<compile_context>
chip_gen: v7x
topology: tpu7x:2x2x1
jax: 0.10.0
libtpu: 0.0.40
codegen_flags: <defaults>
</compile_context>

<pallas_src>
import functools

import jax
import jax.numpy as jnp
from jax import lax
from jax.experimental import pallas as pl
from jax.experimental.pallas import tpu as pltpu

LANE = 128  # TPU lane width (last dim of a vreg)


def _round_up(n, m):
    return ((n + m - 1) // m) * m


# -----------------------------------------------------------------------------
# Kernel
# -----------------------------------------------------------------------------
def _make_lstm_kernel(num_layers, B, T, Hp):
    """Builds a Pallas kernel closure for fixed static sizes."""

    def kernel(*refs):
        # refs: x, (w_ih, w_hh, b) * num_layers, fc1_w, fc1_b, fc2_w, fc2_b, out
        x_ref = refs[0]                                    # (B, T, F) f32
        idx = 1
        layers = []
        for _ in range(num_layers):
            layers.append((refs[idx], refs[idx + 1], refs[idx + 2]))
            idx += 3
        fc1_w_ref, fc1_b_ref, fc2_w_ref, fc2_b_ref = refs[idx : idx + 4]
        out_ref = refs[idx + 4]                            # (B, OUTP)

        F = x_ref.shape[-1]
        w_ih0_ref, _, b0_ref = layers[0]

        # ---- Hoisted layer-0 input projection: ONE MXU matmul for all T steps
        #      (bf16 feed, f32 accumulate).  Reshapes are tile-granular -> layout-free.
        x2 = x_ref[...].reshape(B * T, F).astype(w_ih0_ref.dtype)
        proj0 = (
            jnp.dot(x2, w_ih0_ref[...], preferred_element_type=jnp.float32)
            + b0_ref[...]
        ).reshape(B, T, 4 * Hp)                            # batch-major (b, t) rows

        def lstm_cell(z, c_prev):
            # Gates packed [i | f | o | g]: one sigmoid over the 3 sigmoid gates,
            # one tanh over the candidate gate (merged nonlinearities per review).
            sig = jax.nn.sigmoid(z[:, : 3 * Hp])
            g = jnp.tanh(z[:, 3 * Hp :])
            i_g = sig[:, 0 * Hp : 1 * Hp]
            f_g = sig[:, 1 * Hp : 2 * Hp]
            o_g = sig[:, 2 * Hp : 3 * Hp]
            c_new = f_g * c_prev + i_g * g
            h_new = o_g * jnp.tanh(c_new)
            return h_new, c_new

        h = [jnp.zeros((B, Hp), jnp.float32) for _ in range(num_layers)]
        c = [jnp.zeros((B, Hp), jnp.float32) for _ in range(num_layers)]

        # ---- Cross-layer wavefront (fully unrolled; T and num_layers are small
        #      & static).  At wave w, layer k advances step t = w - k and only
        #      consumes wave-(w-1) values (h_prev), so the num_layers per-wave
        #      work streams are independent and can overlap on MXU/EUP/VPU.
        # TODO(synk): if T or num_layers grows, cap the unroll with
        #             lax.fori_loop(..., unroll=4) instead of a full Python unroll.
        for w in range(T + num_layers - 1):
            h_prev = list(h)
            c_prev = list(c)
            for k in range(num_layers):
                t = w - k
                if t < 0 or t >= T:
                    continue
                w_ih_ref, w_hh_ref, b_ref = layers[k]
                if k == 0:
                    zin = proj0[:, t, :]                   # hoisted projection (bias folded)
                else:
                    # Per-step input projection from the layer below (bf16 feed).
                    zin = (
                        jnp.dot(
                            h_prev[k - 1].astype(w_ih_ref.dtype),
                            w_ih_ref[...],
                            preferred_element_type=jnp.float32,
                        )
                        + b_ref[...]
                    )
                # Recurrent path stays f32 (accuracy-critical).
                z = zin + jnp.dot(
                    h_prev[k], w_hh_ref[...], preferred_element_type=jnp.float32
                )
                h[k], c[k] = lstm_cell(z, c_prev[k])

        # ---- FC head on the last timestep of the last layer.
        # TODO(synk): dropout is identity (eval mode); no stochastic masking in-kernel.
        last_h = h[num_layers - 1]
        y = (
            jnp.dot(
                last_h.astype(fc1_w_ref.dtype),
                fc1_w_ref[...],
                preferred_element_type=jnp.float32,
            )
            + fc1_b_ref[...]
        )
        y = jnp.maximum(y, 0.0)
        y = (
            jnp.dot(
                y.astype(fc2_w_ref.dtype),
                fc2_w_ref[...],
                preferred_element_type=jnp.float32,
            )
            + fc2_b_ref[...]
        )
        out_ref[...] = jax.nn.sigmoid(y)                   # (B, OUTP), column 0 is the real output

    return kernel


# -----------------------------------------------------------------------------
# One-time weight repacking (outside the per-call path)
# -----------------------------------------------------------------------------
def prepare_params(params, *, feature_size, hidden_size, linear_size, num_layers,
                   mxu_dtype=jnp.bfloat16):
    """Transpose to (in, 4H), fold b_ih+b_hh, repack gates to [i|f|o|g], pad each
    gate / hidden / linear dim to full 128-lane vregs, and cast the non-recurrent
    weights to bf16 for the MXU.  Done ONCE, not per forward call."""
    F, H, L = feature_size, hidden_size, linear_size
    Hp = _round_up(H, LANE)
    Lp = _round_up(L, LANE)
    OUTP = LANE  # lane-dense output slab; column 0 holds the real logit
    # PyTorch gate row order is (i, f, g, o); destination slot order is (i, f, o, g)
    # so the three sigmoid gates are contiguous and the tanh gate is last.
    gate_src = (0, 1, 3, 2)

    def pack_w(w, in_dim, in_pad, dtype):
        wt = jnp.transpose(w).astype(jnp.float32)          # (in_dim, 4H)
        out = jnp.zeros((in_pad, 4 * Hp), jnp.float32)
        for dst, src in enumerate(gate_src):
            out = out.at[:in_dim, dst * Hp : dst * Hp + H].set(wt[:, src * H : (src + 1) * H])
        return out.astype(dtype)

    def pack_b(b):
        out = jnp.zeros((1, 4 * Hp), jnp.float32)
        for dst, src in enumerate(gate_src):
            out = out.at[0, dst * Hp : dst * Hp + H].set(b[src * H : (src + 1) * H].astype(jnp.float32))
        return out

    prepared = []
    for k in range(num_layers):
        in_k = F if k == 0 else H
        in_pad = F if k == 0 else Hp        # layer 0 consumes raw (B*T, F) rows -> keep true F
        prepared.append(pack_w(params[f"w_ih_{k}"], in_k, in_pad, mxu_dtype))   # bf16 feed
        prepared.append(pack_w(params[f"w_hh_{k}"], H, Hp, jnp.float32))        # recurrent: f32
        prepared.append(pack_b(params[f"b_ih_{k}"] + params[f"b_hh_{k}"]))

    fc1_w = jnp.zeros((Hp, Lp), jnp.float32).at[:H, :L].set(
        jnp.transpose(params["fc1_w"]).astype(jnp.float32)).astype(mxu_dtype)
    fc1_b = jnp.zeros((1, Lp), jnp.float32).at[0, :L].set(params["fc1_b"].astype(jnp.float32))
    fc2_w = jnp.zeros((Lp, OUTP), jnp.float32).at[:L, 0].set(
        params["fc2_w"][0].astype(jnp.float32)).astype(mxu_dtype)
    fc2_b = jnp.zeros((1, OUTP), jnp.float32).at[0, 0].set(params["fc2_b"][0].astype(jnp.float32))
    prepared += [fc1_w, fc1_b, fc2_w, fc2_b]
    return tuple(prepared)


# -----------------------------------------------------------------------------
# Forward wrapper
# -----------------------------------------------------------------------------
@functools.partial(jax.jit, static_argnames=("num_layers",))
def lstm_model_forward(x, prepared, *, num_layers):
    """x: (B, T, F) float32.  prepared: output of prepare_params.  Returns (B,)."""
    B, T, _ = x.shape
    Hp = prepared[1].shape[0]          # w_hh_0 is (Hp, 4*Hp)
    OUTP = prepared[-2].shape[1]       # padded output width

    kernel = _make_lstm_kernel(num_layers, B, T, Hp)
    vmem = pl.BlockSpec(memory_space=pltpu.MemorySpace.VMEM)
    n_in = 1 + 3 * num_layers + 4

    # TODO(synk): for real batches (B >= 16) add a batch-tile grid axis with
    # dimension_semantics=("parallel",) so v7x's 2 TensorCores split the batch,
    # and set vmem_limit_bytes explicitly; at these shapes everything fits in VMEM
    # of every generation (no large proj scratch remains after the wavefront rewrite).
    out = pl.pallas_call(
        kernel,
        out_shape=jax.ShapeDtypeStruct((B, OUTP), jnp.float32),
        in_specs=[vmem] * n_in,
        out_specs=vmem,
    )(x.astype(jnp.float32), *prepared)
    return out[:, 0]  # squeeze(-1) -> (B,)


# -----------------------------------------------------------------------------
# Deterministic parameter init (PyTorch-style uniform(-1/sqrt(H), 1/sqrt(H)))
# -----------------------------------------------------------------------------
def init_params(key, feature_size, hidden_size, linear_size, num_layers):
    H, L, F = hidden_size, linear_size, feature_size
    params = {}
    bound = 1.0 / jnp.sqrt(jnp.float32(H))

    def u(key, shape, b):
        return jax.random.uniform(key, shape, jnp.float32, -b, b)

    keys = jax.random.split(key, 4 * num_layers + 4)
    ki = 0
    for k in range(num_layers):
        in_k = F if k == 0 else H
        params[f"w_ih_{k}"] = u(keys[ki + 0], (4 * H, in_k), bound)
        params[f"w_hh_{k}"] = u(keys[ki + 1], (4 * H, H), bound)
        params[f"b_ih_{k}"] = u(keys[ki + 2], (4 * H,), bound)
        params[f"b_hh_{k}"] = u(keys[ki + 3], (4 * H,), bound)
        ki += 4
    b1 = 1.0 / jnp.sqrt(jnp.float32(H))
    b2 = 1.0 / jnp.sqrt(jnp.float32(L))
    params["fc1_w"] = u(keys[ki + 0], (L, H), b1)
    params["fc1_b"] = u(keys[ki + 1], (L,), b1)
    params["fc2_w"] = u(keys[ki + 2], (1, L), b2)
    params["fc2_b"] = u(keys[ki + 3], (1,), b2)
    return params


# -----------------------------------------------------------------------------
# Pure-JAX reference (correctness check, original unpadded f32 params)
# -----------------------------------------------------------------------------
def reference_forward(x, params, num_layers, H, L):
    B, T, F = x.shape
    seq = x
    for k in range(num_layers):
        w_ih = params[f"w_ih_{k}"]
        w_hh = params[f"w_hh_{k}"]
        b = params[f"b_ih_{k}"] + params[f"b_hh_{k}"]

        def step(carry, x_t):
            h, c = carry
            z = x_t @ w_ih.T + h @ w_hh.T + b
            i = jax.nn.sigmoid(z[:, 0 * H : 1 * H])
            f = jax.nn.sigmoid(z[:, 1 * H : 2 * H])
            g = jnp.tanh(z[:, 2 * H : 3 * H])
            o = jax.nn.sigmoid(z[:, 3 * H : 4 * H])
            c = f * c + i * g
            h = o * jnp.tanh(c)
            return (h, c), h

        init = (jnp.zeros((B, H), jnp.float32), jnp.zeros((B, H), jnp.float32))
        _, hs = lax.scan(step, init, jnp.transpose(seq, (1, 0, 2)))
        seq = jnp.transpose(hs, (1, 0, 2))
    last = seq[:, -1, :]
    y = jnp.maximum(last @ params["fc1_w"].T + params["fc1_b"], 0.0)
    y = jax.nn.sigmoid(y @ params["fc2_w"].T + params["fc2_b"])
    return y[:, 0]


# -----------------------------------------------------------------------------
if __name__ == "__main__":
    # Small config consistent with the module: feature_size=4, hidden=32,
    # linear=16, num_layers=2, batch=2, seq=8.
    B, T, F = 2, 8, 4
    H, L, NUM_LAYERS = 32, 16, 2

    key = jax.random.PRNGKey(0)
    kx, kp = jax.random.split(key)
    x = jax.random.normal(kx, (B, T, F), jnp.float32)
    params = init_params(kp, F, H, L, NUM_LAYERS)

    prepared = prepare_params(
        params, feature_size=F, hidden_size=H, linear_size=L, num_layers=NUM_LAYERS
    )

    out = jax.block_until_ready(lstm_model_forward(x, prepared, num_layers=NUM_LAYERS))
    ref = reference_forward(x, params, NUM_LAYERS, H, L)

    assert out.shape == (B,)
    # Non-recurrent weights are fed to the MXU in bf16 (per the perf review); the
    # recurrent W_hh / h / c path stays f32, so ~1e-3-level deviation from the
    # pure-f32 reference is expected and bounded.
    assert jnp.allclose(out, ref, atol=5e-3, rtol=5e-3), (out, ref)

    print("KERNEL_OK")
</pallas_src>

<mosaic_0001>
module attributes {stable_mosaic.version = 11 : i64} {
  func.func @kernel(%arg0: memref<2x8x4xf32, #tpu.memory_space<vmem>>, %arg1: memref<4x512xbf16, #tpu.memory_space<vmem>>, %arg2: memref<128x512xf32, #tpu.memory_space<vmem>>, %arg3: memref<1x512xf32, #tpu.memory_space<vmem>>, %arg4: memref<128x512xbf16, #tpu.memory_space<vmem>>, %arg5: memref<128x512xf32, #tpu.memory_space<vmem>>, %arg6: memref<1x512xf32, #tpu.memory_space<vmem>>, %arg7: memref<128x128xbf16, #tpu.memory_space<vmem>>, %arg8: memref<1x128xf32, #tpu.memory_space<vmem>>, %arg9: memref<128x128xbf16, #tpu.memory_space<vmem>>, %arg10: memref<1x128xf32, #tpu.memory_space<vmem>>, %arg11: memref<2x128xf32, #tpu.memory_space<vmem>>) attributes {dimension_semantics = [], scalar_prefetch = 0 : i64, scratch_operands = 0 : i64, tpu.core_type = #tpu.core_type<tc>} {
    %c0 = arith.constant 0 : index
    %c0_0 = arith.constant 0 : index
    %c0_1 = arith.constant 0 : index
    %0 = vector.load %arg0[%c0, %c0_0, %c0_1] : memref<2x8x4xf32, #tpu.memory_space<vmem>>, vector<2x8x4xf32>
    %1 = vector.shape_cast %0 : vector<2x8x4xf32> to vector<16x4xf32>
    %2 = arith.truncf %1 : vector<16x4xf32> to vector<16x4xbf16>
    %c0_2 = arith.constant 0 : index
    %c0_3 = arith.constant 0 : index
    %3 = vector.load %arg1[%c0_2, %c0_3] : memref<4x512xbf16, #tpu.memory_space<vmem>>, vector<4x512xbf16>
    %cst = arith.constant dense<0.000000e+00> : vector<16x512xf32>
    %4 = tpu.matmul %2, %3, %cst {dimension_numbers = #tpu.dot_dimension_numbers<[1], [0], [0], [1], [0, 0, 1, 1], [], []>} : vector<16x4xbf16>, vector<4x512xbf16>, vector<16x512xf32> -> vector<16x512xf32>
    %c0_4 = arith.constant 0 : index
    %c0_5 = arith.constant 0 : index
    %5 = vector.load %arg3[%c0_4, %c0_5] : memref<1x512xf32, #tpu.memory_space<vmem>>, vector<1x512xf32>
    %6 = vector.broadcast %5 : vector<1x512xf32> to vector<16x512xf32>
    %7 = arith.addf %4, %6 : vector<16x512xf32>
    %8 = vector.shape_cast %7 : vector<16x512xf32> to vector<2x8x512xf32>
    %cst_6 = arith.constant 0.000000e+00 : f32
    %9 = vector.broadcast %cst_6 : f32 to vector<2x128xf32>
    %cst_7 = arith.constant 0.000000e+00 : f32
    %10 = vector.broadcast %cst_7 : f32 to vector<2x128xf32>
    %cst_8 = arith.constant 0.000000e+00 : f32
    %11 = vector.broadcast %cst_8 : f32 to vector<2x128xf32>
    %cst_9 = arith.constant 0.000000e+00 : f32
    %12 = vector.broadcast %cst_9 : f32 to vector<2x128xf32>
    %13 = vector.extract_strided_slice %8 {offsets = [0, 0, 0], sizes = [2, 1, 512], strides = [1, 1, 1]} : vector<2x8x512xf32> to vector<2x1x512xf32>
    %14 = vector.shape_cast %13 : vector<2x1x512xf32> to vector<2x512xf32>
    %c0_10 = arith.constant 0 : index
    %c0_11 = arith.constant 0 : index
    %15 = vector.load %arg2[%c0_10, %c0_11] : memref<128x512xf32, #tpu.memory_space<vmem>>, vector<128x512xf32>
    %cst_12 = arith.constant dense<0.000000e+00> : vector<2x512xf32>
    %16 = tpu.matmul %9, %15, %cst_12 {dimension_numbers = #tpu.dot_dimension_numbers<[1], [0], [0], [1], [0, 0, 1, 1], [], []>} : vector<2x128xf32>, vector<128x512xf32>, vector<2x512xf32> -> vector<2x512xf32>
    %17 = arith.addf %14, %16 : vector<2x512xf32>
    %18 = vector.extract_strided_slice %17 {offsets = [0, 0], sizes = [2, 384], strides = [1, 1]} : vector<2x512xf32> to vector<2x384xf32>
    %19 = arith.negf %18 : vector<2x384xf32>
    %20 = math.exp %19 : vector<2x384xf32>
    %cst_13 = arith.constant 1.000000e+00 : f32
    %21 = vector.broadcast %cst_13 : f32 to vector<2x384xf32>
    %22 = arith.addf %21, %20 : vector<2x384xf32>
    %23 = arith.divf %21, %22 : vector<2x384xf32>
    %24 = vector.extract_strided_slice %17 {offsets = [0, 384], sizes = [2, 128], strides = [1, 1]} : vector<2x512xf32> to vector<2x128xf32>
    %25 = math.tanh %24 : vector<2x128xf32>
    %26 = vector.extract_strided_slice %23 {offsets = [0, 0], sizes = [2, 128], strides = [1, 1]} : vector<2x384xf32> to vector<2x128xf32>
    %27 = vector.extract_strided_slice %23 {offsets = [0, 128], sizes = [2, 128], strides = [1, 1]} : vector<2x384xf32> to vector<2x128xf32>
    %28 = vector.extract_strided_slice %23 {offsets = [0, 256], sizes = [2, 128], strides = [1, 1]} : vector<2x384xf32> to vector<2x128xf32>
    %29 = arith.mulf %27, %11 : vector<2x128xf32>
    %30 = arith.mulf %26, %25 : vector<2x128xf32>
    %31 = arith.addf %29, %30 : vector<2x128xf32>
    %32 = math.tanh %31 : vector<2x128xf32>
    %33 = arith.mulf %28, %32 : vector<2x128xf32>
    %34 = vector.extract_strided_slice %8 {offsets = [0, 1, 0], sizes = [2, 1, 512], strides = [1, 1, 1]} : vector<2x8x512xf32> to vector<2x1x512xf32>
    %35 = vector.shape_cast %34 : vector<2x1x512xf32> to vector<2x512xf32>
    %c0_14 = arith.constant 0 : index
    %c0_15 = arith.constant 0 : index
    %36 = vector.load %arg2[%c0_14, %c0_15] : memref<128x512xf32, #tpu.memory_space<vmem>>, vector<128x512xf32>
    %cst_16 = arith.constant dense<0.000000e+00> : vector<2x512xf32>
    %37 = tpu.matmul %33, %36, %cst_16 {dimension_numbers = #tpu.dot_dimension_numbers<[1], [0], [0], [1], [0, 0, 1, 1], [], []>} : vector<2x128xf32>, vector<128x512xf32>, vector<2x512xf32> -> vector<2x512xf32>
    %38 = arith.addf %35, %37 : vector<2x512xf32>
    %39 = vector.extract_strided_slice %38 {offsets = [0, 0], sizes = [2, 384], strides = [1, 1]} : vector<2x512xf32> to vector<2x384xf32>
    %40 = arith.negf %39 : vector<2x384xf32>
    %41 = math.exp %40 : vector<2x384xf32>
    %cst_17 = arith.constant 1.000000e+00 : f32
    %42 = vector.broadcast %cst_17 : f32 to vector<2x384xf32>
    %43 = arith.addf %42, %41 : vector<2x384xf32>
    %44 = arith.divf %42, %43 : vector<2x384xf32>
    %45 = vector.extract_strided_slice %38 {offsets = [0, 384], sizes = [2, 128], strides = [1, 1]} : vector<2x512xf32> to vector<2x128xf32>
    %46 = math.tanh %45 : vector<2x128xf32>
    %47 = vector.extract_strided_slice %44 {offsets = [0, 0], sizes = [2, 128], strides = [1, 1]} : vector<2x384xf32> to vector<2x128xf32>
    %48 = vector.extract_strided_slice %44 {offsets = [0, 128], sizes = [2, 128], strides = [1, 1]} : vector<2x384xf32> to vector<2x128xf32>
    %49 = vector.extract_strided_slice %44 {offsets = [0, 256], sizes = [2, 128], strides = [1, 1]} : vector<2x384xf32> to vector<2x128xf32>
    %50 = arith.mulf %48, %31 : vector<2x128xf32>
    %51 = arith.mulf %47, %46 : vector<2x128xf32>
    %52 = arith.addf %50, %51 : vector<2x128xf32>
    %53 = math.tanh %52 : vector<2x128xf32>
    %54 = arith.mulf %49, %53 : vector<2x128xf32>
    %55 = arith.truncf %33 : vector<2x128xf32> to vector<2x128xbf16>
    %c0_18 = arith.constant 0 : index
    %c0_19 = arith.constant 0 : index
    %56 = vector.load %arg4[%c0_18, %c0_19] : memref<128x512xbf16, #tpu.memory_space<vmem>>, vector<128x512xbf16>
    %cst_20 = arith.constant dense<0.000000e+00> : vector<2x512xf32>
    %57 = tpu.matmul %55, %56, %cst_20 {dimension_numbers = #tpu.dot_dimension_numbers<[1], [0], [0], [1], [0, 0, 1, 1], [], []>} : vector<2x128xbf16>, vector<128x512xbf16>, vector<2x512xf32> -> vector<2x512xf32>
    %c0_21 = arith.constant 0 : index
    %c0_22 = arith.constant 0 : index
    %58 = vector.load %arg6[%c0_21, %c0_22] : memref<1x512xf32, #tpu.memory_space<vmem>>, vector<1x512xf32>
    %59 = vector.broadcast %58 : vector<1x512xf32> to vector<2x512xf32>
    %60 = arith.addf %57, %59 : vector<2x512xf32>
    %c0_23 = arith.constant 0 : index
    %c0_24 = arith.constant 0 : index
    %61 = vector.load %arg5[%c0_23, %c0_24] : memref<128x512xf32, #tpu.memory_space<vmem>>, vector<128x512xf32>
    %cst_25 = arith.constant dense<0.000000e+00> : vector<2x512xf32>
    %62 = tpu.matmul %10, %61, %cst_25 {dimension_numbers = #tpu.dot_dimension_numbers<[1], [0], [0], [1], [0, 0, 1, 1], [], []>} : vector<2x128xf32>, vector<128x512xf32>, vector<2x512xf32> -> vector<2x512xf32>
    %63 = arith.addf %60, %62 : vector<2x512xf32>
    %64 = vector.extract_strided_slice %63 {offsets = [0, 0], sizes = [2, 384], strides = [1, 1]} : vector<2x512xf32> to vector<2x384xf32>
    %65 = arith.negf %64 : vector<2x384xf32>
    %66 = math.exp %65 : vector<2x384xf32>
    %cst_26 = arith.constant 1.000000e+00 : f32
    %67 = vector.broadcast %cst_26 : f32 to vector<2x384xf32>
    %68 = arith.addf %67, %66 : vector<2x384xf32>
    %69 = arith.divf %67, %68 : vector<2x384xf32>
    %70 = vector.extract_strided_slice %63 {offsets = [0, 384], sizes = [2, 128], strides = [1, 1]} : vector<2x512xf32> to vector<2x128xf32>
    %71 = math.tanh %70 : vector<2x128xf32>
    %72 = vector.extract_strided_slice %69 {offsets = [0, 0], sizes = [2, 128], strides = [1, 1]} : vector<2x384xf32> to vector<2x128xf32>
    %73 = vector.extract_strided_slice %69 {offsets = [0, 128], sizes = [2, 128], strides = [1, 1]} : vector<2x384xf32> to vector<2x128xf32>
    %74 = vector.extract_strided_slice %69 {offsets = [0, 256], sizes = [2, 128], strides = [1, 1]} : vector<2x384xf32> to vector<2x128xf32>
    %75 = arith.mulf %73, %12 : vector<2x128xf32>
    %76 = arith.mulf %72, %71 : vector<2x128xf32>
    %77 = arith.addf %75, %76 : vector<2x128xf32>
    %78 = math.tanh %77 : vector<2x128xf32>
    %79 = arith.mulf %74, %78 : vector<2x128xf32>
    %80 = vector.extract_strided_slice %8 {offsets = [0, 2, 0], sizes = [2, 1, 512], strides = [1, 1, 1]} : vector<2x8x512xf32> to vector<2x1x512xf32>
    %81 = vector.shape_cast %80 : vector<2x1x512xf32> to vector<2x512xf32>
    %c0_27 = arith.constant 0 : index
    %c0_28 = arith.constant 0 : index
    %82 = vector.load %arg2[%c0_27, %c0_28] : memref<128x512xf32, #tpu.memory_space<vmem>>, vector<128x512xf32>
    %cst_29 = arith.constant dense<0.000000e+00> : vector<2x512xf32>
    %83 = tpu.matmul %54, %82, %cst_29 {dimension_numbers = #tpu.dot_dimension_numbers<[1], [0], [0], [1], [0, 0, 1, 1], [], []>} : vector<2x128xf32>, vector<128x512xf32>, vector<2x512xf32> -> vector<2x512xf32>
    %84 = arith.addf %81, %83 : vector<2x512xf32>
    %85 = vector.extract_strided_slice %84 {offsets = [0, 0], sizes = [2, 384], strides = [1, 1]} : vector<2x512xf32> to vector<2x384xf32>
    %86 = arith.negf %85 : vector<2x384xf32>
    %87 = math.exp %86 : vector<2x384xf32>
    %cst_30 = arith.constant 1.000000e+00 : f32
    %88 = vector.broadcast %cst_30 : f32 to vector<2x384xf32>
    %89 = arith.addf %88, %87 : vector<2x384xf32>
    %90 = arith.divf %88, %89 : vector<2x384xf32>
    %91 = vector.extract_strided_slice %84 {offsets = [0, 384], sizes = [2, 128], strides = [1, 1]} : vector<2x512xf32> to vector<2x128xf32>
    %92 = math.tanh %91 : vector<2x128xf32>
    %93 = vector.extract_strided_slice %90 {offsets = [0, 0], sizes = [2, 128], strides = [1, 1]} : vector<2x384xf32> to vector<2x128xf32>
    %94 = vector.extract_strided_slice %90 {offsets = [0, 128], sizes = [2, 128], strides = [1, 1]} : vector<2x384xf32> to vector<2x128xf32>
    %95 = vector.extract_strided_slice %90 {offsets = [0, 256], sizes = [2, 128], strides = [1, 1]} : vector<2x384xf32> to vector<2x128xf32>
    %96 = arith.mulf %94, %52 : vector<2x128xf32>
    %97 = arith.mulf %93, %92 : vector<2x128xf32>
    %98 = arith.addf %96, %97 : vector<2x128xf32>
    %99 = math.tanh %98 : vector<2x128xf32>
    %100 = arith.mulf %95, %99 : vector<2x128xf32>
    %101 = arith.truncf %54 : vector<2x128xf32> to vector<2x128xbf16>
    %c0_31 = arith.constant 0 : index
    %c0_32 = arith.constant 0 : index
    %102 = vector.load %arg4[%c0_31, %c0_32] : memref<128x512xbf16, #tpu.memory_space<vmem>>, vector<128x512xbf16>
    %cst_33 = arith.constant dense<0.000000e+00> : vector<2x512xf32>
    %103 = tpu.matmul %101, %102, %cst_33 {dimension_numbers = #tpu.dot_dimension_numbers<[1], [0], [0], [1], [0, 0, 1, 1], [], []>} : vector<2x128xbf16>, vector<128x512xbf16>, vector<2x512xf32> -> vector<2x512xf32>
    %c0_34 = arith.constant 0 : index
    %c0_35 = arith.constant 0 : index
    %104 = vector.load %arg6[%c0_34, %c0_35] : memref<1x512xf32, #tpu.memory_space<vmem>>, vector<1x512xf32>
    %105 = vector.broadcast %104 : vector<1x512xf32> to vector<2x512xf32>
    %106 = arith.addf %103, %105 : vector<2x512xf32>
    %c0_36 = arith.constant 0 : index
    %c0_37 = arith.constant 0 : index
    %107 = vector.load %arg5[%c0_36, %c0_37] : memref<128x512xf32, #tpu.memory_space<vmem>>, vector<128x512xf32>
    %cst_38 = arith.constant dense<0.000000e+00> : vector<2x512xf32>
    %108 = tpu.matmul %79, %107, %cst_38 {dimension_numbers = #tpu.dot_dimension_numbers<[1], [0], [0], [1], [0, 0, 1, 1], [], []>} : vector<2x128xf32>, vector<128x512xf32>, vector<2x512xf32> -> vector<2x512xf32>
    %109 = arith.addf %106, %108 : vector<2x512xf32>
    %110 = vector.extract_strided_slice %109 {offsets = [0, 0], sizes = [2, 384], strides = [1, 1]} : vector<2x512xf32> to vector<2x384xf32>
    %111 = arith.negf %110 : vector<2x384xf32>
    %112 = math.exp %111 : vector<2x384xf32>
    %cst_39 = arith.constant 1.000000e+00 : f32
    %113 = vector.broadcast %cst_39 : f32 to vector<2x384xf32>
    %114 = arith.addf %113, %112 : vector<2x384xf32>
    %115 = arith.divf %113, %114 : vector<2x384xf32>
    %116 = vector.extract_strided_slice %109 {offsets = [0, 384], sizes = [2, 128], strides = [1, 1]} : vector<2x512xf32> to vector<2x128xf32>
    %117 = math.tanh %116 : vector<2x128xf32>
    %118 = vector.extract_strided_slice %115 {offsets = [0, 0], sizes = [2, 128], strides = [1, 1]} : vector<2x384xf32> to vector<2x128xf32>
    %119 = vector.extract_strided_slice %115 {offsets = [0, 128], sizes = [2, 128], strides = [1, 1]} : vector<2x384xf32> to vector<2x128xf32>
    %120 = vector.extract_strided_slice %115 {offsets = [0, 256], sizes = [2, 128], strides = [1, 1]} : vector<2x384xf32> to vector<2x128xf32>
    %121 = arith.mulf %119, %77 : vector<2x128xf32>
    %122 = arith.mulf %118, %117 : vector<2x128xf32>
    %123 = arith.addf %121, %122 : vector<2x128xf32>
    %124 = math.tanh %123 : vector<2x128xf32>
    %125 = arith.mulf %120, %124 : vector<2x128xf32>
    %126 = vector.extract_strided_slice %8 {offsets = [0, 3, 0], sizes = [2, 1, 512], strides = [1, 1, 1]} : vector<2x8x512xf32> to vector<2x1x512xf32>
    %127 = vector.shape_cast %126 : vector<2x1x512xf32> to vector<2x512xf32>
    %c0_40 = arith.constant 0 : index
    %c0_41 = arith.constant 0 : index
    %128 = vector.load %arg2[%c0_40, %c0_41] : memref<128x512xf32, #tpu.memory_space<vmem>>, vector<128x512xf32>
    %cst_42 = arith.constant dense<0.000000e+00> : vector<2x512xf32>
    %129 = tpu.matmul %100, %128, %cst_42 {dimension_numbers = #tpu.dot_dimension_numbers<[1], [0], [0], [1], [0, 0, 1, 1], [], []>} : vector<2x128xf32>, vector<128x512xf32>, vector<2x512xf32> -> vector<2x512xf32>
    %130 = arith.addf %127, %129 : vector<2x512xf32>
    %131 = vector.extract_strided_slice %130 {offsets = [0, 0], sizes = [2, 384], strides = [1, 1]} : vector<2x512xf32> to vector<2x384xf32>
    %132 = arith.negf %131 : vector<2x384xf32>
    %133 = math.exp %132 : vector<2x384xf32>
    %cst_43 = arith.constant 1.000000e+00 : f32
    %134 = vector.broadcast %cst_43 : f32 to vector<2x384xf32>
    %135 = arith.addf %134, %133 : vector<2x384xf32>
    %136 = arith.divf %134, %135 : vector<2x384xf32>
    %137 = vector.extract_strided_slice %130 {offsets = [0, 384], sizes = [2, 128], strides = [1, 1]} : vector<2x512xf32> to vector<2x128xf32>
    %138 = math.tanh %137 : vector<2x128xf32>
    %139 = vector.extract_strided_slice %136 {offsets = [0, 0], sizes = [2, 128], strides = [1, 1]} : vector<2x384xf32> to vector<2x128xf32>
    %140 = vector.extract_strided_slice %136 {offsets = [0, 128], sizes = [2, 128], strides = [1, 1]} : vector<2x384xf32> to vector<2x128xf32>
    %141 = vector.extract_strided_slice %136 {offsets = [0, 256], sizes = [2, 128], strides = [1, 1]} : vector<2x384xf32> to vector<2x128xf32>
    %142 = arith.mulf %140, %98 : vector<2x128xf32>
    %143 = arith.mulf %139, %138 : vector<2x128xf32>
    %144 = arith.addf %142, %143 : vector<2x128xf32>
    %145 = math.tanh %144 : vector<2x128xf32>
    %146 = arith.mulf %141, %145 : vector<2x128xf32>
    %147 = arith.truncf %100 : vector<2x128xf32> to vector<2x128xbf16>
    %c0_44 = arith.constant 0 : index
    %c0_45 = arith.constant 0 : index
    %148 = vector.load %arg4[%c0_44, %c0_45] : memref<128x512xbf16, #tpu.memory_space<vmem>>, vector<128x512xbf16>
    %cst_46 = arith.constant dense<0.000000e+00> : vector<2x512xf32>
    %149 = tpu.matmul %147, %148, %cst_46 {dimension_numbers = #tpu.dot_dimension_numbers<[1], [0], [0], [1], [0, 0, 1, 1], [], []>} : vector<2x128xbf16>, vector<128x512xbf16>, vector<2x512xf32> -> vector<2x512xf32>
    %c0_47 = arith.constant 0 : index
    %c0_48 = arith.constant 0 : index
    %150 = vector.load %arg6[%c0_47, %c0_48] : memref<1x512xf32, #tpu.memory_space<vmem>>, vector<1x512xf32>
    %151 = vector.broadcast %150 : vector<1x512xf32> to vector<2x512xf32>
    %152 = arith.addf %149, %151 : vector<2x512xf32>
    %c0_49 = arith.constant 0 : index
    %c0_50 = arith.constant 0 : index
    %153 = vector.load %arg5[%c0_49, %c0_50] : memref<128x512xf32, #tpu.memory_space<vmem>>, vector<128x512xf32>
    %cst_51 = arith.constant dense<0.000000e+00> : vector<2x512xf32>
    %154 = tpu.matmul %125, %153, %cst_51 {dimension_numbers = #tpu.dot_dimension_numbers<[1], [0], [0], [1], [0, 0, 1, 1], [], []>} : vector<2x128xf32>, vector<128x512xf32>, vector<2x512xf32> -> vector<2x512xf32>
    %155 = arith.addf %152, %154 : vector<2x512xf32>
    %156 = vector.extract_strided_slice %155 {offsets = [0, 0], sizes = [2, 384], strides = [1, 1]} : vector<2x512xf32> to vector<2x384xf32>
    %157 = arith.negf %156 : vector<2x384xf32>
    %158 = math.exp %157 : vector<2x384xf32>
    %cst_52 = arith.constant 1.000000e+00 : f32
    %159 = vector.broadcast %cst_52 : f32 to vector<2x384xf32>
    %160 = arith.addf %159, %158 : vector<2x384xf32>
    %161 = arith.divf %159, %160 : vector<2x384xf32>
    %162 = vector.extract_strided_slice %155 {offsets = [0, 384], sizes = [2, 128], strides = [1, 1]} : vector<2x512xf32> to vector<2x128xf32>
    %163 = math.tanh %162 : vector<2x128xf32>
    %164 = vector.extract_strided_slice %161 {offsets = [0, 0], sizes = [2, 128], strides = [1, 1]} : vector<2x384xf32> to vector<2x128xf32>
    %165 = vector.extract_strided_slice %161 {offsets = [0, 128], sizes = [2, 128], strides = [1, 1]} : vector<2x384xf32> to vector<2x128xf32>
    %166 = vector.extract_strided_slice %161 {offsets = [0, 256], sizes = [2, 128], strides = [1, 1]} : vector<2x384xf32> to vector<2x128xf32>
    %167 = arith.mulf %165, %123 : vector<2x128xf32>
    %168 = arith.mulf %164, %163 : vector<2x128xf32>
    %169 = arith.addf %167, %168 : vector<2x128xf32>
    %170 = math.tanh %169 : vector<2x128xf32>
    %171 = arith.mulf %166, %170 : vector<2x128xf32>
    %172 = vector.extract_strided_slice %8 {offsets = [0, 4, 0], sizes = [2, 1, 512], strides = [1, 1, 1]} : vector<2x8x512xf32> to vector<2x1x512xf32>
    %173 = vector.shape_cast %172 : vector<2x1x512xf32> to vector<2x512xf32>
    %c0_53 = arith.constant 0 : index
    %c0_54 = arith.constant 0 : index
    %174 = vector.load %arg2[%c0_53, %c0_54] : memref<128x512xf32, #tpu.memory_space<vmem>>, vector<128x512xf32>
    %cst_55 = arith.constant dense<0.000000e+00> : vector<2x512xf32>
    %175 = tpu.matmul %146, %174, %cst_55 {dimension_numbers = #tpu.dot_dimension_numbers<[1], [0], [0], [1], [0, 0, 1, 1], [], []>} : vector<2x128xf32>, vector<128x512xf32>, vector<2x512xf32> -> vector<2x512xf32>
    %176 = arith.addf %173, %175 : vector<2x512xf32>
    %177 = vector.extract_strided_slice %176 {offsets = [0, 0], sizes = [2, 384], strides = [1, 1]} : vector<2x512xf32> to vector<2x384xf32>
    %178 = arith.negf %177 : vector<2x384xf32>
    %179 = math.exp %178 : vector<2x384xf32>
    %cst_56 = arith.constant 1.000000e+00 : f32
    %180 = vector.broadcast %cst_56 : f32 to vector<2x384xf32>
    %181 = arith.addf %180, %179 : vector<2x384xf32>
    %182 = arith.divf %180, %181 : vector<2x384xf32>
    %183 = vector.extract_strided_slice %176 {offsets = [0, 384], sizes = [2, 128], strides = [1, 1]} : vector<2x512xf32> to vector<2x128xf32>
    %184 = math.tanh %183 : vector<2x128xf32>
    %185 = vector.extract_strided_slice %182 {offsets = [0, 0], sizes = [2, 128], strides = [1, 1]} : vector<2x384xf32> to vector<2x128xf32>
    %186 = vector.extract_strided_slice %182 {offsets = [0, 128], sizes = [2, 128], strides = [1, 1]} : vector<2x384xf32> to vector<2x128xf32>
    %187 = vector.extract_strided_slice %182 {offsets = [0, 256], sizes = [2, 128], strides = [1, 1]} : vector<2x384xf32> to vector<2x128xf32>
    %188 = arith.mulf %186, %144 : vector<2x128xf32>
    %189 = arith.mulf %185, %184 : vector<2x128xf32>
    %190 = arith.addf %188, %189 : vector<2x128xf32>
    %191 = math.tanh %190 : vector<2x128xf32>
    %192 = arith.mulf %187, %191 : vector<2x128xf32>
    %193 = arith.truncf %146 : vector<2x128xf32> to vector<2x128xbf16>
    %c0_57 = arith.constant 0 : index
    %c0_58 = arith.constant 0 : index
    %194 = vector.load %arg4[%c0_57, %c0_58] : memref<128x512xbf16, #tpu.memory_space<vmem>>, vector<128x512xbf16>
    %cst_59 = arith.constant dense<0.000000e+00> : vector<2x512xf32>
    %195 = tpu.matmul %193, %194, %cst_59 {dimension_numbers = #tpu.dot_dimension_numbers<[1], [0], [0], [1], [0, 0, 1, 1], [], []>} : vector<2x128xbf16>, vector<128x512xbf16>, vector<2x512xf32> -> vector<2x512xf32>
    %c0_60 = arith.constant 0 : index
    %c0_61 = arith.constant 0 : index
    %196 = vector.load %arg6[%c0_60, %c0_61] : memref<1x512xf32, #tpu.memory_space<vmem>>, vector<1x512xf32>
    %197 = vector.broadcast %196 : vector<1x512xf32> to vector<2x512xf32>
    %198 = arith.addf %195, %197 : vector<2x512xf32>
    %c0_62 = arith.constant 0 : index
    %c0_63 = arith.constant 0 : index
    %199 = vector.load %arg5[%c0_62, %c0_63] : memref<128x512xf32, #tpu.memory_space<vmem>>, vector<128x512xf32>
    %cst_64 = arith.constant dense<0.000000e+00> : vector<2x512xf32>
    %200 = tpu.matmul %171, %199, %cst_64 {dimension_numbers = #tpu.dot_dimension_numbers<[1], [0], [0], [1], [0, 0, 1, 1], [], []>} : vector<2x128xf32>, vector<128x512xf32>, vector<2x512xf32> -> vector<2x512xf32>
    %201 = arith.addf %198, %200 : vector<2x512xf32>
    %202 = vector.extract_strided_slice %201 {offsets = [0, 0], sizes = [2, 384], strides = [1, 1]} : vector<2x512xf32> to vector<2x384xf32>
    %203 = arith.negf %202 : vector<2x384xf32>
    %204 = math.exp %203 : vector<2x384xf32>
    %cst_65 = arith.constant 1.000000e+00 : f32
    %205 = vector.broadcast %cst_65 : f32 to vector<2x384xf32>
    %206 = arith.addf %205, %204 : vector<2x384xf32>
    %207 = arith.divf %205, %206 : vector<2x384xf32>
    %208 = vector.extract_strided_slice %201 {offsets = [0, 384], sizes = [2, 128], strides = [1, 1]} : vector<2x512xf32> to vector<2x128xf32>
    %209 = math.tanh %208 : vector<2x128xf32>
    %210 = vector.extract_strided_slice %207 {offsets = [0, 0], sizes = [2, 128], strides = [1, 1]} : vector<2x384xf32> to vector<2x128xf32>
    %211 = vector.extract_strided_slice %207 {offsets = [0, 128], sizes = [2, 128], strides = [1, 1]} : vector<2x384xf32> to vector<2x128xf32>
    %212 = vector.extract_strided_slice %207 {offsets = [0, 256], sizes = [2, 128], strides = [1, 1]} : vector<2x384xf32> to vector<2x128xf32>
    %213 = arith.mulf %211, %169 : vector<2x128xf32>
    %214 = arith.mulf %210, %209 : vector<2x128xf32>
    %215 = arith.addf %213, %214 : vector<2x128xf32>
    %216 = math.tanh %215 : vector<2x128xf32>
    %217 = arith.mulf %212, %216 : vector<2x128xf32>
    %218 = vector.extract_strided_slice %8 {offsets = [0, 5, 0], sizes = [2, 1, 512], strides = [1, 1, 1]} : vector<2x8x512xf32> to vector<2x1x512xf32>
    %219 = vector.shape_cast %218 : vector<2x1x512xf32> to vector<2x512xf32>
    %c0_66 = arith.constant 0 : index
    %c0_67 = arith.constant 0 : index
    %220 = vector.load %arg2[%c0_66, %c0_67] : memref<128x512xf32, #tpu.memory_space<vmem>>, vector<128x512xf32>
    %cst_68 = arith.constant dense<0.000000e+00> : vector<2x512xf32>
    %221 = tpu.matmul %192, %220, %cst_68 {dimension_numbers = #tpu.dot_dimension_numbers<[1], [0], [0], [1], [0, 0, 1, 1], [], []>} : vector<2x128xf32>, vector<128x512xf32>, vector<2x512xf32> -> vector<2x512xf32>
    %222 = arith.addf %219, %221 : vector<2x512xf32>
    %223 = vector.extract_strided_slice %222 {offsets = [0, 0], sizes = [2, 384], strides = [1, 1]} : vector<2x512xf32> to vector<2x384xf32>
    %224 = arith.negf %223 : vector<2x384xf32>
    %225 = math.exp %224 : vector<2x384xf32>
    %cst_69 = arith.constant 1.000000e+00 : f32
    %226 = vector.broadcast %cst_69 : f32 to vector<2x384xf32>
    %227 = arith.addf %226, %225 : vector<2x384xf32>
    %228 = arith.divf %226, %227 : vector<2x384xf32>
    %229 = vector.extract_strided_slice %222 {offsets = [0, 384], sizes = [2, 128], strides = [1, 1]} : vector<2x512xf32> to vector<2x128xf32>
    %230 = math.tanh %229 : vector<2x128xf32>
    %231 = vector.extract_strided_slice %228 {offsets = [0, 0], sizes = [2, 128], strides = [1, 1]} : vector<2x384xf32> to vector<2x128xf32>
    %232 = vector.extract_strided_slice %228 {offsets = [0, 128], sizes = [2, 128], strides = [1, 1]} : vector<2x384xf32> to vector<2x128xf32>
    %233 = vector.extract_strided_slice %228 {offsets = [0, 256], sizes = [2, 128], strides = [1, 1]} : vector<2x384xf32> to vector<2x128xf32>
    %234 = arith.mulf %232, %190 : vector<2x128xf32>
    %235 = arith.mulf %231, %230 : vector<2x128xf32>
    %236 = arith.addf %234, %235 : vector<2x128xf32>
    %237 = math.tanh %236 : vector<2x128xf32>
    %238 = arith.mulf %233, %237 : vector<2x128xf32>
    %239 = arith.truncf %192 : vector<2x128xf32> to vector<2x128xbf16>
    %c0_70 = arith.constant 0 : index
    %c0_71 = arith.constant 0 : index
    %240 = vector.load %arg4[%c0_70, %c0_71] : memref<128x512xbf16, #tpu.memory_space<vmem>>, vector<128x512xbf16>
    %cst_72 = arith.constant dense<0.000000e+00> : vector<2x512xf32>
    %241 = tpu.matmul %239, %240, %cst_72 {dimension_numbers = #tpu.dot_dimension_numbers<[1], [0], [0], [1], [0, 0, 1, 1], [], []>} : vector<2x128xbf16>, vector<128x512xbf16>, vector<2x512xf32> -> vector<2x512xf32>
    %c0_73 = arith.constant 0 : index
    %c0_74 = arith.constant 0 : index
    %242 = vector.load %arg6[%c0_73, %c0_74] : memref<1x512xf32, #tpu.memory_space<vmem>>, vector<1x512xf32>
    %243 = vector.broadcast %242 : vector<1x512xf32> to vector<2x512xf32>
    %244 = arith.addf %241, %243 : vector<2x512xf32>
    %c0_75 = arith.constant 0 : index
    %c0_76 = arith.constant 0 : index
    %245 = vector.load %arg5[%c0_75, %c0_76] : memref<128x512xf32, #tpu.memory_space<vmem>>, vector<128x512xf32>
    %cst_77 = arith.constant dense<0.000000e+00> : vector<2x512xf32>
    %246 = tpu.matmul %217, %245, %cst_77 {dimension_numbers = #tpu.dot_dimension_numbers<[1], [0], [0], [1], [0, 0, 1, 1], [], []>} : vector<2x128xf32>, vector<128x512xf32>, vector<2x512xf32> -> vector<2x512xf32>
    %247 = arith.addf %244, %246 : vector<2x512xf32>
    %248 = vector.extract_strided_slice %247 {offsets = [0, 0], sizes = [2, 384], strides = [1, 1]} : vector<2x512xf32> to vector<2x384xf32>
    %249 = arith.negf %248 : vector<2x384xf32>
    %250 = math.exp %249 : vector<2x384xf32>
    %cst_78 = arith.constant 1.000000e+00 : f32
    %251 = vector.broadcast %cst_78 : f32 to vector<2x384xf32>
    %252 = arith.addf %251, %250 : vector<2x384xf32>
    %253 = arith.divf %251, %252 : vector<2x384xf32>
    %254 = vector.extract_strided_slice %247 {offsets = [0, 384], sizes = [2, 128], strides = [1, 1]} : vector<2x512xf32> to vector<2x128xf32>
    %255 = math.tanh %254 : vector<2x128xf32>
    %256 = vector.extract_strided_slice %253 {offsets = [0, 0], sizes = [2, 128], strides = [1, 1]} : vector<2x384xf32> to vector<2x128xf32>
    %257 = vector.extract_strided_slice %253 {offsets = [0, 128], sizes = [2, 128], strides = [1, 1]} : vector<2x384xf32> to vector<2x128xf32>
    %258 = vector.extract_strided_slice %253 {offsets = [0, 256], sizes = [2, 128], strides = [1, 1]} : vector<2x384xf32> to vector<2x128xf32>
    %259 = arith.mulf %257, %215 : vector<2x128xf32>
    %260 = arith.mulf %256, %255 : vector<2x128xf32>
    %261 = arith.addf %259, %260 : vector<2x128xf32>
    %262 = math.tanh %261 : vector<2x128xf32>
    %263 = arith.mulf %258, %262 : vector<2x128xf32>
    %264 = vector.extract_strided_slice %8 {offsets = [0, 6, 0], sizes = [2, 1, 512], strides = [1, 1, 1]} : vector<2x8x512xf32> to vector<2x1x512xf32>
    %265 = vector.shape_cast %264 : vector<2x1x512xf32> to vector<2x512xf32>
    %c0_79 = arith.constant 0 : index
    %c0_80 = arith.constant 0 : index
    %266 = vector.load %arg2[%c0_79, %c0_80] : memref<128x512xf32, #tpu.memory_space<vmem>>, vector<128x512xf32>
    %cst_81 = arith.constant dense<0.000000e+00> : vector<2x512xf32>
    %267 = tpu.matmul %238, %266, %cst_81 {dimension_numbers = #tpu.dot_dimension_numbers<[1], [0], [0], [1], [0, 0, 1, 1], [], []>} : vector<2x128xf32>, vector<128x512xf32>, vector<2x512xf32> -> vector<2x512xf32>
    %268 = arith.addf %265, %267 : vector<2x512xf32>
    %269 = vector.extract_strided_slice %268 {offsets = [0, 0], sizes = [2, 384], strides = [1, 1]} : vector<2x512xf32> to vector<2x384xf32>
    %270 = arith.negf %269 : vector<2x384xf32>
    %271 = math.exp %270 : vector<2x384xf32>
    %cst_82 = arith.constant 1.000000e+00 : f32
    %272 = vector.broadcast %cst_82 : f32 to vector<2x384xf32>
    %273 = arith.addf %272, %271 : vector<2x384xf32>
    %274 = arith.divf %272, %273 : vector<2x384xf32>
    %275 = vector.extract_strided_slice %268 {offsets = [0, 384], sizes = [2, 128], strides = [1, 1]} : vector<2x512xf32> to vector<2x128xf32>
    %276 = math.tanh %275 : vector<2x128xf32>
    %277 = vector.extract_strided_slice %274 {offsets = [0, 0], sizes = [2, 128], strides = [1, 1]} : vector<2x384xf32> to vector<2x128xf32>
    %278 = vector.extract_strided_slice %274 {offsets = [0, 128], sizes = [2, 128], strides = [1, 1]} : vector<2x384xf32> to vector<2x128xf32>
    %279 = vector.extract_strided_slice %274 {offsets = [0, 256], sizes = [2, 128], strides = [1, 1]} : vector<2x384xf32> to vector<2x128xf32>
    %280 = arith.mulf %278, %236 : vector<2x128xf32>
    %281 = arith.mulf %277, %276 : vector<2x128xf32>
    %282 = arith.addf %280, %281 : vector<2x128xf32>
    %283 = math.tanh %282 : vector<2x128xf32>
    %284 = arith.mulf %279, %283 : vector<2x128xf32>
    %285 = arith.truncf %238 : vector<2x128xf32> to vector<2x128xbf16>
    %c0_83 = arith.constant 0 : index
    %c0_84 = arith.constant 0 : index
    %286 = vector.load %arg4[%c0_83, %c0_84] : memref<128x512xbf16, #tpu.memory_space<vmem>>, vector<128x512xbf16>
    %cst_85 = arith.constant dense<0.000000e+00> : vector<2x512xf32>
    %287 = tpu.matmul %285, %286, %cst_85 {dimension_numbers = #tpu.dot_dimension_numbers<[1], [0], [0], [1], [0, 0, 1, 1], [], []>} : vector<2x128xbf16>, vector<128x512xbf16>, vector<2x512xf32> -> vector<2x512xf32>
    %c0_86 = arith.constant 0 : index
    %c0_87 = arith.constant 0 : index
    %288 = vector.load %arg6[%c0_86, %c0_87] : memref<1x512xf32, #tpu.memory_space<vmem>>, vector<1x512xf32>
    %289 = vector.broadcast %288 : vector<1x512xf32> to vector<2x512xf32>
    %290 = arith.addf %287, %289 : vector<2x512xf32>
    %c0_88 = arith.constant 0 : index
    %c0_89 = arith.constant 0 : index
    %291 = vector.load %arg5[%c0_88, %c0_89] : memref<128x512xf32, #tpu.memory_space<vmem>>, vector<128x512xf32>
    %cst_90 = arith.constant dense<0.000000e+00> : vector<2x512xf32>
    %292 = tpu.matmul %263, %291, %cst_90 {dimension_numbers = #tpu.dot_dimension_numbers<[1], [0], [0], [1], [0, 0, 1, 1], [], []>} : vector<2x128xf32>, vector<128x512xf32>, vector<2x512xf32> -> vector<2x512xf32>
    %293 = arith.addf %290, %292 : vector<2x512xf32>
    %294 = vector.extract_strided_slice %293 {offsets = [0, 0], sizes = [2, 384], strides = [1, 1]} : vector<2x512xf32> to vector<2x384xf32>
    %295 = arith.negf %294 : vector<2x384xf32>
    %296 = math.exp %295 : vector<2x384xf32>
    %cst_91 = arith.constant 1.000000e+00 : f32
    %297 = vector.broadcast %cst_91 : f32 to vector<2x384xf32>
    %298 = arith.addf %297, %296 : vector<2x384xf32>
    %299 = arith.divf %297, %298 : vector<2x384xf32>
    %300 = vector.extract_strided_slice %293 {offsets = [0, 384], sizes = [2, 128], strides = [1, 1]} : vector<2x512xf32> to vector<2x128xf32>
    %301 = math.tanh %300 : vector<2x128xf32>
    %302 = vector.extract_strided_slice %299 {offsets = [0, 0], sizes = [2, 128], strides = [1, 1]} : vector<2x384xf32> to vector<2x128xf32>
    %303 = vector.extract_strided_slice %299 {offsets = [0, 128], sizes = [2, 128], strides = [1, 1]} : vector<2x384xf32> to vector<2x128xf32>
    %304 = vector.extract_strided_slice %299 {offsets = [0, 256], sizes = [2, 128], strides = [1, 1]} : vector<2x384xf32> to vector<2x128xf32>
    %305 = arith.mulf %303, %261 : vector<2x128xf32>
    %306 = arith.mulf %302, %301 : vector<2x128xf32>
    %307 = arith.addf %305, %306 : vector<2x128xf32>
    %308 = math.tanh %307 : vector<2x128xf32>
    %309 = arith.mulf %304, %308 : vector<2x128xf32>
    %310 = vector.extract_strided_slice %8 {offsets = [0, 7, 0], sizes = [2, 1, 512], strides = [1, 1, 1]} : vector<2x8x512xf32> to vector<2x1x512xf32>
    %311 = vector.shape_cast %310 : vector<2x1x512xf32> to vector<2x512xf32>
    %c0_92 = arith.constant 0 : index
    %c0_93 = arith.constant 0 : index
    %312 = vector.load %arg2[%c0_92, %c0_93] : memref<128x512xf32, #tpu.memory_space<vmem>>, vector<128x512xf32>
    %cst_94 = arith.constant dense<0.000000e+00> : vector<2x512xf32>
    %313 = tpu.matmul %284, %312, %cst_94 {dimension_numbers = #tpu.dot_dimension_numbers<[1], [0], [0], [1], [0, 0, 1, 1], [], []>} : vector<2x128xf32>, vector<128x512xf32>, vector<2x512xf32> -> vector<2x512xf32>
    %314 = arith.addf %311, %313 : vector<2x512xf32>
    %315 = vector.extract_strided_slice %314 {offsets = [0, 0], sizes = [2, 384], strides = [1, 1]} : vector<2x512xf32> to vector<2x384xf32>
    %316 = arith.negf %315 : vector<2x384xf32>
    %317 = math.exp %316 : vector<2x384xf32>
    %cst_95 = arith.constant 1.000000e+00 : f32
    %318 = vector.broadcast %cst_95 : f32 to vector<2x384xf32>
    %319 = arith.addf %318, %317 : vector<2x384xf32>
    %320 = arith.divf %318, %319 : vector<2x384xf32>
    %321 = vector.extract_strided_slice %314 {offsets = [0, 384], sizes = [2, 128], strides = [1, 1]} : vector<2x512xf32> to vector<2x128xf32>
    %322 = math.tanh %321 : vector<2x128xf32>
    %323 = vector.extract_strided_slice %320 {offsets = [0, 0], sizes = [2, 128], strides = [1, 1]} : vector<2x384xf32> to vector<2x128xf32>
    %324 = vector.extract_strided_slice %320 {offsets = [0, 128], sizes = [2, 128], strides = [1, 1]} : vector<2x384xf32> to vector<2x128xf32>
    %325 = vector.extract_strided_slice %320 {offsets = [0, 256], sizes = [2, 128], strides = [1, 1]} : vector<2x384xf32> to vector<2x128xf32>
    %326 = arith.mulf %324, %282 : vector<2x128xf32>
    %327 = arith.mulf %323, %322 : vector<2x128xf32>
    %328 = arith.addf %326, %327 : vector<2x128xf32>
    %329 = math.tanh %328 : vector<2x128xf32>
    %330 = arith.mulf %325, %329 : vector<2x128xf32>
    %331 = arith.truncf %284 : vector<2x128xf32> to vector<2x128xbf16>
    %c0_96 = arith.constant 0 : index
    %c0_97 = arith.constant 0 : index
    %332 = vector.load %arg4[%c0_96, %c0_97] : memref<128x512xbf16, #tpu.memory_space<vmem>>, vector<128x512xbf16>
    %cst_98 = arith.constant dense<0.000000e+00> : vector<2x512xf32>
    %333 = tpu.matmul %331, %332, %cst_98 {dimension_numbers = #tpu.dot_dimension_numbers<[1], [0], [0], [1], [0, 0, 1, 1], [], []>} : vector<2x128xbf16>, vector<128x512xbf16>, vector<2x512xf32> -> vector<2x512xf32>
    %c0_99 = arith.constant 0 : index
    %c0_100 = arith.constant 0 : index
    %334 = vector.load %arg6[%c0_99, %c0_100] : memref<1x512xf32, #tpu.memory_space<vmem>>, vector<1x512xf32>
    %335 = vector.broadcast %334 : vector<1x512xf32> to vector<2x512xf32>
    %336 = arith.addf %333, %335 : vector<2x512xf32>
    %c0_101 = arith.constant 0 : index
    %c0_102 = arith.constant 0 : index
    %337 = vector.load %arg5[%c0_101, %c0_102] : memref<128x512xf32, #tpu.memory_space<vmem>>, vector<128x512xf32>
    %cst_103 = arith.constant dense<0.000000e+00> : vector<2x512xf32>
    %338 = tpu.matmul %309, %337, %cst_103 {dimension_numbers = #tpu.dot_dimension_numbers<[1], [0], [0], [1], [0, 0, 1, 1], [], []>} : vector<2x128xf32>, vector<128x512xf32>, vector<2x512xf32> -> vector<2x512xf32>
    %339 = arith.addf %336, %338 : vector<2x512xf32>
    %340 = vector.extract_strided_slice %339 {offsets = [0, 0], sizes = [2, 384], strides = [1, 1]} : vector<2x512xf32> to vector<2x384xf32>
    %341 = arith.negf %340 : vector<2x384xf32>
    %342 = math.exp %341 : vector<2x384xf32>
    %cst_104 = arith.constant 1.000000e+00 : f32
    %343 = vector.broadcast %cst_104 : f32 to vector<2x384xf32>
    %344 = arith.addf %343, %342 : vector<2x384xf32>
    %345 = arith.divf %343, %344 : vector<2x384xf32>
    %346 = vector.extract_strided_slice %339 {offsets = [0, 384], sizes = [2, 128], strides = [1, 1]} : vector<2x512xf32> to vector<2x128xf32>
    %347 = math.tanh %346 : vector<2x128xf32>
    %348 = vector.extract_strided_slice %345 {offsets = [0, 0], sizes = [2, 128], strides = [1, 1]} : vector<2x384xf32> to vector<2x128xf32>
    %349 = vector.extract_strided_slice %345 {offsets = [0, 128], sizes = [2, 128], strides = [1, 1]} : vector<2x384xf32> to vector<2x128xf32>
    %350 = vector.extract_strided_slice %345 {offsets = [0, 256], sizes = [2, 128], strides = [1, 1]} : vector<2x384xf32> to vector<2x128xf32>
    %351 = arith.mulf %349, %307 : vector<2x128xf32>
    %352 = arith.mulf %348, %347 : vector<2x128xf32>
    %353 = arith.addf %351, %352 : vector<2x128xf32>
    %354 = math.tanh %353 : vector<2x128xf32>
    %355 = arith.mulf %350, %354 : vector<2x128xf32>
    %356 = arith.truncf %330 : vector<2x128xf32> to vector<2x128xbf16>
    %c0_105 = arith.constant 0 : index
    %c0_106 = arith.constant 0 : index
    %357 = vector.load %arg4[%c0_105, %c0_106] : memref<128x512xbf16, #tpu.memory_space<vmem>>, vector<128x512xbf16>
    %cst_107 = arith.constant dense<0.000000e+00> : vector<2x512xf32>
    %358 = tpu.matmul %356, %357, %cst_107 {dimension_numbers = #tpu.dot_dimension_numbers<[1], [0], [0], [1], [0, 0, 1, 1], [], []>} : vector<2x128xbf16>, vector<128x512xbf16>, vector<2x512xf32> -> vector<2x512xf32>
    %c0_108 = arith.constant 0 : index
    %c0_109 = arith.constant 0 : index
    %359 = vector.load %arg6[%c0_108, %c0_109] : memref<1x512xf32, #tpu.memory_space<vmem>>, vector<1x512xf32>
    %360 = vector.broadcast %359 : vector<1x512xf32> to vector<2x512xf32>
    %361 = arith.addf %358, %360 : vector<2x512xf32>
    %c0_110 = arith.constant 0 : index
    %c0_111 = arith.constant 0 : index
    %362 = vector.load %arg5[%c0_110, %c0_111] : memref<128x512xf32, #tpu.memory_space<vmem>>, vector<128x512xf32>
    %cst_112 = arith.constant dense<0.000000e+00> : vector<2x512xf32>
    %363 = tpu.matmul %355, %362, %cst_112 {dimension_numbers = #tpu.dot_dimension_numbers<[1], [0], [0], [1], [0, 0, 1, 1], [], []>} : vector<2x128xf32>, vector<128x512xf32>, vector<2x512xf32> -> vector<2x512xf32>
    %364 = arith.addf %361, %363 : vector<2x512xf32>
    %365 = vector.extract_strided_slice %364 {offsets = [0, 0], sizes = [2, 384], strides = [1, 1]} : vector<2x512xf32> to vector<2x384xf32>
    %366 = arith.negf %365 : vector<2x384xf32>
    %367 = math.exp %366 : vector<2x384xf32>
    %cst_113 = arith.constant 1.000000e+00 : f32
    %368 = vector.broadcast %cst_113 : f32 to vector<2x384xf32>
    %369 = arith.addf %368, %367 : vector<2x384xf32>
    %370 = arith.divf %368, %369 : vector<2x384xf32>
    %371 = vector.extract_strided_slice %364 {offsets = [0, 384], sizes = [2, 128], strides = [1, 1]} : vector<2x512xf32> to vector<2x128xf32>
    %372 = math.tanh %371 : vector<2x128xf32>
    %373 = vector.extract_strided_slice %370 {offsets = [0, 0], sizes = [2, 128], strides = [1, 1]} : vector<2x384xf32> to vector<2x128xf32>
    %374 = vector.extract_strided_slice %370 {offsets = [0, 128], sizes = [2, 128], strides = [1, 1]} : vector<2x384xf32> to vector<2x128xf32>
    %375 = vector.extract_strided_slice %370 {offsets = [0, 256], sizes = [2, 128], strides = [1, 1]} : vector<2x384xf32> to vector<2x128xf32>
    %376 = arith.mulf %374, %353 : vector<2x128xf32>
    %377 = arith.mulf %373, %372 : vector<2x128xf32>
    %378 = arith.addf %376, %377 : vector<2x128xf32>
    %379 = math.tanh %378 : vector<2x128xf32>
    %380 = arith.mulf %375, %379 : vector<2x128xf32>
    %381 = arith.truncf %380 : vector<2x128xf32> to vector<2x128xbf16>
    %c0_114 = arith.constant 0 : index
    %c0_115 = arith.constant 0 : index
    %382 = vector.load %arg7[%c0_114, %c0_115] : memref<128x128xbf16, #tpu.memory_space<vmem>>, vector<128x128xbf16>
    %cst_116 = arith.constant dense<0.000000e+00> : vector<2x128xf32>
    %383 = tpu.matmul %381, %382, %cst_116 {dimension_numbers = #tpu.dot_dimension_numbers<[1], [0], [0], [1], [0, 0, 1, 1], [], []>} : vector<2x128xbf16>, vector<128x128xbf16>, vector<2x128xf32> -> vector<2x128xf32>
    %c0_117 = arith.constant 0 : index
    %c0_118 = arith.constant 0 : index
    %384 = vector.load %arg8[%c0_117, %c0_118] : memref<1x128xf32, #tpu.memory_space<vmem>>, vector<1x128xf32>
    %385 = vector.broadcast %384 : vector<1x128xf32> to vector<2x128xf32>
    %386 = arith.addf %383, %385 : vector<2x128xf32>
    %cst_119 = arith.constant 0.000000e+00 : f32
    %387 = vector.broadcast %cst_119 : f32 to vector<2x128xf32>
    %388 = arith.maximumf %386, %387 : vector<2x128xf32>
    %389 = arith.truncf %388 : vector<2x128xf32> to vector<2x128xbf16>
    %c0_120 = arith.constant 0 : index
    %c0_121 = arith.constant 0 : index
    %390 = vector.load %arg9[%c0_120, %c0_121] : memref<128x128xbf16, #tpu.memory_space<vmem>>, vector<128x128xbf16>
    %cst_122 = arith.constant dense<0.000000e+00> : vector<2x128xf32>
    %391 = tpu.matmul %389, %390, %cst_122 {dimension_numbers = #tpu.dot_dimension_numbers<[1], [0], [0], [1], [0, 0, 1, 1], [], []>} : vector<2x128xbf16>, vector<128x128xbf16>, vector<2x128xf32> -> vector<2x128xf32>
    %c0_123 = arith.constant 0 : index
    %c0_124 = arith.constant 0 : index
    %392 = vector.load %arg10[%c0_123, %c0_124] : memref<1x128xf32, #tpu.memory_space<vmem>>, vector<1x128xf32>
    %393 = vector.broadcast %392 : vector<1x128xf32> to vector<2x128xf32>
    %394 = arith.addf %391, %393 : vector<2x128xf32>
    %395 = arith.negf %394 : vector<2x128xf32>
    %396 = math.exp %395 : vector<2x128xf32>
    %cst_125 = arith.constant 1.000000e+00 : f32
    %397 = vector.broadcast %cst_125 : f32 to vector<2x128xf32>
    %398 = arith.addf %397, %396 : vector<2x128xf32>
    %399 = arith.divf %397, %398 : vector<2x128xf32>
    %c0_126 = arith.constant 0 : index
    %c0_127 = arith.constant 0 : index
    %400 = vector.load %arg11[%c0_126, %c0_127] : memref<2x128xf32, #tpu.memory_space<vmem>>, vector<2x128xf32>
    tpu.vector_store %arg11[%c0_126, %c0_127], %399 {strides = array<i32>} : memref<2x128xf32, #tpu.memory_space<vmem>>, vector<2x128xf32>,
    return
  }
}

</mosaic_0001>

<bundles_post_ra>
// kernel: lstm_model_forward.1
= control target key start
LH: loop header
LB: loop body
LE: loop exit
PB: predicated region body
PF: predicated region fallthrough
CT: control target
= control target key end

     0   :  { %16 = vsyncpa [#allocation3], 0  ;;  %s8198_s0 = inlined_call_operand.vmem [shape: f32[2,8,4], index: 0, kind: input, shape index: {}]   ;;  %s8199_s1 = inlined_call_operand.vmem [shape: bf16[4,512], index: 1, kind: input, shape index: {}]   ;;  %s8200_s2 = inlined_call_operand.hbm [shape: f32[128,512], index: 2, kind: input, shape index: {}]   ;;  %s8201_s3 = inlined_call_operand.vmem [shape: f32[1,512], index: 3, kind: input, shape index: {}]   ;;  %s8202_s4 = inlined_call_operand.hbm [shape: bf16[128,512], index: 4, kind: input, shape index: {}]   ;;  %s8203_s5 = inlined_call_operand.hbm [shape: f32[128,512], index: 5, kind: input, shape index: {}]   ;;  %s8204_s6 = inlined_call_operand.vmem [shape: f32[1,512], index: 6, kind: input, shape index: {}]   ;;  %s8205_s7 = inlined_call_operand.hbm [shape: bf16[128,128], index: 7, kind: input, shape index: {}]   ;;  %s8206_s8 = inlined_call_operand.vmem [shape: f32[1,128], index: 8, kind: input, shape index: {}]   ;;  %s8207_s9 = inlined_call_operand.hbm [shape: bf16[128,128], index: 9, kind: input, shape index: {}]   ;;  %s8208_s10 = inlined_call_operand.vmem [shape: f32[1,128], index: 10, kind: input, shape index: {}]   ;;  %s8209_s11 = inlined_call_operand.vmem [shape: f32[2,128], index: 11, kind: output, shape index: {}]  }
   0x1   :  { %17 = vsyncpa [#allocation5], 0 }
   0x2   :  { %18 = vsyncpa [#allocation8], 0  ;;  %s6613_s17 = smov [#allocation4]   ;;  %s6497_s21 = scalar_lea.hbm %s8202_s4, 4096 }
   0x3   :  { %s42_s18 = sshll.u32 %s6613_s17, 4  ;;  %p6498_p0 = scmp.ne.s32.totalorder %s8202_s4, %s6497_s21  ;;  %s43_s18 = int_to_ptr.vmem [resolvable:$true] %s42_s18 }
   0x4   :  { %p6501_p1 = scmp.lt.u32.totalorder %s6497_s21, %s8202_s4 }
   0x6   :  { %p6503_p2 = pnand %p6501_p1, %p6498_p0 }
   0x8   :  { %6506 = shalt.err (!%p6503_p2)
}
   0x9   :  { %s6507_s26 = scalar_lea.vmem %s43_s18, 4096  ;;  %p6512_p4 = scmp.lt.s32.totalorder %s43_s18, %s43_s18 }
   0xa   :  { %p6508_p3 = scmp.ne.s32.totalorder %s43_s18, %s6507_s26  ;;  %p6513_p5 = scmp.lt.s32.totalorder %s6507_s26, %s6507_s26 }
   0xc   :  { %p6514_p6 = por %p6513_p5, %p6512_p4 }
   0xe   :  { %p6515_p7 = pnand %p6514_p6, %p6508_p3 }
  0x10   :  { %6518 = shalt.err (!%p6515_p7)
}
  0x11   :  { %s6614_s27 = smov 256   ;;  %s6615_s28 = smov 16  }
  0x12   :  { %48 = dma.hbm_to_vmem [thread:$0]  %s8202_s4, 4096, %s43_s18, [#allocation5], %s6614_s27, %s6614_s27, %s6615_s28  }
  0x13   :  { %s6616_s12 = smov [#allocation7]   ;;  %s6519_s16 = scalar_lea.hbm %s8205_s7, 1024 }
  0x14   :  { %s68_s13 = sshll.u32 %s6616_s12, 4  ;;  %p6520_p8 = scmp.ne.s32.totalorder %s8205_s7, %s6519_s16  ;;  %s69_s13 = int_to_ptr.vmem [resolvable:$true] %s68_s13 }
  0x15   :  { %p6523_p9 = scmp.lt.u32.totalorder %s6519_s16, %s8205_s7 }
  0x17   :  { %p6525_p10 = pnand %p6523_p9, %p6520_p8 }
  0x19   :  { %6528 = shalt.err (!%p6525_p10)
}
  0x1a   :  { %s6529_s22 = scalar_lea.vmem %s69_s13, 1024  ;;  %p6534_p12 = scmp.lt.s32.totalorder %s69_s13, %s69_s13 }
  0x1b   :  { %p6530_p11 = scmp.ne.s32.totalorder %s69_s13, %s6529_s22  ;;  %p6535_p13 = scmp.lt.s32.totalorder %s6529_s22, %s6529_s22 }
  0x1d   :  { %p6536_p0 = por %p6535_p13, %p6534_p12 }
  0x1f   :  { %p6537_p1 = pnand %p6536_p0, %p6530_p11 }
  0x21   :  { %6540 = shalt.err (!%p6537_p1)
}
  0x22   :  { %s6617_s4 = smov 64   ;;  %s6618_s18 = smov 4  }
  0x23   :  { %74 = dma.hbm_to_vmem [thread:$0]  %s8205_s7, 1024, %s69_s13, [#allocation8], %s6617_s4, %s6617_s4, %s6618_s18  }
  0x24   :  { %s6619_s25 = smov [#allocation2]   ;;  %s6541_s29 = scalar_lea.hbm %s8200_s2, 8192 }
  0x25   :  { %s28_s26 = sshll.u32 %s6619_s25, 4  ;;  %p6542_p2 = scmp.ne.s32.totalorder %s8200_s2, %s6541_s29  ;;  %s29_s26 = int_to_ptr.vmem [resolvable:$true] %s28_s26 }
  0x26   :  { %p6545_p3 = scmp.lt.u32.totalorder %s6541_s29, %s8200_s2 }
  0x28   :  { %p6547_p4 = pnand %p6545_p3, %p6542_p2 }
  0x2a   :  { %6550 = shalt.err (!%p6547_p4)
}
  0x2b   :  { %s6551_s16 = scalar_lea.vmem %s29_s26, 8192  ;;  %p6556_p6 = scmp.lt.s32.totalorder %s29_s26, %s29_s26 }
  0x2c   :  { %p6552_p5 = scmp.ne.s32.totalorder %s29_s26, %s6551_s16  ;;  %p6557_p7 = scmp.lt.s32.totalorder %s6551_s16, %s6551_s16 }
  0x2e   :  { %p6558_p8 = por %p6557_p7, %p6556_p6 }
  0x30   :  { %p6559_p9 = pnand %p6558_p8, %p6552_p5 }
  0x32   :  { %6562 = shalt.err (!%p6559_p9)
}
  0x33   :  { %s6620_s7 = smov 512   ;;  %s6621_s13 = smov 32  }
  0x34   :  { %34 = dma.hbm_to_vmem [thread:$0]  %s8200_s2, 8192, %s29_s26, [#allocation3], %s6620_s7, %s6620_s7, %s6621_s13  }
  0x35   :  { %s6622_s20 = smov [#allocation6]   ;;  %s6623_s22 = smov [#allocation9]  }
  0x36   :  { %s54_s21 = sshll.u32 %s6622_s20, 4  ;;  %s82_s23 = sshll.u32 %s6623_s22, 4  ;;  %s55_s21 = int_to_ptr.vmem [resolvable:$true] %s54_s21  ;;  %s83_s23 = int_to_ptr.vmem [resolvable:$true] %s82_s23 }
  0x37   :  { %s6563_s27 = scalar_lea.hbm %s8203_s5, 8192 }
  0x38   :  { %p6564_p10 = scmp.ne.s32.totalorder %s8203_s5, %s6563_s27  ;;  %p6567_p11 = scmp.lt.u32.totalorder %s6563_s27, %s8203_s5 }
  0x3a   :  { %p6569_p12 = pnand %p6567_p11, %p6564_p10 }
  0x3c   :  { %6572 = shalt.err (!%p6569_p12)
}
  0x3d   :  { %s6573_s2 = scalar_lea.vmem %s55_s21, 8192  ;;  %p6578_p0 = scmp.lt.s32.totalorder %s55_s21, %s55_s21 }
  0x3e   :  { %p6574_p13 = scmp.ne.s32.totalorder %s55_s21, %s6573_s2  ;;  %p6579_p1 = scmp.lt.s32.totalorder %s6573_s2, %s6573_s2 }
  0x40   :  { %p6580_p2 = por %p6579_p1, %p6578_p0 }
  0x42   :  { %p6581_p3 = pnand %p6580_p2, %p6574_p13 }
  0x44   :  { %6584 = shalt.err (!%p6581_p3)
}
  0x45   :  { %60 = dma.hbm_to_vmem [thread:$0]  %s8203_s5, 8192, %s55_s21, [#allocation5], %s6620_s7, %s6620_s7, %s6621_s13  }
  0x46   :  { %s6585_s17 = scalar_lea.hbm %s8207_s9, 1024 }
  0x47   :  { %p6586_p4 = scmp.ne.s32.totalorder %s8207_s9, %s6585_s17  ;;  %p6589_p5 = scmp.lt.u32.totalorder %s6585_s17, %s8207_s9 }
  0x49   :  { %p6591_p6 = pnand %p6589_p5, %p6586_p4 }
  0x4b   :  { %6594 = shalt.err (!%p6591_p6)
}
  0x4c   :  { %s6595_s25 = scalar_lea.vmem %s83_s23, 1024  ;;  %p6600_p8 = scmp.lt.s32.totalorder %s83_s23, %s83_s23 }
  0x4d   :  { %p6596_p7 = scmp.ne.s32.totalorder %s83_s23, %s6595_s25  ;;  %p6601_p9 = scmp.lt.s32.totalorder %s6595_s25, %s6595_s25 }
  0x4f   :  { %p6602_p10 = por %p6601_p9, %p6600_p8 }
  0x51   :  { %p6603_p11 = pnand %p6602_p10, %p6596_p7 }
  0x53   :  { %6606 = shalt.err (!%p6603_p11)
}
  0x54   :  { %88 = dma.hbm_to_vmem [thread:$0]  %s8207_s9, 1024, %s83_s23, [#allocation8], %s6617_s4, %s6617_s4, %s6618_s18  }
  0x55   :  { %6607 = dma.done.wait [#allocation3], 8192  }
  0x56   :  { %6608 = vsyncadd [#allocation3], 4294959104 }
  0x57   :  { %6609 = dma.done.wait [#allocation5], 12288  }
  0x58   :  { %6610 = vsyncadd [#allocation5], 4294955008 }
  0x59   :  { %6611 = dma.done.wait [#allocation8], 2048  }
  0x5a   :  { %6612 = vsyncadd [#allocation8], 4294965248  ;;  %v113_v0 = vlaneseq  ;;  %v6624_v1 = vmov 1983009808   ;;  %v8216_v3 = vmov 0   ;;  %v110_v7 = vld [vmem:[%s8199_s1] sm:$0xff] }
  0x5b   :  { %v136_v2 = vunpack.c.l.s4 %v6624_v1  ;;  %200 = vmatprep.mubr.bf16.mxu0 %v8216_v3  ;;  %243 = vmatprep.mubr.bf16.mxu1 %v8216_v3  ;;  %vm155_vm0 = vcmask 1041408   ;;  %v134_v9 = vcombine.high %v110_v7, %v110_v7  ;;  %v107_v10 = vld [vmem:[%s8198_s0] sm:$0xff]  ;;  %v255_v11 = vld [vmem:[#allocation2 + $0x8] sm:$0xff]  ;;  %v257_v14 = vld [vmem:[#allocation2 + $0x18] sm:$0xff]  ;;  %vm151_vm1 = vcmask 31744  }
  0x5c   :  { %v6756_v4 = vshrl.u32 %v113_v0, 7  ;;  %v259_v12 = vld [vmem:[#allocation2 + $0x28] sm:$0xff]  ;;  %v261_v15 = vld [vmem:[#allocation2 + $0x38] sm:$0xff]  ;;  %v254_v20 = vld [vmem:[#allocation2] sm:$0xff]  ;;  %v8213_v45 = vmov 0.0   ;;  %vm535_vm2 = vcmask 1041409  }
  0x5d   :  { %v137_v5 = vunpack.c.0.s8 %v136_v2  ;;  %v108_v13 = vld [vmem:[%s8198_s0 + $0x8] sm:$0xff]  ;;  %v6769_v19 = vpack.c.bf16 %v259_v12, %v255_v11  ;;  %v258_v21 = vld [vmem:[#allocation2 + $0x20] sm:$0xff]  ;;  %v6773_v27 = vpack.c.bf16 %v261_v15, %v257_v14  ;;  %v256_v28 = vld [vmem:[#allocation2 + $0x10] sm:$0xff]  ;;  %vm6627_vm3 = vmmov 0  }
  0x5e   :  { %8495 = vst [vmem:[#allocation13_spill] sm:$0xff] %v6756_v4  ;;  %v263_v22 = vld [vmem:[#allocation2 + $0x48] sm:$0xff]  ;;  %v109_v26 = vpack.c.bf16 %v108_v13, %v107_v10  ;;  %v260_v29 = vld [vmem:[#allocation2 + $0x30] sm:$0xff]  ;;  %v6775_v30 = vpack.c.bf16 %v258_v21, %v254_v20  ;;  %v265_v31 = vld [vmem:[#allocation2 + $0x58] sm:$0xff] }
  0x5f   :  { %v140_v6 = vsub.s32 %v137_v5, %v6756_v4  ;;  %8496 = vst [vmem:[#allocation14_spill] sm:$0xff] %v6769_v19  ;;  %v267_v23 = vld [vmem:[#allocation2 + $0x68] sm:$0xff]  ;;  %8497 = vst [vmem:[#allocation15_spill] sm:$0xff] %v6773_v27  ;;  %v269_v32 = vld [vmem:[#allocation2 + $0x78] sm:$0xff]  ;;  %v6781_v36 = vpack.c.bf16 %v260_v29, %v256_v28 }
  0x60   :  { %8498 = vst [vmem:[#allocation16_spill] sm:$0xff] %v6775_v30  ;;  %v6779_v33 = vpack.c.bf16 %v267_v23, %v263_v22  ;;  %v262_v34 = vld [vmem:[#allocation2 + $0x40] sm:$0xff]  ;;  %v271_v37 = vld [vmem:[#allocation2 + $0x88] sm:$0xff]  ;;  %v6785_v39 = vpack.c.bf16 %v269_v32, %v265_v31  ;;  %v264_v40 = vld [vmem:[#allocation2 + $0x50] sm:$0xff] }
  0x61   :  { %v141_v8 = vrot.slane %v110_v7, %v140_v6  ;;  %v148_v18 = vrot.slane %v134_v9, %v140_v6  ;;  %v266_v35 = vld [vmem:[#allocation2 + $0x60] sm:$0xff]  ;;  %8500 = vst [vmem:[#allocation18_spill] sm:$0xff] %v6781_v36  ;;  %v275_v38 = vld [vmem:[#allocation2 + $0xa8] sm:$0xff]  ;;  %v268_v41 = vld [vmem:[#allocation2 + $0x70] sm:$0xff] }
  0x62   :  { %8499 = vst [vmem:[#allocation17_spill] sm:$0xff] %v6779_v33  ;;  %8501 = vst [vmem:[#allocation19_spill] sm:$0xff] %v6785_v39  ;;  %v6788_v42 = vpack.c.bf16 %v266_v35, %v262_v34  ;;  %v273_v43 = vld [vmem:[#allocation2 + $0x98] sm:$0xff]  ;;  %v6793_v46 = vpack.c.bf16 %v275_v38, %v271_v37  ;;  %v270_v47 = vld [vmem:[#allocation2 + $0x80] sm:$0xff]  ;;  %v6796_v49 = vpack.c.bf16 %v268_v41, %v264_v40 }
  0x63   :  { %v149_v16 = vcombine.high %v141_v8, %v141_v8  ;;  %v157_v17 = vsel %vm155_vm0, %v141_v8, 0  ;;  %v150_v24 = vcombine.high %v148_v18, %v148_v18  ;;  %v163_v25 = vsel %vm155_vm0, %v148_v18, 0  ;;  %v277_v44 = vld [vmem:[#allocation2 + $0xb8] sm:$0xff]  ;;  %v274_v48 = vld [vmem:[#allocation2 + $0xa0] sm:$0xff]  ;;  %v279_v50 = vld [vmem:[#allocation2 + $0xc8] sm:$0xff] }
  0x64   :  { %8502 = vst [vmem:[#allocation20_spill] sm:$0xff] %v6788_v42  ;;  %8503 = vst [vmem:[#allocation21_spill] sm:$0xff] %v6793_v46  ;;  %v283_v51 = vld [vmem:[#allocation2 + $0xe8] sm:$0xff]  ;;  %v6800_v52 = vpack.c.bf16 %v277_v44, %v273_v43  ;;  %v272_v53 = vld [vmem:[#allocation2 + $0x90] sm:$0xff]  ;;  %v6803_v55 = vpack.c.bf16 %v274_v48, %v270_v47 }
  0x65   :  { %4756 = vmatprep.subr.msk.bf16.mxu0 %vm155_vm0, %v149_v16  ;;  %4758 = vmatprep.subr.msk.bf16.mxu1 %vm155_vm0, %v150_v24  ;;  %8504 = vst [vmem:[#allocation22_spill] sm:$0xff] %v6796_v49  ;;  %v276_v54 = vld [vmem:[#allocation2 + $0xb0] sm:$0xff]  ;;  %v281_v56 = vld [vmem:[#allocation2 + $0xd8] sm:$0xff]  ;;  %v6806_v58 = vpack.c.bf16 %v283_v51, %v279_v50  ;;  %v278_v59 = vld [vmem:[#allocation2 + $0xc0] sm:$0xff] }
  0x66   :  { %169 = vmatpush1.bf16.msra.mxu0 %v157_v17  ;;  %212 = vmatpush1.bf16.msra.mxu1 %v163_v25  ;;  %8505 = vst [vmem:[#allocation23_spill] sm:$0xff] %v6800_v52  ;;  %8506 = vst [vmem:[#allocation24_spill] sm:$0xff] %v6803_v55  ;;  %v285_v57 = vld [vmem:[#allocation2 + $0xf8] sm:$0xff]  ;;  %v282_v60 = vld [vmem:[#allocation2 + $0xe0] sm:$0xff]  ;;  %v6809_v61 = vpack.c.bf16 %v276_v54, %v272_v53 }
  0x67   :  { %4942 = vmatprep.subr.bf16.mxu0 %v6769_v19  ;;  %4974 = vmatprep.subr.bf16.mxu1 %v6773_v27  ;;  %8507 = vst [vmem:[#allocation25_spill] sm:$0xff] %v6806_v58  ;;  %v287_v62 = vld [vmem:[#allocation2 + $0x108] sm:$0xff]  ;;  %v6812_v0 = vpack.c.bf16 %v285_v57, %v281_v56  ;;  %v280_v1 = vld [vmem:[#allocation2 + $0xd0] sm:$0xff]  ;;  %v6815_v5 = vpack.c.bf16 %v282_v60, %v278_v59  ;;  %v289_v6 = vld [vmem:[#allocation2 + $0x118] sm:$0xff] }
  0x68   :  { %8508 = vst [vmem:[#allocation26_spill] sm:$0xff] %v6809_v61  ;;  %v291_v63 = vld [vmem:[#allocation2 + $0x128] sm:$0xff]  ;;  %v284_v2 = vld [vmem:[#allocation2 + $0xf0] sm:$0xff]  ;;  %v293_v7 = vld [vmem:[#allocation2 + $0x138] sm:$0xff] }
  0x69   :  { %4757 = vmatmul.mubr.msk.bf16.vlgmr.msra.gmra.mrb[0].mxu0 %vm151_vm1, %v109_v26  ;;  %4759 = vmatmul.mubr.msk.bf16.vlgmr.msra.gmra.mrb[0].mxu1 %vm151_vm1, %v109_v26  ;;  %8509 = vst [vmem:[#allocation27_spill] sm:$0xff] %v6812_v0  ;;  %8510 = vst [vmem:[#allocation28_spill] sm:$0xff] %v6815_v5  ;;  %v6818_v8 = vpack.c.bf16 %v291_v63, %v287_v62  ;;  %v286_v9 = vld [vmem:[#allocation2 + $0x100] sm:$0xff]  ;;  %v288_v11 = vld [vmem:[#allocation2 + $0x110] sm:$0xff]  ;;  %v6821_v12 = vpack.c.bf16 %v284_v2, %v280_v1 }
  0x6a   :  { %4944 = vmatpush1.bf16.msra.mxu0 %v6775_v30  ;;  %382 = vmatprep.mubr.f32.mxu0 %v8213_v45  ;;  %v290_v10 = vld [vmem:[#allocation2 + $0x120] sm:$0xff]  ;;  %v292_v13 = vld [vmem:[#allocation2 + $0x130] sm:$0xff]  ;;  %v295_v14 = vld [vmem:[#allocation2 + $0x148] sm:$0xff]  ;;  %v6824_v16 = vpack.c.bf16 %v293_v7, %v289_v6 }
  0x6b   :  { %4946 = vmatprep.subr.bf16.mxu0 %v6779_v33  ;;  %4976 = vmatpush1.bf16.msra.mxu1 %v6781_v36  ;;  %8511 = vst [vmem:[#allocation29_spill] sm:$0xff] %v6818_v8  ;;  %8512 = vst [vmem:[#allocation30_spill] sm:$0xff] %v6821_v12  ;;  %v299_v15 = vld [vmem:[#allocation2 + $0x168] sm:$0xff]  ;;  %v294_v17 = vld [vmem:[#allocation2 + $0x140] sm:$0xff]  ;;  %v6827_v22 = vpack.c.bf16 %v290_v10, %v286_v9  ;;  %v6833_v29 = vpack.c.bf16 %v292_v13, %v288_v11 }
  0x6c   :  { %453 = vmatprep.mubr.f32.mxu1 %v8213_v45  ;;  %4978 = vmatprep.subr.bf16.mxu1 %v6785_v39  ;;  %8513 = vst [vmem:[#allocation31_spill] sm:$0xff] %v6824_v16  ;;  %v298_v18 = vld [vmem:[#allocation2 + $0x160] sm:$0xff]  ;;  %v297_v20 = vld [vmem:[#allocation2 + $0x158] sm:$0xff]  ;;  %v303_v23 = vld [vmem:[#allocation2 + $0x188] sm:$0xff]  ;;  %v6830_v25 = vpack.c.bf16 %v299_v15, %v295_v14 }
  0x6d   :  { %v301_v21 = vld [vmem:[#allocation2 + $0x178] sm:$0xff]  ;;  %8514 = vst [vmem:[#allocation32_spill] sm:$0xff] %v6827_v22  ;;  %v307_v24 = vld [vmem:[#allocation2 + $0x1a8] sm:$0xff]  ;;  %v296_v26 = vld [vmem:[#allocation2 + $0x150] sm:$0xff]  ;;  %v6839_v38 = vpack.c.bf16 %v298_v18, %v294_v17 }
  0x6e   :  { %4948 = vmatpush1.bf16.msra.mxu0 %v6788_v42  ;;  %8515 = vst [vmem:[#allocation33_spill] sm:$0xff] %v6830_v25  ;;  %v300_v28 = vld [vmem:[#allocation2 + $0x170] sm:$0xff]  ;;  %8516 = vst [vmem:[#allocation34_spill] sm:$0xff] %v6833_v29  ;;  %v305_v31 = vld [vmem:[#allocation2 + $0x198] sm:$0xff]  ;;  %v6836_v34 = vpack.c.bf16 %v301_v21, %v297_v20  ;;  %v6842_v43 = vpack.c.bf16 %v307_v24, %v303_v23  ;;  %v8212_v21 = vsub.s32 0, %v6756_v4  ;;  %v8210_v24 = vsub.s32 1, %v6756_v4 }
  0x6f   :  { %4950 = vmatprep.subr.bf16.mxu0 %v6793_v46  ;;  %4980 = vmatpush1.bf16.msra.mxu1 %v6796_v49  ;;  %v309_v32 = vld [vmem:[#allocation2 + $0x1b8] sm:$0xff]  ;;  %v302_v35 = vld [vmem:[#allocation2 + $0x180] sm:$0xff]  ;;  %8518 = vst [vmem:[#allocation36_spill] sm:$0xff] %v6839_v38  ;;  %v311_v40 = vld [vmem:[#allocation2 + $0x1c8] sm:$0xff]  ;;  %v6845_v48 = vpack.c.bf16 %v300_v28, %v296_v26 }
  0x70   :  { %4982 = vmatprep.subr.bf16.mxu1 %v6800_v52  ;;  %8517 = vst [vmem:[#allocation35_spill] sm:$0xff] %v6836_v34  ;;  %v306_v37 = vld [vmem:[#allocation2 + $0x1a0] sm:$0xff]  ;;  %v315_v41 = vld [vmem:[#allocation2 + $0x1e8] sm:$0xff]  ;;  %8519 = vst [vmem:[#allocation37_spill] sm:$0xff] %v6842_v43  ;;  %v6848_v53 = vpack.c.bf16 %v309_v32, %v305_v31  ;;  %v8211_v31 = vsub.s32 2, %v6756_v4 }
  0x71   :  { %v304_v44 = vld [vmem:[#allocation2 + $0x190] sm:$0xff]  ;;  %8520 = vst [vmem:[#allocation38_spill] sm:$0xff] %v6845_v48  ;;  %v313_v50 = vld [vmem:[#allocation2 + $0x1d8] sm:$0xff]  ;;  %v310_v54 = vld [vmem:[#allocation2 + $0x1c0] sm:$0xff]  ;;  %v6851_v57 = vpack.c.bf16 %v306_v37, %v302_v35  ;;  %v6854_v59 = vpack.c.bf16 %v315_v41, %v311_v40 }
  0x72   :  { %4952 = vmatpush1.bf16.msra.mxu0 %v6803_v55  ;;  %v308_v47 = vld [vmem:[#allocation2 + $0x1b0] sm:$0xff]  ;;  %v317_v51 = vld [vmem:[#allocation2 + $0x1f8] sm:$0xff]  ;;  %8521 = vst [vmem:[#allocation39_spill] sm:$0xff] %v6848_v53  ;;  %v314_v56 = vld [vmem:[#allocation2 + $0x1e0] sm:$0xff] }
  0x73   :  { %4954 = vmatprep.subr.bf16.mxu0 %v6806_v58  ;;  %4984 = vmatpush1.bf16.msra.mxu1 %v6809_v61  ;;  %8522 = vst [vmem:[#allocation40_spill] sm:$0xff] %v6851_v57  ;;  %8523 = vst [vmem:[#allocation41_spill] sm:$0xff] %v6854_v59  ;;  %v312_v60 = vld [vmem:[#allocation2 + $0x1d0] sm:$0xff]  ;;  %v6857_v63 = vpack.c.bf16 %v308_v47, %v304_v44  ;;  %v6860_v1 = vpack.c.bf16 %v317_v51, %v313_v50  ;;  %v6910_v9 = vld [vmem:[#allocation4 + $0xc] ss:$16 sps:$4 sm:$0xff]  }
  0x74   :  { %4986 = vmatprep.subr.bf16.mxu1 %v6812_v0  ;;  %v316_v62 = vld [vmem:[#allocation2 + $0x1f0] sm:$0xff]  ;;  %v6863_v2 = vpack.c.bf16 %v314_v56, %v310_v54  ;;  %v111_v23 = vld [vmem:[%s8201_s3] sm:$0xf]  ;;  %v8215_v54 = vsub.s32 3, %v6756_v4 }
  0x75   :  { %8524 = vst [vmem:[#allocation42_spill] sm:$0xff] %v6857_v63  ;;  %8525 = vst [vmem:[#allocation43_spill] sm:$0xff] %v6860_v1  ;;  %v6867_v6 = vpack.c.bf16 %v316_v62, %v312_v60  ;;  %v6908_v7 = vld [vmem:[#allocation4 + $0x4] ss:$16 sps:$4 sm:$0xff]   ;;  %v116_v26 = vrot.slane %v111_v23, %v8212_v21  ;;  %v120_v28 = vrot.slane %v111_v23, %v8210_v24  ;;  %v7045_v4 = vld [vmem:[#allocation4 + $0xe0] ss:$16 sps:$4 sm:$0xff]  }
  0x76   :  { %4956 = vmatpush1.bf16.msra.mxu0 %v6815_v5  ;;  %8526 = vst [vmem:[#allocation44_spill] sm:$0xff] %v6863_v2  ;;  %v124_v37 = vrot.slane %v111_v23, %v8211_v31  ;;  %8566 = vst [vmem:[#allocation84_spill] sm:$0xff] %v7045_v4 }
  0x77   :  { %4958 = vmatprep.subr.bf16.mxu0 %v6818_v8  ;;  %4988 = vmatpush1.bf16.msra.mxu1 %v6821_v12  ;;  %8527 = vst [vmem:[#allocation45_spill] sm:$0xff] %v6867_v6 }
  0x78   :  { %4990 = vmatprep.subr.bf16.mxu1 %v6824_v16 }
  0x7a   :  { %4960 = vmatpush1.bf16.msra.mxu0 %v6827_v22 }
  0x7b   :  { %4962 = vmatprep.subr.bf16.mxu0 %v6830_v25  ;;  %4992 = vmatpush1.bf16.msra.mxu1 %v6833_v29 }
  0x7c   :  { %4994 = vmatprep.subr.bf16.mxu1 %v6836_v34 }
  0x7e   :  { %4964 = vmatpush1.bf16.msra.mxu0 %v6839_v38 }
  0x7f   :  { %4966 = vmatprep.subr.bf16.mxu0 %v6842_v43  ;;  %4996 = vmatpush1.bf16.msra.mxu1 %v6845_v48 }
  0x80   :  { %4998 = vmatprep.subr.bf16.mxu1 %v6848_v53 }
  0x82   :  { %4968 = vmatpush1.bf16.msra.mxu0 %v6851_v57 }
  0x83   :  { %4970 = vmatprep.subr.bf16.mxu0 %v6854_v59  ;;  %5000 = vmatpush1.bf16.msra.mxu1 %v6857_v63 }
  0x84   :  { %5002 = vmatprep.subr.bf16.mxu1 %v6860_v1 }
  0x86   :  { %4972 = vmatpush1.bf16.msra.mxu0 %v6863_v2 }
  0x87   :  { %5006 = vmatprep.subr.bf16.mxu0 %v6769_v19  ;;  %5004 = vmatpush1.bf16.msra.mxu1 %v6867_v6 }
  0x88   :  { %5038 = vmatprep.subr.bf16.mxu1 %v6773_v27 }
  0x89   :  { %383 = vmatmul.mubr.f32.vlgmr.msra.gmra.mrb[4].mxu0 %v8213_v45 }
  0x8a   :  { %5008 = vmatpush1.bf16.msra.mxu0 %v6775_v30  ;;  %602 = vmatprep.mubr.f32.mxu0 %v8213_v45 }
  0x8b   :  { %454 = vmatmul.mubr.f32.vlgmr.msra.gmra.mrb[4].mxu1 %v8213_v45  ;;  %5010 = vmatprep.subr.bf16.mxu0 %v6779_v33 }
  0x8c   :  { %5040 = vmatpush1.bf16.msra.mxu1 %v6781_v36  ;;  %673 = vmatprep.mubr.f32.mxu1 %v8213_v45 }
  0x8d   :  { %5042 = vmatprep.subr.bf16.mxu1 %v6785_v39 }
  0x8e   :  { %5012 = vmatpush1.bf16.msra.mxu0 %v6788_v42 }
  0x8f   :  { %5014 = vmatprep.subr.bf16.mxu0 %v6793_v46 }
  0x90   :  { %5044 = vmatpush1.bf16.msra.mxu1 %v6796_v49 }
  0x91   :  { %5046 = vmatprep.subr.bf16.mxu1 %v6800_v52 }
  0x92   :  { %5016 = vmatpush1.bf16.msra.mxu0 %v6803_v55 }
  0x93   :  { %5018 = vmatprep.subr.bf16.mxu0 %v6806_v58 }
  0x94   :  { %5048 = vmatpush1.bf16.msra.mxu1 %v6809_v61 }
  0x95   :  { %5050 = vmatprep.subr.bf16.mxu1 %v6812_v0 }
  0x96   :  { %5020 = vmatpush1.bf16.msra.mxu0 %v6815_v5 }
  0x97   :  { %5022 = vmatprep.subr.bf16.mxu0 %v6818_v8 }
  0x98   :  { %5052 = vmatpush1.bf16.msra.mxu1 %v6821_v12 }
  0x99   :  { %5054 = vmatprep.subr.bf16.mxu1 %v6824_v16 }
  0x9a   :  { %5024 = vmatpush1.bf16.msra.mxu0 %v6827_v22 }
  0x9b   :  { %5026 = vmatprep.subr.bf16.mxu0 %v6830_v25 }
  0x9c   :  { %5056 = vmatpush1.bf16.msra.mxu1 %v6833_v29 }
  0x9d   :  { %5058 = vmatprep.subr.bf16.mxu1 %v6836_v34 }
  0x9e   :  { %5028 = vmatpush1.bf16.msra.mxu0 %v6839_v38 }
  0x9f   :  { %5030 = vmatprep.subr.bf16.mxu0 %v6842_v43 }
  0xa0   :  { %5060 = vmatpush1.bf16.msra.mxu1 %v6845_v48 }
  0xa1   :  { %5062 = vmatprep.subr.bf16.mxu1 %v6848_v53 }
  0xa2   :  { %5032 = vmatpush1.bf16.msra.mxu0 %v6851_v57 }
  0xa3   :  { %5034 = vmatprep.subr.bf16.mxu0 %v6854_v59 }
  0xa4   :  { %5064 = vmatpush1.bf16.msra.mxu1 %v6857_v63 }
  0xa5   :  { %5066 = vmatprep.subr.bf16.mxu1 %v6860_v1 }
  0xa6   :  { %5036 = vmatpush1.bf16.msra.mxu0 %v6863_v2 }
  0xa7   :  { %982 = vmatprep.subr.bf16.mxu0 %v6908_v7 }
  0xa8   :  { %5068 = vmatpush1.bf16.msra.mxu1 %v6867_v6 }
  0xa9   :  { %1023 = vmatprep.subr.bf16.mxu1 %v6910_v9 }
 0x13c   :  { %v202_v10 = vpop.f32.mrb[0].mxu0  ;;  %v245_v14 = vpop.f32.mrb[0].mxu1 }
 0x13d   :  { %v204_v11 = vpop.f32.mrb[1].mxu0  ;;  %v247_v17 = vpop.f32.mrb[1].mxu1  ;;  %v6924_v32 = vadd.f32 %v202_v10, %v116_v26  ;;  %v6938_v21 = vadd.f32 %v245_v14, %v124_v37 }
 0x13e   :  { %v206_v13 = vpop.f32.mrb[2].mxu0  ;;  %v249_v18 = vpop.f32.mrb[2].mxu1  ;;  %v6926_v35 = vadd.f32 %v204_v11, %v120_v28 }
 0x13f   :  { %v208_v15 = vpop.f32.mrb[3].mxu0  ;;  %v251_v20 = vpop.f32.mrb[3].mxu1  ;;  %8528 = vst [vmem:[#allocation46_spill] sm:$0xff] %v6924_v32  ;;  %v6930_v41 = vadd.f32 %v206_v13, %v116_v26  ;;  %8532 = vst [vmem:[#allocation50_spill] sm:$0xff] %v6938_v21 }
 0x140   :  { %8529 = vst [vmem:[#allocation47_spill] sm:$0xff] %v6926_v35  ;;  %v6933_v51 = vadd.f32 %v208_v15, %v120_v28  ;;  %v128_v28 = vrot.slane %v111_v23, %v8215_v54 }
 0x141   :  { %8530 = vst [vmem:[#allocation48_spill] sm:$0xff] %v6930_v41 }
 0x142   :  { %8531 = vst [vmem:[#allocation49_spill] sm:$0xff] %v6933_v51 }
 0x15c   :  { %v384_v40 = vpop.f32.mrb[4].mxu0 }
 0x15d   :  { %v464_v44 = vrot.slane %v384_v40, 1  ;;  %v476_v47 = vadd.f32 %v384_v40, %v6924_v32  ;;  %v386_v50 = vpop.f32.mrb[5].mxu0  ;;  %v6941_v40 = vadd.f32 %v249_v18, %v124_v37 }
 0x15e   :  { %v465_v56 = vrot.slane %v386_v50, 1  ;;  %v477_v60 = vadd.f32 %v386_v50, %v6926_v35  ;;  %v455_v62 = vpop.f32.mrb[4].mxu1 }
 0x15f   :  { %v480_v10 = vadd.f32 %v464_v44, %v6930_v41  ;;  %v4760_v11 = vmul.f32 -1.442695, %v476_v47  ;;  %v466_v24 = vrot.slane %v455_v62, 1  ;;  %v457_v31 = vpop.f32.mrb[5].mxu1  ;;  %8533 = vst [vmem:[#allocation51_spill] sm:$0xff] %v6941_v40  ;;  %v478_v45 = vadd.f32 %v455_v62, %v6938_v21 }
 0x160   :  { %v481_v13 = vadd.f32 %v465_v56, %v6933_v51  ;;  %v4761_v26 = vmul.f32 -1.442695, %v477_v60  ;;  %v467_v14 = vrot.slane %v457_v31, 1  ;;  %v6947_v47 = vadd.f32 %v247_v17, %v128_v28 }
 0x161   :  { %6045 = vpow2.f32 %v4760_v11  ;;  %v4763_v15 = vmul.f32 -1.442695, %v480_v10  ;;  %v482_v44 = vadd.f32 %v466_v24, %v6941_v40  ;;  %v4762_v56 = vmul.f32 -1.442695, %v478_v45 }
 0x162   :  { %6047 = vpow2.f32 %v4761_v26  ;;  %v4764_v50 = vmul.f32 -1.442695, %v481_v13  ;;  %8534 = vst [vmem:[#allocation52_spill] sm:$0xff] %v6947_v47  ;;  %v6949_v60 = vadd.f32 %v251_v20, %v128_v28  ;;  %v479_v37 = vadd.f32 %v457_v31, %v6947_v47  ;;  %v1099_v47 = vld [vmem:[#allocation6 + $0x118] sm:$0xff] }
 0x163   :  { %6049 = vpow2.f32 %v4763_v15  ;;  %v4765_v18 = vmul.f32 -1.442695, %v482_v44 }
 0x164   :  { %6051 = vpow2.f32 %v4764_v50  ;;  %8535 = vst [vmem:[#allocation53_spill] sm:$0xff] %v6949_v60  ;;  %v483_v10 = vadd.f32 %v467_v14, %v6949_v60 }
 0x165   :  { %6053 = vpow2.f32 %v4762_v56 }
 0x166   :  { %6055 = vpow2.f32 %v4765_v18 }
 0x167   :  { %6057 = vtanh.f32 %v479_v37 }
 0x168   :  { %6059 = vtanh.f32 %v483_v10 }
 0x16b   :  { %v6046_v23 = vpop.eup %6045 }
 0x16c   :  { %v6048_v11 = vpop.eup %6047  ;;  %v502_v62 = vadd.f32 1.0, %v6046_v23 }
 0x16d   :  { %v6050_v13 = vpop.eup %6049  ;;  %v503_v24 = vadd.f32 1.0, %v6048_v11 }
 0x16e   :  { %v6052_v26 = vpop.eup %6051  ;;  %v505_v17 = vadd.f32 1.0, %v6050_v13  ;;  %6061 = vrcp.f32 %v502_v62 }
 0x16f   :  { %v506_v45 = vadd.f32 1.0, %v6052_v26  ;;  %6063 = vrcp.f32 %v503_v24  ;;  %v6054_v20 = vpop.eup %6053 }
 0x170   :  { %6065 = vrcp.f32 %v505_v17  ;;  %v6056_v31 = vpop.eup %6055  ;;  %v504_v14 = vadd.f32 1.0, %v6054_v20 }
 0x171   :  { %6067 = vrcp.f32 %v506_v45  ;;  %v6058_v15 = vpop.eup %6057  ;;  %v507_v11 = vadd.f32 1.0, %v6056_v31 }
 0x172   :  { %v6060_v28 = vpop.eup %6059  ;;  %6069 = vrcp.f32 %v504_v14  ;;  %v6961_v14 = vld [vmem:[#allocation4 + $0x8] ss:$16 sps:$4 sm:$0xff]  }
 0x173   :  { %8539 = vst [vmem:[#allocation57_spill] sm:$0xff] %v6961_v14 }
 0x178   :  { %v6062_v50 = vpop.eup %6061 }
 0x179   :  { %v6064_v44 = vpop.eup %6063  ;;  %v524_v56 = vmul.f32 %v6062_v50, %v6058_v15 }
 0x17a   :  { %v6066_v18 = vpop.eup %6065  ;;  %v522_v37 = vmul.f32 0.0, %v6064_v44  ;;  %v6959_v44 = vld [vmem:[#allocation4] ss:$16 sps:$4 sm:$0xff]  }
 0x17b   :  { %v6068_v23 = vpop.eup %6067  ;;  %v525_v10 = vmul.f32 %v6066_v18, %v6060_v28  ;;  %8538 = vst [vmem:[#allocation56_spill] sm:$0xff] %v6959_v44 }
 0x17c   :  { %v523_v54 = vmul.f32 0.0, %v6068_v23  ;;  %v6953_v13 = vadd.f32 %v524_v56, %v522_v37  ;;  %v6070_v24 = vpop.eup %6069  ;;  %v6965_v56 = vld [vmem:[#allocation4 + $0x2c] ss:$16 sps:$4 sm:$0xff]  }
 0x17d   :  { %8541 = vst [vmem:[#allocation59_spill] sm:$0xff] %v6965_v56 }
 0x17e   :  { %8536 = vst [vmem:[#allocation54_spill] sm:$0xff] %v6953_v13  ;;  %v6955_v62 = vadd.f32 %v525_v10, %v523_v54  ;;  %6071 = vtanh.f32 %v6953_v13  ;;  %v6963_v54 = vld [vmem:[#allocation4 + $0x24] ss:$16 sps:$4 sm:$0xff]   ;;  %v6972_v10 = vld [vmem:[#allocation4 + $0x28] ss:$16 sps:$4 sm:$0xff]  }
 0x17f   :  { %6073 = vrcp.f32 %v507_v11  ;;  %8540 = vst [vmem:[#allocation58_spill] sm:$0xff] %v6963_v54  ;;  %v6970_v11 = vld [vmem:[#allocation4 + $0x20] ss:$16 sps:$4 sm:$0xff]   ;;  %8543 = vst [vmem:[#allocation61_spill] sm:$0xff] %v6972_v10  ;;  %v1091_v13 = vld [vmem:[#allocation6 + $0xd8] sm:$0xff] }
 0x180   :  { %8537 = vst [vmem:[#allocation55_spill] sm:$0xff] %v6955_v62  ;;  %6075 = vtanh.f32 %v6955_v62  ;;  %8542 = vst [vmem:[#allocation60_spill] sm:$0xff] %v6970_v11 }
 0x188   :  { %v6072_v26 = vpop.eup %6071 }
 0x189   :  { %v6074_v17 = vpop.eup %6073  ;;  %v530_v45 = vmul.f32 %v6072_v26, %v6070_v24  ;;  %v6976_v26 = vld [vmem:[#allocation4 + $0x44] ss:$16 sps:$4 sm:$0xff]  }
 0x18a   :  { %v6076_v20 = vpop.eup %6075  ;;  %8544 = vst [vmem:[#allocation62_spill] sm:$0xff] %v6976_v26 }
 0x18b   :  { %v531_v15 = vmul.f32 %v6076_v20, %v6074_v17  ;;  %v758_v28 = vpack.c.bf16 %v530_v45, %v530_v45  ;;  %v6978_v17 = vld [vmem:[#allocation4 + $0x4c] ss:$16 sps:$4 sm:$0xff]   ;;  %v6987_v20 = vld [vmem:[#allocation4 + $0x40] ss:$16 sps:$4 sm:$0xff]  }
 0x18c   :  { %8545 = vst [vmem:[#allocation63_spill] sm:$0xff] %v6978_v17  ;;  %8546 = vst [vmem:[#allocation64_spill] sm:$0xff] %v6987_v20 }
 0x18d   :  { %v534_v31 = vrot.slane %v531_v15, 7  ;;  %v759_v50 = vpack.c.bf16 %v531_v15, %v531_v15  ;;  %v816_v23 = vunpack.c.l.b16 %v758_v28  ;;  %v6989_v15 = vld [vmem:[#allocation4 + $0x48] ss:$16 sps:$4 sm:$0xff]   ;;  %v6995_v28 = vld [vmem:[#allocation4 + $0x6c] ss:$16 sps:$4 sm:$0xff]  }
 0x18e   :  { %8547 = vst [vmem:[#allocation65_spill] sm:$0xff] %v6989_v15  ;;  %8549 = vst [vmem:[#allocation67_spill] sm:$0xff] %v6995_v28 }
 0x18f   :  { %v536_v18 = vsel %vm535_vm2, %v534_v31, %v530_v45  ;;  %v817_v37 = vunpack.c.l.b16 %v759_v50  ;;  %v6993_v31 = vld [vmem:[#allocation4 + $0x64] ss:$16 sps:$4 sm:$0xff]   ;;  %v6999_v50 = vld [vmem:[#allocation4 + $0x60] ss:$16 sps:$4 sm:$0xff]  }
 0x190   :  { %603 = vmatmul.mubr.f32.vlgmr.msra.gmra.mrb[6].mxu0 %v536_v18  ;;  %674 = vmatmul.mubr.f32.vlgmr.msra.gmra.mrb[6].mxu1 %v536_v18  ;;  %8548 = vst [vmem:[#allocation66_spill] sm:$0xff] %v6993_v31  ;;  %8550 = vst [vmem:[#allocation68_spill] sm:$0xff] %v6999_v50  ;;  %v7001_v18 = vld [vmem:[#allocation4 + $0x68] ss:$16 sps:$4 sm:$0xff]  }
 0x191   :  { %983 = vmatpush1.bf16.msra.mxu0 %v6959_v44  ;;  %1024 = vmatpush1.bf16.msra.mxu1 %v6961_v14  ;;  %v818_v24 = vrot.slane %v817_v37, 7  ;;  %8551 = vst [vmem:[#allocation69_spill] sm:$0xff] %v7001_v18  ;;  %v7005_v37 = vld [vmem:[#allocation4 + $0x84] ss:$16 sps:$4 sm:$0xff]   ;;  %v1077_v14 = vld [vmem:[#allocation6 + $0x68] sm:$0xff]  ;;  %v1075_v44 = vld [vmem:[#allocation6 + $0x58] sm:$0xff] }
 0x192   :  { %984 = vmatprep.subr.bf16.mxu0 %v6963_v54  ;;  %1025 = vmatprep.subr.bf16.mxu1 %v6965_v56  ;;  %8552 = vst [vmem:[#allocation70_spill] sm:$0xff] %v7005_v37  ;;  %v1070_v56 = vld [vmem:[#allocation6 + $0x30] sm:$0xff]  ;;  %v1073_v54 = vld [vmem:[#allocation6 + $0x48] sm:$0xff] }
 0x193   :  { %1014 = vmatprep.mubr.bf16.mxu0 %v8216_v3  ;;  %1055 = vmatprep.mubr.bf16.mxu1 %v8216_v3  ;;  %v6983_v45 = vsel %vm535_vm2, %v818_v24, %v816_v23  ;;  %v7007_v23 = vld [vmem:[#allocation4 + $0x8c] ss:$16 sps:$4 sm:$0xff]   ;;  %v7011_v24 = vld [vmem:[#allocation4 + $0x80] ss:$16 sps:$4 sm:$0xff]   ;;  %v7013_v3 = vld [vmem:[#allocation4 + $0x88] ss:$16 sps:$4 sm:$0xff]  }
 0x194   :  { %8553 = vst [vmem:[#allocation71_spill] sm:$0xff] %v7007_v23  ;;  %8554 = vst [vmem:[#allocation72_spill] sm:$0xff] %v7011_v24 }
 0x195   :  { %985 = vmatpush1.bf16.msra.mxu0 %v6970_v11  ;;  %1026 = vmatpush1.bf16.msra.mxu1 %v6972_v10  ;;  %8555 = vst [vmem:[#allocation73_spill] sm:$0xff] %v7013_v3  ;;  %v1066_v11 = vld [vmem:[#allocation6 + $0x10] sm:$0xff] }
 0x196   :  { %986 = vmatprep.subr.bf16.mxu0 %v6976_v26  ;;  %1027 = vmatprep.subr.bf16.mxu1 %v6978_v17  ;;  %v1067_v17 = vld [vmem:[#allocation6 + $0x18] sm:$0xff]  ;;  %v7061_v62 = vpack.c.bf16 %v1070_v56, %v1066_v11 }
 0x197   :  { %v1071_v26 = vld [vmem:[#allocation6 + $0x38] sm:$0xff] }
 0x198   :  { %v7055_v10 = vpack.c.bf16 %v1071_v26, %v1067_v17  ;;  %8571 = vst [vmem:[#allocation89_spill] sm:$0xff] %v7061_v62  ;;  %v820_v26 = vpack.c.b16 %v6983_v45, %v6983_v45  ;;  %v7067_v17 = vpack.c.bf16 %v1077_v14, %v1073_v54  ;;  %v1087_v56 = vld [vmem:[#allocation6 + $0xb8] sm:$0xff]  ;;  %v1080_v14 = vld [vmem:[#allocation6 + $0x80] sm:$0xff] }
 0x199   :  { %987 = vmatpush1.bf16.msra.mxu0 %v6987_v20  ;;  %1028 = vmatpush1.bf16.msra.mxu1 %v6989_v15  ;;  %v7017_v15 = vld [vmem:[#allocation4 + $0xa4] ss:$16 sps:$4 sm:$0xff]   ;;  %v1069_v20 = vld [vmem:[#allocation6 + $0x28] sm:$0xff] }
 0x19a   :  { %988 = vmatprep.subr.bf16.mxu0 %v6993_v31  ;;  %1029 = vmatprep.subr.bf16.mxu1 %v6995_v28  ;;  %8556 = vst [vmem:[#allocation74_spill] sm:$0xff] %v7017_v15  ;;  %v7019_v31 = vld [vmem:[#allocation4 + $0xac] ss:$16 sps:$4 sm:$0xff]   ;;  %v7023_v28 = vld [vmem:[#allocation4 + $0xa0] ss:$16 sps:$4 sm:$0xff]   ;;  %8569 = vst [vmem:[#allocation87_spill] sm:$0xff] %v7055_v10 }
 0x19b   :  { %8557 = vst [vmem:[#allocation75_spill] sm:$0xff] %v7019_v31  ;;  %8558 = vst [vmem:[#allocation76_spill] sm:$0xff] %v7023_v28  ;;  %v1084_v54 = vld [vmem:[#allocation6 + $0xa0] sm:$0xff] }
 0x19c   :  { %8572 = vst [vmem:[#allocation90_spill] sm:$0xff] %v7067_v17 }
 0x19d   :  { %989 = vmatpush1.bf16.msra.mxu0 %v6999_v50  ;;  %1030 = vmatpush1.bf16.msra.mxu1 %v7001_v18  ;;  %v7025_v50 = vld [vmem:[#allocation4 + $0xa8] ss:$16 sps:$4 sm:$0xff]   ;;  %v7029_v18 = vld [vmem:[#allocation4 + $0xc4] ss:$16 sps:$4 sm:$0xff]  }
 0x19e   :  { %990 = vmatprep.subr.bf16.mxu0 %v7005_v37  ;;  %1031 = vmatprep.subr.bf16.mxu1 %v7007_v23  ;;  %8559 = vst [vmem:[#allocation77_spill] sm:$0xff] %v7025_v50  ;;  %8560 = vst [vmem:[#allocation78_spill] sm:$0xff] %v7029_v18  ;;  %v7031_v37 = vld [vmem:[#allocation4 + $0xcc] ss:$16 sps:$4 sm:$0xff]   ;;  %v7035_v23 = vld [vmem:[#allocation4 + $0xc0] ss:$16 sps:$4 sm:$0xff]  }
 0x19f   :  { %8561 = vst [vmem:[#allocation79_spill] sm:$0xff] %v7031_v37  ;;  %8562 = vst [vmem:[#allocation80_spill] sm:$0xff] %v7035_v23 }
 0x1a1   :  { %991 = vmatpush1.bf16.msra.mxu0 %v7011_v24  ;;  %1032 = vmatpush1.bf16.msra.mxu1 %v7013_v3  ;;  %v7037_v24 = vld [vmem:[#allocation4 + $0xc8] ss:$16 sps:$4 sm:$0xff]   ;;  %v7041_v3 = vld [vmem:[#allocation4 + $0xe4] ss:$16 sps:$4 sm:$0xff]  }
 0x1a2   :  { %992 = vmatprep.subr.bf16.mxu0 %v7017_v15  ;;  %1033 = vmatprep.subr.bf16.mxu1 %v7019_v31  ;;  %8563 = vst [vmem:[#allocation81_spill] sm:$0xff] %v7037_v24  ;;  %8564 = vst [vmem:[#allocation82_spill] sm:$0xff] %v7041_v3  ;;  %v7043_v15 = vld [vmem:[#allocation4 + $0xec] ss:$16 sps:$4 sm:$0xff]  }
 0x1a3   :  { %8565 = vst [vmem:[#allocation83_spill] sm:$0xff] %v7043_v15  ;;  %v1065_v31 = vld [vmem:[#allocation6 + $0x8] sm:$0xff] }
 0x1a5   :  { %993 = vmatpush1.bf16.msra.mxu0 %v7023_v28  ;;  %1034 = vmatpush1.bf16.msra.mxu1 %v7025_v50  ;;  %v7049_v50 = vld [vmem:[#allocation4 + $0xe8] ss:$16 sps:$4 sm:$0xff]   ;;  %v1064_v28 = vld [vmem:[#allocation6] sm:$0xff] }
 0x1a6   :  { %994 = vmatprep.subr.bf16.mxu0 %v7029_v18  ;;  %1035 = vmatprep.subr.bf16.mxu1 %v7031_v37  ;;  %8567 = vst [vmem:[#allocation85_spill] sm:$0xff] %v7049_v50  ;;  %v1068_v18 = vld [vmem:[#allocation6 + $0x20] sm:$0xff]  ;;  %v7053_v37 = vpack.c.bf16 %v1069_v20, %v1065_v31  ;;  %v1074_v31 = vld [vmem:[#allocation6 + $0x50] sm:$0xff] }
 0x1a8   :  { %8568 = vst [vmem:[#allocation86_spill] sm:$0xff] %v7053_v37 }
 0x1a9   :  { %995 = vmatpush1.bf16.msra.mxu0 %v7035_v23  ;;  %1036 = vmatpush1.bf16.msra.mxu1 %v7037_v24  ;;  %v1079_v23 = vld [vmem:[#allocation6 + $0x78] sm:$0xff]  ;;  %v7059_v24 = vpack.c.bf16 %v1068_v18, %v1064_v28  ;;  %v1085_v28 = vld [vmem:[#allocation6 + $0xa8] sm:$0xff] }
 0x1aa   :  { %996 = vmatprep.subr.bf16.mxu0 %v7041_v3  ;;  %1037 = vmatprep.subr.bf16.mxu1 %v7043_v15  ;;  %v1072_v3 = vld [vmem:[#allocation6 + $0x40] sm:$0xff]  ;;  %v7069_v20 = vpack.c.bf16 %v1079_v23, %v1075_v44  ;;  %v1083_v18 = vld [vmem:[#allocation6 + $0x98] sm:$0xff] }
 0x1ab   :  { %8570 = vst [vmem:[#allocation88_spill] sm:$0xff] %v7059_v24  ;;  %v1076_v15 = vld [vmem:[#allocation6 + $0x60] sm:$0xff]  ;;  %v7081_v23 = vpack.c.bf16 %v1087_v56, %v1083_v18  ;;  %v1090_v56 = vld [vmem:[#allocation6 + $0xd0] sm:$0xff] }
 0x1ac   :  { %8573 = vst [vmem:[#allocation91_spill] sm:$0xff] %v7069_v20  ;;  %v7073_v11 = vpack.c.bf16 %v1076_v15, %v1072_v3  ;;  %v8578_v3 = vmov 0.0  }
 0x1ad   :  { %997 = vmatpush1.bf16.msra.mxu0 %v7045_v4  ;;  %1038 = vmatpush1.bf16.msra.mxu1 %v7049_v50  ;;  %v1078_v4 = vld [vmem:[#allocation6 + $0x70] sm:$0xff]  ;;  %v1081_v50 = vld [vmem:[#allocation6 + $0x88] sm:$0xff]  ;;  %8577 = vst [vmem:[#allocation95_spill] sm:$0xff] %v7081_v23 }
 0x1ae   :  { %5070 = vmatprep.subr.bf16.mxu0 %v7053_v37  ;;  %5102 = vmatprep.subr.bf16.mxu1 %v7055_v10  ;;  %8574 = vst [vmem:[#allocation92_spill] sm:$0xff] %v7073_v11  ;;  %v7075_v45 = vpack.c.bf16 %v1078_v4, %v1074_v31  ;;  %v7079_v44 = vpack.c.bf16 %v1085_v28, %v1081_v50  ;;  %v1082_v10 = vld [vmem:[#allocation6 + $0x90] sm:$0xff]  ;;  %v1089_v37 = vld [vmem:[#allocation6 + $0xc8] sm:$0xff]  ;;  %v1088_v50 = vld [vmem:[#allocation6 + $0xc0] sm:$0xff] }
 0x1af   :  { %v7087_v4 = vpack.c.bf16 %v1084_v54, %v1080_v14  ;;  %v1092_v31 = vld [vmem:[#allocation6 + $0xe0] sm:$0xff] }
 0x1b0   :  { %1015 = vmatmul.mubr.bf16.vlgmr.msra.gmra.mrb[8].mxu0 %v820_v26  ;;  %1056 = vmatmul.mubr.bf16.vlgmr.msra.gmra.mrb[8].mxu1 %v820_v26  ;;  %8575 = vst [vmem:[#allocation93_spill] sm:$0xff] %v7075_v45  ;;  %8576 = vst [vmem:[#allocation94_spill] sm:$0xff] %v7079_v44  ;;  %v1086_v26 = vld [vmem:[#allocation6 + $0xb0] sm:$0xff]  ;;  %v1096_v54 = vld [vmem:[#allocation6 + $0x100] sm:$0xff] }
 0x1b1   :  { %5072 = vmatpush1.bf16.msra.mxu0 %v7059_v24  ;;  %5104 = vmatpush1.bf16.msra.mxu1 %v7061_v62  ;;  %v1093_v24 = vld [vmem:[#allocation6 + $0xe8] sm:$0xff]  ;;  %v1095_v62 = vld [vmem:[#allocation6 + $0xf8] sm:$0xff]  ;;  %8579 = vst [vmem:[#allocation96_spill] sm:$0xff] %v7087_v4  ;;  %v7089_v15 = vpack.c.bf16 %v1086_v26, %v1082_v10  ;;  %v7099_v10 = vpack.c.bf16 %v1092_v31, %v1088_v50  ;;  %v1100_v26 = vld [vmem:[#allocation6 + $0x120] sm:$0xff] }
 0x1b2   :  { %5074 = vmatprep.subr.bf16.mxu0 %v7067_v17  ;;  %5106 = vmatprep.subr.bf16.mxu1 %v7069_v20  ;;  %v7093_v28 = vpack.c.bf16 %v1093_v24, %v1089_v37  ;;  %v7095_v18 = vpack.c.bf16 %v1095_v62, %v1091_v13  ;;  %v1094_v20 = vld [vmem:[#allocation6 + $0xf0] sm:$0xff]  ;;  %v1097_v17 = vld [vmem:[#allocation6 + $0x108] sm:$0xff]  ;;  %v1104_v31 = vld [vmem:[#allocation6 + $0x140] sm:$0xff] }
 0x1b3   :  { %1192 = vmatprep.mubr.f32.mxu0 %v8578_v3  ;;  %1263 = vmatprep.mubr.f32.mxu1 %v8578_v3  ;;  %8580 = vst [vmem:[#allocation97_spill] sm:$0xff] %v7089_v15  ;;  %8583 = vst [vmem:[#allocation100_spill] sm:$0xff] %v7099_v10  ;;  %v7101_v14 = vpack.c.bf16 %v1094_v20, %v1090_v56  ;;  %v1098_v37 = vld [vmem:[#allocation6 + $0x110] sm:$0xff]  ;;  %v7111_v20 = vpack.c.bf16 %v1100_v26, %v1096_v54  ;;  %v1108_v56 = vld [vmem:[#allocation6 + $0x160] sm:$0xff] }
 0x1b4   :  { %8581 = vst [vmem:[#allocation98_spill] sm:$0xff] %v7093_v28  ;;  %8582 = vst [vmem:[#allocation99_spill] sm:$0xff] %v7095_v18  ;;  %v1102_v24 = vld [vmem:[#allocation6 + $0x130] sm:$0xff]  ;;  %v7123_v54 = vpack.c.bf16 %v1108_v56, %v1104_v31 }
 0x1b5   :  { %5076 = vmatpush1.bf16.msra.mxu0 %v7073_v11  ;;  %5108 = vmatpush1.bf16.msra.mxu1 %v7075_v45  ;;  %v1101_v11 = vld [vmem:[#allocation6 + $0x128] sm:$0xff]  ;;  %v1103_v45 = vld [vmem:[#allocation6 + $0x138] sm:$0xff]  ;;  %8584 = vst [vmem:[#allocation101_spill] sm:$0xff] %v7101_v14  ;;  %8587 = vst [vmem:[#allocation104_spill] sm:$0xff] %v7111_v20  ;;  %v7113_v50 = vpack.c.bf16 %v1102_v24, %v1098_v37 }
 0x1b6   :  { %5078 = vmatprep.subr.bf16.mxu0 %v7079_v44  ;;  %5110 = vmatprep.subr.bf16.mxu1 %v7081_v23  ;;  %v7105_v13 = vpack.c.bf16 %v1101_v11, %v1097_v17  ;;  %v7107_v62 = vpack.c.bf16 %v1103_v45, %v1099_v47  ;;  %v1105_v23 = vld [vmem:[#allocation6 + $0x148] sm:$0xff]  ;;  %v1107_v44 = vld [vmem:[#allocation6 + $0x158] sm:$0xff]  ;;  %v1106_v11 = vld [vmem:[#allocation6 + $0x150] sm:$0xff]  ;;  %8591 = vst [vmem:[#allocation108_spill] sm:$0xff] %v7123_v54 }
 0x1b7   :  { %8588 = vst [vmem:[#allocation105_spill] sm:$0xff] %v7113_v50  ;;  %v1110_v45 = vld [vmem:[#allocation6 + $0x170] sm:$0xff]  ;;  %v1112_v37 = vld [vmem:[#allocation6 + $0x180] sm:$0xff] }
 0x1b8   :  { %8585 = vst [vmem:[#allocation102_spill] sm:$0xff] %v7105_v13  ;;  %8586 = vst [vmem:[#allocation103_spill] sm:$0xff] %v7107_v62  ;;  %v7125_v26 = vpack.c.bf16 %v1110_v45, %v1106_v11  ;;  %v1116_v24 = vld [vmem:[#allocation6 + $0x1a0] sm:$0xff]  ;;  %v1126_v45 = vld [vmem:[#allocation6 + $0x1f0] sm:$0xff] }
 0x1b9   :  { %5080 = vmatpush1.bf16.msra.mxu0 %v7087_v4  ;;  %5112 = vmatpush1.bf16.msra.mxu1 %v7089_v15  ;;  %v1109_v4 = vld [vmem:[#allocation6 + $0x168] sm:$0xff]  ;;  %v1111_v15 = vld [vmem:[#allocation6 + $0x178] sm:$0xff]  ;;  %v7135_v31 = vpack.c.bf16 %v1116_v24, %v1112_v37  ;;  %v1120_v11 = vld [vmem:[#allocation6 + $0x1c0] sm:$0xff] }
 0x1ba   :  { %5082 = vmatprep.subr.bf16.mxu0 %v7093_v28  ;;  %5114 = vmatprep.subr.bf16.mxu1 %v7095_v18  ;;  %v7117_v47 = vpack.c.bf16 %v1109_v4, %v1105_v23  ;;  %v7119_v17 = vpack.c.bf16 %v1111_v15, %v1107_v44  ;;  %v1113_v18 = vld [vmem:[#allocation6 + $0x188] sm:$0xff]  ;;  %v1115_v28 = vld [vmem:[#allocation6 + $0x198] sm:$0xff]  ;;  %8592 = vst [vmem:[#allocation109_spill] sm:$0xff] %v7125_v26  ;;  %v1114_v4 = vld [vmem:[#allocation6 + $0x190] sm:$0xff] }
 0x1bb   :  { %v1118_v15 = vld [vmem:[#allocation6 + $0x1b0] sm:$0xff]  ;;  %8595 = vst [vmem:[#allocation112_spill] sm:$0xff] %v7135_v31 }
 0x1bc   :  { %8589 = vst [vmem:[#allocation106_spill] sm:$0xff] %v7117_v47  ;;  %8590 = vst [vmem:[#allocation107_spill] sm:$0xff] %v7119_v17  ;;  %v7137_v56 = vpack.c.bf16 %v1118_v15, %v1114_v4 }
 0x1bd   :  { %5084 = vmatpush1.bf16.msra.mxu0 %v7099_v10  ;;  %5116 = vmatpush1.bf16.msra.mxu1 %v7101_v14  ;;  %v1117_v10 = vld [vmem:[#allocation6 + $0x1a8] sm:$0xff]  ;;  %v1119_v14 = vld [vmem:[#allocation6 + $0x1b8] sm:$0xff] }
 0x1be   :  { %5086 = vmatprep.subr.bf16.mxu0 %v7105_v13  ;;  %5118 = vmatprep.subr.bf16.mxu1 %v7107_v62  ;;  %v7129_v44 = vpack.c.bf16 %v1117_v10, %v1113_v18  ;;  %v7131_v23 = vpack.c.bf16 %v1119_v14, %v1115_v28  ;;  %v1121_v62 = vld [vmem:[#allocation6 + $0x1c8] sm:$0xff]  ;;  %v1123_v13 = vld [vmem:[#allocation6 + $0x1d8] sm:$0xff]  ;;  %8596 = vst [vmem:[#allocation113_spill] sm:$0xff] %v7137_v56  ;;  %v1124_v10 = vld [vmem:[#allocation6 + $0x1e0] sm:$0xff] }
 0x1bf   :  { %v1122_v14 = vld [vmem:[#allocation6 + $0x1d0] sm:$0xff]  ;;  %v7147_v37 = vpack.c.bf16 %v1124_v10, %v1120_v11 }
 0x1c0   :  { %8593 = vst [vmem:[#allocation110_spill] sm:$0xff] %v7129_v44  ;;  %8594 = vst [vmem:[#allocation111_spill] sm:$0xff] %v7131_v23  ;;  %v7149_v24 = vpack.c.bf16 %v1126_v45, %v1122_v14 }
 0x1c1   :  { %5088 = vmatpush1.bf16.msra.mxu0 %v7111_v20  ;;  %5120 = vmatpush1.bf16.msra.mxu1 %v7113_v50  ;;  %v1125_v20 = vld [vmem:[#allocation6 + $0x1e8] sm:$0xff]  ;;  %v1127_v50 = vld [vmem:[#allocation6 + $0x1f8] sm:$0xff]  ;;  %8599 = vst [vmem:[#allocation116_spill] sm:$0xff] %v7147_v37 }
 0x1c2   :  { %5090 = vmatprep.subr.bf16.mxu0 %v7117_v47  ;;  %5122 = vmatprep.subr.bf16.mxu1 %v7119_v17  ;;  %v7141_v28 = vpack.c.bf16 %v1125_v20, %v1121_v62  ;;  %v7143_v18 = vpack.c.bf16 %v1127_v50, %v1123_v13  ;;  %8600 = vst [vmem:[#allocation117_spill] sm:$0xff] %v7149_v24 }
 0x1c4   :  { %8597 = vst [vmem:[#allocation114_spill] sm:$0xff] %v7141_v28  ;;  %8598 = vst [vmem:[#allocation115_spill] sm:$0xff] %v7143_v18 }
 0x1c5   :  { %5092 = vmatpush1.bf16.msra.mxu0 %v7123_v54  ;;  %5124 = vmatpush1.bf16.msra.mxu1 %v7125_v26 }
 0x1c6   :  { %5094 = vmatprep.subr.bf16.mxu0 %v7129_v44  ;;  %5126 = vmatprep.subr.bf16.mxu1 %v7131_v23 }
 0x1c9   :  { %5096 = vmatpush1.bf16.msra.mxu0 %v7135_v31  ;;  %5128 = vmatpush1.bf16.msra.mxu1 %v7137_v56 }
 0x1ca   :  { %5098 = vmatprep.subr.bf16.mxu0 %v7141_v28  ;;  %5130 = vmatprep.subr.bf16.mxu1 %v7143_v18 }
 0x1cd   :  { %5100 = vmatpush1.bf16.msra.mxu0 %v7147_v37  ;;  %5132 = vmatpush1.bf16.msra.mxu1 %v7149_v24 }
 0x1ce   :  { %5134 = vmatprep.subr.bf16.mxu0 %v6769_v19  ;;  %5166 = vmatprep.subr.bf16.mxu1 %v6773_v27 }
 0x1d0   :  { %1193 = vmatmul.mubr.f32.vlgmr.msra.gmra.mrb[12].mxu0 %v8578_v3  ;;  %1264 = vmatmul.mubr.f32.vlgmr.msra.gmra.mrb[12].mxu1 %v8578_v3 }
 0x1d1   :  { %5136 = vmatpush1.bf16.msra.mxu0 %v6775_v30  ;;  %5168 = vmatpush1.bf16.msra.mxu1 %v6781_v36 }
 0x1d2   :  { %5138 = vmatprep.subr.bf16.mxu0 %v6779_v33  ;;  %5170 = vmatprep.subr.bf16.mxu1 %v6785_v39 }
 0x1d3   :  { %1367 = vmatprep.mubr.f32.mxu0 %v8578_v3  ;;  %1438 = vmatprep.mubr.f32.mxu1 %v8578_v3 }
 0x1d5   :  { %5140 = vmatpush1.bf16.msra.mxu0 %v6788_v42  ;;  %5172 = vmatpush1.bf16.msra.mxu1 %v6796_v49 }
 0x1d6   :  { %5142 = vmatprep.subr.bf16.mxu0 %v6793_v46  ;;  %5174 = vmatprep.subr.bf16.mxu1 %v6800_v52 }
 0x1d9   :  { %5144 = vmatpush1.bf16.msra.mxu0 %v6803_v55  ;;  %5176 = vmatpush1.bf16.msra.mxu1 %v6809_v61 }
 0x1da   :  { %5146 = vmatprep.subr.bf16.mxu0 %v6806_v58  ;;  %5178 = vmatprep.subr.bf16.mxu1 %v6812_v0 }
 0x1dd   :  { %5148 = vmatpush1.bf16.msra.mxu0 %v6815_v5  ;;  %5180 = vmatpush1.bf16.msra.mxu1 %v6821_v12 }
 0x1de   :  { %5150 = vmatprep.subr.bf16.mxu0 %v6818_v8  ;;  %5182 = vmatprep.subr.bf16.mxu1 %v6824_v16 }
 0x1e1   :  { %5152 = vmatpush1.bf16.msra.mxu0 %v6827_v22  ;;  %5184 = vmatpush1.bf16.msra.mxu1 %v6833_v29 }
 0x1e2   :  { %5154 = vmatprep.subr.bf16.mxu0 %v6830_v25  ;;  %5186 = vmatprep.subr.bf16.mxu1 %v6836_v34 }
 0x1e5   :  { %5156 = vmatpush1.bf16.msra.mxu0 %v6839_v38  ;;  %5188 = vmatpush1.bf16.msra.mxu1 %v6845_v48 }
 0x1e6   :  { %5158 = vmatprep.subr.bf16.mxu0 %v6842_v43  ;;  %5190 = vmatprep.subr.bf16.mxu1 %v6848_v53 }
 0x1e9   :  { %5160 = vmatpush1.bf16.msra.mxu0 %v6851_v57  ;;  %5192 = vmatpush1.bf16.msra.mxu1 %v6857_v63 }
 0x1ea   :  { %5162 = vmatprep.subr.bf16.mxu0 %v6854_v59  ;;  %5194 = vmatprep.subr.bf16.mxu1 %v6860_v1 }
 0x1ed   :  { %5164 = vmatpush1.bf16.msra.mxu0 %v6863_v2  ;;  %5196 = vmatpush1.bf16.msra.mxu1 %v6867_v6 }
 0x1ee   :  { %1537 = vmatprep.subr.bf16.mxu0 %v6908_v7  ;;  %1578 = vmatprep.subr.bf16.mxu1 %v6910_v9 }
 0x263   :  { %v604_v13 = vpop.f32.mrb[6].mxu0  ;;  %v675_v62 = vpop.f32.mrb[6].mxu1 }
 0x264   :  { %v684_v20 = vrot.slane %v604_v13, 7  ;;  %v700_v50 = vadd.f32 %v604_v13, %v6930_v41  ;;  %v606_v4 = vpop.f32.mrb[7].mxu0  ;;  %v677_v15 = vpop.f32.mrb[7].mxu1  ;;  %v686_v7 = vrot.slane %v675_v62, 7  ;;  %v702_v59 = vadd.f32 %v675_v62, %v6941_v40 }
 0x265   :  { %v685_v11 = vrot.slane %v606_v4, 7  ;;  %v701_v10 = vadd.f32 %v606_v4, %v6933_v51  ;;  %v687_v41 = vrot.slane %v677_v15, 7  ;;  %v703_v4 = vadd.f32 %v677_v15, %v6949_v60 }
 0x266   :  { %v696_v14 = vadd.f32 %v684_v20, %v6924_v32  ;;  %v4769_v45 = vmul.f32 -1.442695, %v700_v50  ;;  %v698_v13 = vadd.f32 %v686_v7, %v6938_v21  ;;  %v4771_v51 = vmul.f32 -1.442695, %v702_v59  ;;  %v8601_v32 = vld [vmem:[#allocation52_spill] sm:$0xff] }
 0x267   :  { %v697_v2 = vadd.f32 %v685_v11, %v6926_v35  ;;  %v4770_v9 = vmul.f32 -1.442695, %v701_v10  ;;  %v699_v11 = vadd.f32 %v687_v41, %v8601_v32 }
 0x268   :  { %v4766_v6 = vmul.f32 -1.442695, %v696_v14  ;;  %6077 = vpow2.f32 %v4769_v45  ;;  %v4768_v20 = vmul.f32 -1.442695, %v698_v13 }
 0x269   :  { %v4767_v1 = vmul.f32 -1.442695, %v697_v2 }
 0x26a   :  { %6079 = vpow2.f32 %v4766_v6 }
 0x26b   :  { %6081 = vpow2.f32 %v4767_v1 }
 0x26c   :  { %6083 = vpow2.f32 %v4770_v9 }
 0x26d   :  { %6085 = vtanh.f32 %v703_v4 }
 0x26e   :  { %6087 = vpow2.f32 %v4771_v51  ;;  %v8602_v51 = vld [vmem:[#allocation54_spill] sm:$0xff] }
 0x26f   :  { %6089 = vpow2.f32 %v4768_v20 }
 0x272   :  { %v6078_v50 = vpop.eup %6077 }
 0x273   :  { %v725_v14 = vadd.f32 1.0, %v6078_v50  ;;  %v744_v50 = vrot.slane %v8602_v51, 7 }
 0x274   :  { %v6080_v2 = vpop.eup %6079 }
 0x275   :  { %v722_v6 = vadd.f32 1.0, %v6080_v2  ;;  %6091 = vrcp.f32 %v725_v14  ;;  %v6082_v62 = vpop.eup %6081 }
 0x276   :  { %6093 = vtanh.f32 %v699_v11  ;;  %v6084_v10 = vpop.eup %6083  ;;  %v723_v1 = vadd.f32 1.0, %v6082_v62  ;;  %v8603_v11 = vld [vmem:[#allocation55_spill] sm:$0xff] }
 0x277   :  { %6095 = vrcp.f32 %v722_v6  ;;  %v726_v45 = vadd.f32 1.0, %v6084_v10  ;;  %v6086_v59 = vpop.eup %6085  ;;  %v745_v32 = vrot.slane %v8603_v11, 7 }
 0x278   :  { %6097 = vrcp.f32 %v723_v1  ;;  %v6088_v15 = vpop.eup %6087 }
 0x279   :  { %6099 = vrcp.f32 %v726_v45  ;;  %v6090_v7 = vpop.eup %6089  ;;  %v727_v20 = vadd.f32 1.0, %v6088_v15 }
 0x27a   :  { %v724_v60 = vadd.f32 1.0, %v6090_v7 }
 0x27b   :  { %6101 = vrcp.f32 %v727_v20 }
 0x27c   :  { %6103 = vrcp.f32 %v724_v60  ;;  %v8606_v60 = vld [vmem:[#allocation56_spill] sm:$0xff] }
 0x27f   :  { %v6092_v9 = vpop.eup %6091 }
 0x280   :  { %v6094_v41 = vpop.eup %6093  ;;  %v751_v13 = vmul.f32 %v6092_v9, %v6086_v59 }
 0x281   :  { %v6096_v4 = vpop.eup %6095 }
 0x282   :  { %v750_v2 = vmul.f32 %v6096_v4, %v6094_v41  ;;  %v6098_v14 = vpop.eup %6097 }
 0x283   :  { %v1016_v6 = vpop.f32.mrb[8].mxu0  ;;  %v1057_v62 = vpop.f32.mrb[8].mxu1  ;;  %v748_v1 = vmul.f32 %v6098_v14, %v744_v50 }
 0x284   :  { %v6100_v10 = vpop.eup %6099  ;;  %v1018_v45 = vpop.f32.mrb[9].mxu0 }
 0x285   :  { %v1059_v40 = vpop.f32.mrb[9].mxu1  ;;  %v749_v21 = vmul.f32 %v6100_v10, %v745_v32  ;;  %v1020_v35 = vpop.f32.mrb[10].mxu0  ;;  %v7203_v59 = vadd.f32 %v750_v2, %v748_v1  ;;  %v8608_v1 = vld [vmem:[#allocation58_spill] sm:$0xff] }
 0x286   :  { %v1061_v63 = vpop.f32.mrb[10].mxu1  ;;  %v1021_v9 = vpop.f32.mrb[11].mxu0 }
 0x287   :  { %8604 = vst [vmem:[#allocation54_spill] sm:$0xff] %v7203_v59  ;;  %v1062_v51 = vpop.f32.mrb[11].mxu1  ;;  %v7205_v15 = vadd.f32 %v751_v13, %v749_v21  ;;  %6105 = vtanh.f32 %v7203_v59  ;;  %v6102_v7 = vpop.eup %6101  ;;  %v8607_v13 = vld [vmem:[#allocation57_spill] sm:$0xff]  ;;  %v8609_v9 = vld [vmem:[#allocation59_spill] sm:$0xff]  ;;  %v8627_v59 = vld [vmem:[#allocation68_spill] sm:$0xff] }
 0x288   :  { %v6104_v41 = vpop.eup %6103  ;;  %v792_v51 = vld [vmem:[%s8204_s6] sm:$0xf] }
 0x289   :  { %8605 = vst [vmem:[#allocation55_spill] sm:$0xff] %v7205_v15  ;;  %6107 = vtanh.f32 %v7205_v15 }
 0x291   :  { %v6106_v4 = vpop.eup %6105 }
 0x292   :  { %v756_v14 = vmul.f32 %v6106_v4, %v6104_v41  ;;  %v8611_v4 = vld [vmem:[#allocation60_spill] sm:$0xff] }
 0x293   :  { %v6108_v50 = vpop.eup %6107 }
 0x294   :  { %v757_v32 = vmul.f32 %v6108_v50, %v6102_v7  ;;  %v1300_v35 = vrot.slane %v756_v14, 1  ;;  %v1527_v63 = vpack.c.bf16 %v756_v14, %v756_v14  ;;  %v8610_v7 = vmov 0   ;;  %v8612_v50 = vld [vmem:[#allocation61_spill] sm:$0xff] }
 0x295   :  { %v8613_v14 = vld [vmem:[#allocation13_spill] sm:$0xff] }
 0x296   :  { %v1528_v20 = vpack.c.bf16 %v757_v32, %v757_v32  ;;  %v1301_v2 = vsel %vm535_vm2, %v757_v32, %v1300_v35  ;;  %v1531_v11 = vunpack.c.l.b16 %v1527_v63  ;;  %v8614_v32 = vsub.s32 0, %v8613_v14 }
 0x297   :  { %1368 = vmatmul.mubr.f32.vlgmr.msra.gmra.mrb[14].mxu0 %v1301_v2  ;;  %1439 = vmatmul.mubr.f32.vlgmr.msra.gmra.mrb[14].mxu1 %v1301_v2  ;;  %v8616_v63 = vsub.s32 2, %v8613_v14  ;;  %v8617_v2 = vld [vmem:[#allocation62_spill] sm:$0xff] }
 0x298   :  { %v1532_v21 = vunpack.c.l.b16 %v1528_v20  ;;  %1538 = vmatpush1.bf16.msra.mxu0 %v8606_v60  ;;  %1579 = vmatpush1.bf16.msra.mxu1 %v8607_v13  ;;  %v1533_v10 = vrot.slane %v1531_v11, 1  ;;  %v7224_v35 = vrot.slane %v792_v51, %v8614_v32  ;;  %v8618_v11 = vld [vmem:[#allocation63_spill] sm:$0xff]  ;;  %v8619_v60 = vsub.s32 1, %v8613_v14  ;;  %v8625_v32 = vld [vmem:[#allocation66_spill] sm:$0xff] }
 0x299   :  { %1539 = vmatprep.subr.bf16.mxu0 %v8608_v1  ;;  %1580 = vmatprep.subr.bf16.mxu1 %v8609_v9  ;;  %v7228_v20 = vrot.slane %v792_v51, %v8616_v63  ;;  %v8623_v1 = vld [vmem:[#allocation64_spill] sm:$0xff]  ;;  %v8624_v9 = vld [vmem:[#allocation65_spill] sm:$0xff]  ;;  %v8626_v63 = vld [vmem:[#allocation67_spill] sm:$0xff] }
 0x29a   :  { %1569 = vmatprep.mubr.bf16.mxu0 %v8610_v7  ;;  %1610 = vmatprep.mubr.bf16.mxu1 %v8610_v7  ;;  %v1534_v41 = vsel %vm535_vm2, %v1532_v21, %v1533_v10  ;;  %8615 = vst [vmem:[#allocation56_spill] sm:$0xff] %v7224_v35  ;;  %v7234_v13 = vrot.slane %v792_v51, %v8619_v60  ;;  %v8621_v21 = vsub.s32 3, %v8613_v14 }
 0x29c   :  { %1540 = vmatpush1.bf16.msra.mxu0 %v8611_v4  ;;  %1581 = vmatpush1.bf16.msra.mxu1 %v8612_v50  ;;  %8620 = vst [vmem:[#allocation57_spill] sm:$0xff] %v7234_v13  ;;  %v7238_v10 = vrot.slane %v792_v51, %v8621_v21  ;;  %v1017_v4 = vadd.f32 %v1016_v6, %v7224_v35  ;;  %v8628_v6 = vld [vmem:[#allocation69_spill] sm:$0xff] }
 0x29d   :  { %1541 = vmatprep.subr.bf16.mxu0 %v8617_v2  ;;  %1582 = vmatprep.subr.bf16.mxu1 %v8618_v11  ;;  %v1058_v50 = vadd.f32 %v1057_v62, %v7228_v20  ;;  %v1019_v2 = vadd.f32 %v1018_v45, %v7234_v13 }
 0x29e   :  { %8622 = vst [vmem:[#allocation58_spill] sm:$0xff] %v7238_v10  ;;  %v1060_v11 = vadd.f32 %v1059_v40, %v7238_v10  ;;  %v8631_v40 = vld [vmem:[#allocation72_spill] sm:$0xff]  ;;  %v8632_v10 = vld [vmem:[#allocation73_spill] sm:$0xff] }
 0x2a0   :  { %1542 = vmatpush1.bf16.msra.mxu0 %v8623_v1  ;;  %1583 = vmatpush1.bf16.msra.mxu1 %v8624_v9 }
 0x2a1   :  { %1543 = vmatprep.subr.bf16.mxu0 %v8625_v32  ;;  %1584 = vmatprep.subr.bf16.mxu1 %v8626_v63  ;;  %v8629_v32 = vld [vmem:[#allocation70_spill] sm:$0xff]  ;;  %v8630_v63 = vld [vmem:[#allocation71_spill] sm:$0xff] }
 0x2a3   :  { %v1194_v60 = vpop.f32.mrb[12].mxu0  ;;  %v1265_v14 = vpop.f32.mrb[12].mxu1 }
 0x2a4   :  { %v1270_v51 = vadd.f32 %v1194_v60, %v1017_v4  ;;  %v1272_v21 = vadd.f32 %v1265_v14, %v1058_v50  ;;  %v1196_v7 = vpop.f32.mrb[13].mxu0  ;;  %v1267_v1 = vpop.f32.mrb[13].mxu1  ;;  %1544 = vmatpush1.bf16.msra.mxu0 %v8627_v59  ;;  %1585 = vmatpush1.bf16.msra.mxu1 %v8628_v6  ;;  %v8633_v4 = vld [vmem:[#allocation74_spill] sm:$0xff]  ;;  %v8635_v50 = vld [vmem:[#allocation76_spill] sm:$0xff]  ;;  %v8636_v59 = vld [vmem:[#allocation77_spill] sm:$0xff] }
 0x2a5   :  { %v1271_v15 = vadd.f32 %v1196_v7, %v1019_v2  ;;  %v1273_v9 = vadd.f32 %v1267_v1, %v1060_v11  ;;  %1545 = vmatprep.subr.bf16.mxu0 %v8629_v32  ;;  %1586 = vmatprep.subr.bf16.mxu1 %v8630_v63  ;;  %v8634_v7 = vld [vmem:[#allocation75_spill] sm:$0xff]  ;;  %v8637_v2 = vld [vmem:[#allocation78_spill] sm:$0xff]  ;;  %v8639_v60 = vld [vmem:[#allocation80_spill] sm:$0xff] }
 0x2a6   :  { %v4804_v62 = vmul.f32 -1.442695, %v1270_v51  ;;  %v8638_v11 = vld [vmem:[#allocation79_spill] sm:$0xff]  ;;  %v8641_v51 = vld [vmem:[#allocation82_spill] sm:$0xff]  ;;  %v8643_v32 = vld [vmem:[#allocation84_spill] sm:$0xff] }
 0x2a7   :  { %v4805_v45 = vmul.f32 -1.442695, %v1271_v15  ;;  %v8640_v15 = vld [vmem:[#allocation81_spill] sm:$0xff] }
 0x2a8   :  { %6109 = vpow2.f32 %v4804_v62  ;;  %1546 = vmatpush1.bf16.msra.mxu0 %v8631_v40  ;;  %1587 = vmatpush1.bf16.msra.mxu1 %v8632_v10  ;;  %v8642_v10 = vld [vmem:[#allocation83_spill] sm:$0xff]  ;;  %v8644_v63 = vld [vmem:[#allocation85_spill] sm:$0xff]  ;;  %v1535_v40 = vpack.c.b16 %v1534_v41, %v1534_v41  ;;  %v8651_v41 = vld [vmem:[#allocation92_spill] sm:$0xff] }
 0x2a9   :  { %6111 = vpow2.f32 %v4805_v45  ;;  %1547 = vmatprep.subr.bf16.mxu0 %v8633_v4  ;;  %1588 = vmatprep.subr.bf16.mxu1 %v8634_v7  ;;  %v4806_v45 = vmul.f32 -1.442695, %v1272_v21  ;;  %v8645_v4 = vld [vmem:[#allocation86_spill] sm:$0xff]  ;;  %v8646_v7 = vld [vmem:[#allocation87_spill] sm:$0xff]  ;;  %v8652_v21 = vld [vmem:[#allocation93_spill] sm:$0xff] }
 0x2aa   :  { %6113 = vtanh.f32 %v1273_v9  ;;  %v8649_v9 = vld [vmem:[#allocation90_spill] sm:$0xff] }
 0x2ac   :  { %1548 = vmatpush1.bf16.msra.mxu0 %v8635_v50  ;;  %1589 = vmatpush1.bf16.msra.mxu1 %v8636_v59  ;;  %v8647_v50 = vld [vmem:[#allocation88_spill] sm:$0xff]  ;;  %v8648_v59 = vld [vmem:[#allocation89_spill] sm:$0xff] }
 0x2ad   :  { %1549 = vmatprep.subr.bf16.mxu0 %v8637_v2  ;;  %1590 = vmatprep.subr.bf16.mxu1 %v8638_v11  ;;  %v8650_v2 = vld [vmem:[#allocation91_spill] sm:$0xff] }
 0x2b0   :  { %1550 = vmatpush1.bf16.msra.mxu0 %v8639_v60  ;;  %1591 = vmatpush1.bf16.msra.mxu1 %v8640_v15  ;;  %v8653_v60 = vld [vmem:[#allocation94_spill] sm:$0xff]  ;;  %v8654_v15 = vld [vmem:[#allocation95_spill] sm:$0xff] }
 0x2b1   :  { %1551 = vmatprep.subr.bf16.mxu0 %v8641_v51  ;;  %1592 = vmatprep.subr.bf16.mxu1 %v8642_v10 }
 0x2b2   :  { %v6110_v14 = vpop.eup %6109 }
 0x2b3   :  { %v1283_v1 = vadd.f32 1.0, %v6110_v14  ;;  %v6112_v6 = vpop.eup %6111 }
 0x2b4   :  { %v1284_v62 = vadd.f32 1.0, %v6112_v6  ;;  %1552 = vmatpush1.bf16.msra.mxu0 %v8643_v32  ;;  %1593 = vmatpush1.bf16.msra.mxu1 %v8644_v63  ;;  %v6114_v11 = vpop.eup %6113  ;;  %v8656_v6 = vld [vmem:[#allocation97_spill] sm:$0xff]  ;;  %v8657_v32 = vld [vmem:[#allocation98_spill] sm:$0xff]  ;;  %v8658_v63 = vld [vmem:[#allocation99_spill] sm:$0xff] }
 0x2b5   :  { %6115 = vrcp.f32 %v1283_v1  ;;  %5198 = vmatprep.subr.bf16.mxu0 %v8645_v4  ;;  %5230 = vmatprep.subr.bf16.mxu1 %v8646_v7  ;;  %v8655_v1 = vld [vmem:[#allocation96_spill] sm:$0xff] }
 0x2b6   :  { %6117 = vrcp.f32 %v1284_v62 }
 0x2b7   :  { %1570 = vmatmul.mubr.bf16.vlgmr.msra.gmra.mrb[16].mxu0 %v1535_v40  ;;  %1611 = vmatmul.mubr.bf16.vlgmr.msra.gmra.mrb[16].mxu1 %v1535_v40  ;;  %6119 = vpow2.f32 %v4806_v45 }
 0x2b8   :  { %5200 = vmatpush1.bf16.msra.mxu0 %v8647_v50  ;;  %5232 = vmatpush1.bf16.msra.mxu1 %v8648_v59 }
 0x2b9   :  { %5202 = vmatprep.subr.bf16.mxu0 %v8649_v9  ;;  %5234 = vmatprep.subr.bf16.mxu1 %v8650_v2 }
 0x2ba   :  { %1683 = vmatprep.mubr.f32.mxu0 %v8578_v3  ;;  %1754 = vmatprep.mubr.f32.mxu1 %v8578_v3 }
 0x2bc   :  { %5204 = vmatpush1.bf16.msra.mxu0 %v8651_v41  ;;  %5236 = vmatpush1.bf16.msra.mxu1 %v8652_v21  ;;  %v8659_v21 = vld [vmem:[#allocation100_spill] sm:$0xff] }
 0x2bd   :  { %5206 = vmatprep.subr.bf16.mxu0 %v8653_v60  ;;  %5238 = vmatprep.subr.bf16.mxu1 %v8654_v15  ;;  %v8660_v60 = vld [vmem:[#allocation101_spill] sm:$0xff]  ;;  %v8661_v15 = vld [vmem:[#allocation102_spill] sm:$0xff] }
 0x2bf   :  { %v6116_v14 = vpop.eup %6115 }
 0x2c0   :  { %v1294_v51 = vmul.f32 %v6116_v14, %v6114_v11  ;;  %v6118_v10 = vpop.eup %6117  ;;  %5208 = vmatpush1.bf16.msra.mxu0 %v8655_v1  ;;  %5240 = vmatpush1.bf16.msra.mxu1 %v8656_v6  ;;  %v8662_v11 = vld [vmem:[#allocation103_spill] sm:$0xff]  ;;  %v8663_v6 = vld [vmem:[#allocation104_spill] sm:$0xff] }
 0x2c1   :  { %v1293_v62 = vmul.f32 0.0, %v6118_v10  ;;  %5210 = vmatprep.subr.bf16.mxu0 %v8657_v32  ;;  %5242 = vmatprep.subr.bf16.mxu1 %v8658_v63  ;;  %v6120_v45 = vpop.eup %6119  ;;  %v8664_v10 = vld [vmem:[#allocation105_spill] sm:$0xff] }
 0x2c2   :  { %v1285_v14 = vadd.f32 1.0, %v6120_v45 }
 0x2c3   :  { %v7282_v40 = vadd.f32 %v1294_v51, %v1293_v62 }
 0x2c4   :  { %5212 = vmatpush1.bf16.msra.mxu0 %v8659_v21  ;;  %5244 = vmatpush1.bf16.msra.mxu1 %v8660_v60 }
 0x2c5   :  { %5214 = vmatprep.subr.bf16.mxu0 %v8661_v15  ;;  %5246 = vmatprep.subr.bf16.mxu1 %v8662_v11  ;;  %6121 = vtanh.f32 %v7282_v40 }
 0x2c6   :  { %6123 = vrcp.f32 %v1285_v14  ;;  %v8665_v14 = vld [vmem:[#allocation42_spill] sm:$0xff] }
 0x2c8   :  { %5216 = vmatpush1.bf16.msra.mxu0 %v8663_v6  ;;  %5248 = vmatpush1.bf16.msra.mxu1 %v8664_v10 }
 0x2c9   :  { %5218 = vmatprep.subr.bf16.mxu0 %v7117_v47  ;;  %5250 = vmatprep.subr.bf16.mxu1 %v7119_v17 }
 0x2cc   :  { %5220 = vmatpush1.bf16.msra.mxu0 %v7123_v54  ;;  %5252 = vmatpush1.bf16.msra.mxu1 %v7125_v26 }
 0x2cd   :  { %5222 = vmatprep.subr.bf16.mxu0 %v7129_v44  ;;  %5254 = vmatprep.subr.bf16.mxu1 %v7131_v23 }
 0x2cf   :  { %v6122_v51 = vpop.eup %6121 }
 0x2d0   :  { %5224 = vmatpush1.bf16.msra.mxu0 %v7135_v31  ;;  %5256 = vmatpush1.bf16.msra.mxu1 %v7137_v56  ;;  %v6124_v62 = vpop.eup %6123 }
 0x2d1   :  { %5226 = vmatprep.subr.bf16.mxu0 %v7141_v28  ;;  %5258 = vmatprep.subr.bf16.mxu1 %v7143_v18  ;;  %v1297_v45 = vmul.f32 %v6124_v62, %v6122_v51  ;;  %v8666_v51 = vld [vmem:[#allocation41_spill] sm:$0xff]  ;;  %v8667_v62 = vld [vmem:[#allocation43_spill] sm:$0xff] }
 0x2d4   :  { %5228 = vmatpush1.bf16.msra.mxu0 %v7147_v37  ;;  %5260 = vmatpush1.bf16.msra.mxu1 %v7149_v24 }
 0x2d5   :  { %5262 = vmatprep.subr.bf16.mxu0 %v6769_v19  ;;  %5294 = vmatprep.subr.bf16.mxu1 %v6773_v27 }
 0x2d7   :  { %1684 = vmatmul.mubr.f32.vlgmr.msra.gmra.mrb[20].mxu0 %v1297_v45  ;;  %1755 = vmatmul.mubr.f32.vlgmr.msra.gmra.mrb[20].mxu1 %v1297_v45  ;;  %v8668_v45 = vld [vmem:[#allocation44_spill] sm:$0xff] }
 0x2d8   :  { %5264 = vmatpush1.bf16.msra.mxu0 %v6775_v30  ;;  %5296 = vmatpush1.bf16.msra.mxu1 %v6781_v36 }
 0x2d9   :  { %5266 = vmatprep.subr.bf16.mxu0 %v6779_v33  ;;  %5298 = vmatprep.subr.bf16.mxu1 %v6785_v39 }
 0x2da   :  { %1859 = vmatprep.mubr.f32.mxu0 %v8578_v3  ;;  %1930 = vmatprep.mubr.f32.mxu1 %v8578_v3 }
 0x2dc   :  { %5268 = vmatpush1.bf16.msra.mxu0 %v6788_v42  ;;  %5300 = vmatpush1.bf16.msra.mxu1 %v6796_v49 }
 0x2dd   :  { %5270 = vmatprep.subr.bf16.mxu0 %v6793_v46  ;;  %5302 = vmatprep.subr.bf16.mxu1 %v6800_v52  ;;  %v8676_v46 = vld [vmem:[#allocation50_spill] sm:$0xff] }
 0x2e0   :  { %5272 = vmatpush1.bf16.msra.mxu0 %v6803_v55  ;;  %5304 = vmatpush1.bf16.msra.mxu1 %v6809_v61 }
 0x2e1   :  { %5274 = vmatprep.subr.bf16.mxu0 %v6806_v58  ;;  %5306 = vmatprep.subr.bf16.mxu1 %v6812_v0 }
 0x2e4   :  { %5276 = vmatpush1.bf16.msra.mxu0 %v6815_v5  ;;  %5308 = vmatpush1.bf16.msra.mxu1 %v6821_v12  ;;  %v8675_v5 = vld [vmem:[#allocation49_spill] sm:$0xff] }
 0x2e5   :  { %5278 = vmatprep.subr.bf16.mxu0 %v6818_v8  ;;  %5310 = vmatprep.subr.bf16.mxu1 %v6824_v16  ;;  %v8673_v16 = vld [vmem:[#allocation48_spill] sm:$0xff]  ;;  %v8674_v8 = vld [vmem:[#allocation47_spill] sm:$0xff] }
 0x2e8   :  { %5280 = vmatpush1.bf16.msra.mxu0 %v6827_v22  ;;  %5312 = vmatpush1.bf16.msra.mxu1 %v6833_v29  ;;  %v8672_v22 = vld [vmem:[#allocation46_spill] sm:$0xff] }
 0x2e9   :  { %5282 = vmatprep.subr.bf16.mxu0 %v6830_v25  ;;  %5314 = vmatprep.subr.bf16.mxu1 %v6836_v34  ;;  %v8669_v25 = vld [vmem:[#allocation45_spill] sm:$0xff] }
 0x2ea   :  { %v7337_v34 = vld [vmem:[#allocation4 + $0x4] ss:$16 sps:$4 sm:$0xff]  }
 0x2eb   :  { %8670 = vst [vmem:[#allocation59_spill] sm:$0xff] %v7337_v34 }
 0x2ec   :  { %5284 = vmatpush1.bf16.msra.mxu0 %v6839_v38  ;;  %5316 = vmatpush1.bf16.msra.mxu1 %v6845_v48  ;;  %v7340_v48 = vld [vmem:[#allocation4 + $0xc] ss:$16 sps:$4 sm:$0xff]  }
 0x2ed   :  { %5286 = vmatprep.subr.bf16.mxu0 %v6842_v43  ;;  %5318 = vmatprep.subr.bf16.mxu1 %v6848_v53  ;;  %8671 = vst [vmem:[#allocation60_spill] sm:$0xff] %v7340_v48 }
 0x2f0   :  { %5288 = vmatpush1.bf16.msra.mxu0 %v6851_v57  ;;  %5320 = vmatpush1.bf16.msra.mxu1 %v8665_v14 }
 0x2f1   :  { %5290 = vmatprep.subr.bf16.mxu0 %v8666_v51  ;;  %5322 = vmatprep.subr.bf16.mxu1 %v8667_v62 }
 0x2f4   :  { %5292 = vmatpush1.bf16.msra.mxu0 %v8668_v45  ;;  %5324 = vmatpush1.bf16.msra.mxu1 %v8669_v25 }
 0x2f5   :  { %2030 = vmatprep.subr.bf16.mxu0 %v7337_v34  ;;  %2071 = vmatprep.subr.bf16.mxu1 %v7340_v48 }
 0x36a   :  { %v1369_v53 = vpop.f32.mrb[14].mxu0  ;;  %v1440_v57 = vpop.f32.mrb[14].mxu1 }
 0x36b   :  { %v1449_v43 = vrot.slane %v1369_v53, 6  ;;  %v1453_v14 = vrot.slane %v1369_v53, 7  ;;  %v1371_v38 = vpop.f32.mrb[15].mxu0  ;;  %v1442_v51 = vpop.f32.mrb[15].mxu1  ;;  %v1451_v61 = vrot.slane %v1440_v57, 6  ;;  %v1455_v48 = vrot.slane %v1440_v57, 7 }
 0x36c   :  { %v1450_v29 = vrot.slane %v1371_v38, 6  ;;  %v1454_v62 = vrot.slane %v1371_v38, 7  ;;  %v1452_v52 = vrot.slane %v1442_v51, 6  ;;  %v8677_v38 = vld [vmem:[#allocation51_spill] sm:$0xff] }
 0x36d   :  { %v1465_v45 = vadd.f32 %v1449_v43, %v8672_v22  ;;  %v1469_v25 = vadd.f32 %v1453_v14, %v8673_v16  ;;  %v1467_v49 = vadd.f32 %v1451_v61, %v8676_v46  ;;  %v1471_v42 = vadd.f32 %v1455_v48, %v8677_v38  ;;  %v8678_v14 = vld [vmem:[#allocation52_spill] sm:$0xff] }
 0x36e   :  { %v1466_v12 = vadd.f32 %v1450_v29, %v8674_v8  ;;  %v1470_v34 = vadd.f32 %v1454_v62, %v8675_v5  ;;  %v1456_v43 = vrot.slane %v1442_v51, 7  ;;  %v1468_v29 = vadd.f32 %v1452_v52, %v8678_v14 }
 0x36f   :  { %v4807_v0 = vmul.f32 -1.442695, %v1465_v45  ;;  %v4810_v58 = vmul.f32 -1.442695, %v1469_v25  ;;  %v4809_v8 = vmul.f32 -1.442695, %v1467_v49 }
 0x370   :  { %v4808_v55 = vmul.f32 -1.442695, %v1466_v12  ;;  %v4811_v53 = vmul.f32 -1.442695, %v1470_v34  ;;  %v4812_v62 = vmul.f32 -1.442695, %v1471_v42 }
 0x371   :  { %6125 = vpow2.f32 %v4807_v0  ;;  %v8679_v45 = vld [vmem:[#allocation53_spill] sm:$0xff] }
 0x372   :  { %6127 = vpow2.f32 %v4810_v58  ;;  %v1472_v25 = vadd.f32 %v1456_v43, %v8679_v45 }
 0x373   :  { %6129 = vpow2.f32 %v4808_v55 }
 0x374   :  { %6131 = vpow2.f32 %v4811_v53 }
 0x375   :  { %6133 = vtanh.f32 %v1468_v29 }
 0x376   :  { %6135 = vpow2.f32 %v4809_v8 }
 0x377   :  { %6137 = vpow2.f32 %v4812_v62 }
 0x378   :  { %6139 = vtanh.f32 %v1472_v25 }
 0x37b   :  { %v6126_v57 = vpop.eup %6125 }
 0x37c   :  { %v6128_v0 = vpop.eup %6127  ;;  %v1491_v58 = vadd.f32 1.0, %v6126_v57 }
 0x37d   :  { %v1494_v12 = vadd.f32 1.0, %v6128_v0  ;;  %v6130_v61 = vpop.eup %6129  ;;  %v8680_v0 = vld [vmem:[#allocation54_spill] sm:$0xff] }
 0x37e   :  { %6141 = vrcp.f32 %v1491_v58  ;;  %v6132_v55 = vpop.eup %6131  ;;  %v1492_v34 = vadd.f32 1.0, %v6130_v61  ;;  %v1513_v25 = vrot.slane %v8680_v0, 7  ;;  %v8681_v61 = vld [vmem:[#allocation55_spill] sm:$0xff] }
 0x37f   :  { %6143 = vrcp.f32 %v1494_v12  ;;  %v1495_v48 = vadd.f32 1.0, %v6132_v55  ;;  %v6134_v49 = vpop.eup %6133  ;;  %v1514_v55 = vrot.slane %v8681_v61, 7 }
 0x380   :  { %6145 = vrcp.f32 %v1492_v34  ;;  %v6136_v42 = vpop.eup %6135 }
 0x381   :  { %6147 = vrcp.f32 %v1495_v48  ;;  %v6138_v52 = vpop.eup %6137  ;;  %v1493_v58 = vadd.f32 1.0, %v6136_v42 }
 0x382   :  { %v6140_v51 = vpop.eup %6139  ;;  %v1496_v34 = vadd.f32 1.0, %v6138_v52 }
 0x383   :  { %6149 = vrcp.f32 %v1493_v58  ;;  %v7363_v58 = vld [vmem:[#allocation4 + $0x8] ss:$16 sps:$4 sm:$0xff]  }
 0x384   :  { %6151 = vrcp.f32 %v1496_v34  ;;  %v7369_v34 = vld [vmem:[#allocation4 + $0x2c] ss:$16 sps:$4 sm:$0xff]  }
 0x388   :  { %v6142_v53 = vpop.eup %6141 }
 0x389   :  { %v6144_v43 = vpop.eup %6143  ;;  %v1519_v8 = vmul.f32 %v6142_v53, %v6134_v49 }
 0x38a   :  { %v1520_v29 = vmul.f32 %v6144_v43, %v6140_v51  ;;  %v1571_v57 = vpop.f32.mrb[16].mxu0  ;;  %v1612_v62 = vpop.f32.mrb[16].mxu1 }
 0x38b   :  { %v1573_v45 = vpop.f32.mrb[17].mxu0  ;;  %v1614_v12 = vpop.f32.mrb[17].mxu1 }
 0x38c   :  { %v6146_v14 = vpop.eup %6145  ;;  %v1575_v48 = vpop.f32.mrb[18].mxu0 }
 0x38d   :  { %v1616_v38 = vpop.f32.mrb[18].mxu1  ;;  %v6148_v46 = vpop.eup %6147  ;;  %v1517_v5 = vmul.f32 %v6146_v14, %v1513_v25  ;;  %v8682_v48 = vmov 0  }
 0x38e   :  { %v1576_v16 = vpop.f32.mrb[19].mxu0  ;;  %v1617_v22 = vpop.f32.mrb[19].mxu1  ;;  %v1518_v39 = vmul.f32 %v6148_v46, %v1514_v55  ;;  %v7366_v55 = vld [vmem:[#allocation4 + $0x24] ss:$16 sps:$4 sm:$0xff]  }
 0x38f   :  { %v7353_v49 = vadd.f32 %v1519_v8, %v1517_v5  ;;  %v6150_v42 = vpop.eup %6149 }
 0x390   :  { %v7355_v51 = vadd.f32 %v1520_v29, %v1518_v39  ;;  %v6152_v53 = vpop.eup %6151  ;;  %v7360_v29 = vld [vmem:[#allocation4] ss:$16 sps:$4 sm:$0xff]  }
 0x391   :  { %6153 = vtanh.f32 %v7353_v49 }
 0x392   :  { %6155 = vtanh.f32 %v7355_v51 }
 0x39b   :  { %v6154_v52 = vpop.eup %6153 }
 0x39c   :  { %v6156_v43 = vpop.eup %6155  ;;  %v1525_v38 = vmul.f32 %v6154_v52, %v6150_v42  ;;  %v7380_v52 = vld [vmem:[#allocation4 + $0x28] ss:$16 sps:$4 sm:$0xff]  }
 0x39d   :  { %v1526_v0 = vmul.f32 %v6156_v43, %v6152_v53  ;;  %v7377_v53 = vld [vmem:[#allocation4 + $0x20] ss:$16 sps:$4 sm:$0xff]   ;;  %v7383_v43 = vld [vmem:[#allocation4 + $0x44] ss:$16 sps:$4 sm:$0xff]  }
 0x39e   :  { %v1791_v14 = vrot.slane %v1525_v38, 2  ;;  %v2019_v16 = vpack.c.bf16 %v1525_v38, %v1525_v38  ;;  %8683 = vst [vmem:[#allocation61_spill] sm:$0xff] %v7383_v43  ;;  %v7386_v38 = vld [vmem:[#allocation4 + $0x4c] ss:$16 sps:$4 sm:$0xff]  }
 0x39f   :  { %v1792_v22 = vrot.slane %v1526_v0, 1  ;;  %v2020_v46 = vpack.c.bf16 %v1526_v0, %v1526_v0  ;;  %8684 = vst [vmem:[#allocation13_spill] sm:$0xff] %v7386_v38  ;;  %v1572_v0 = vadd.f32 %v1571_v57, %v7224_v35  ;;  %v7399_v35 = vld [vmem:[#allocation4 + $0x64] ss:$16 sps:$4 sm:$0xff]  }
 0x3a0   :  { %v2023_v25 = vunpack.c.l.b16 %v2019_v16  ;;  %v1574_v16 = vadd.f32 %v1573_v45, %v7234_v13  ;;  %v7402_v45 = vld [vmem:[#allocation4 + $0x6c] ss:$16 sps:$4 sm:$0xff]   ;;  %v7405_v13 = vld [vmem:[#allocation4 + $0x60] ss:$16 sps:$4 sm:$0xff]  }
 0x3a1   :  { %v1793_v5 = vsel %vm535_vm2, %v1792_v22, %v1791_v14  ;;  %v2024_v8 = vunpack.c.l.b16 %v2020_v46  ;;  %v1613_v14 = vadd.f32 %v1612_v62, %v7228_v20  ;;  %v8685_v22 = vld [vmem:[#allocation58_spill] sm:$0xff] }
 0x3a2   :  { %1860 = vmatmul.mubr.f32.vlgmr.msra.gmra.mrb[22].mxu0 %v1793_v5  ;;  %1931 = vmatmul.mubr.f32.vlgmr.msra.gmra.mrb[22].mxu1 %v1793_v5  ;;  %v2025_v39 = vrot.slane %v2023_v25, 2  ;;  %v1615_v46 = vadd.f32 %v1614_v12, %v8685_v22 }
 0x3a3   :  { %2031 = vmatpush1.bf16.msra.mxu0 %v7360_v29  ;;  %2072 = vmatpush1.bf16.msra.mxu1 %v7363_v58  ;;  %v2026_v61 = vrot.slane %v2024_v8, 1  ;;  %v7393_v8 = vld [vmem:[#allocation4 + $0x40] ss:$16 sps:$4 sm:$0xff]  }
 0x3a4   :  { %2032 = vmatprep.subr.bf16.mxu0 %v7366_v55  ;;  %2073 = vmatprep.subr.bf16.mxu1 %v7369_v34  ;;  %8686 = vst [vmem:[#allocation62_spill] sm:$0xff] %v7393_v8 }
 0x3a5   :  { %2062 = vmatprep.mubr.bf16.mxu0 %v8682_v48  ;;  %2103 = vmatprep.mubr.bf16.mxu1 %v8682_v48  ;;  %v7375_v42 = vsel %vm535_vm2, %v2026_v61, %v2025_v39  ;;  %v7396_v39 = vld [vmem:[#allocation4 + $0x48] ss:$16 sps:$4 sm:$0xff]  }
 0x3a7   :  { %2033 = vmatpush1.bf16.msra.mxu0 %v7377_v53  ;;  %2074 = vmatpush1.bf16.msra.mxu1 %v7380_v52 }
 0x3a8   :  { %2034 = vmatprep.subr.bf16.mxu0 %v7383_v43  ;;  %2075 = vmatprep.subr.bf16.mxu1 %v7386_v38 }
 0x3aa   :  { %v1685_v25 = vpop.f32.mrb[20].mxu0  ;;  %v1756_v5 = vpop.f32.mrb[20].mxu1 }
 0x3ab   :  { %2035 = vmatpush1.bf16.msra.mxu0 %v7393_v8  ;;  %2076 = vmatpush1.bf16.msra.mxu1 %v7396_v39  ;;  %v1761_v61 = vadd.f32 %v1685_v25, %v1572_v0  ;;  %v1763_v38 = vadd.f32 %v1756_v5, %v1613_v14  ;;  %v1687_v43 = vpop.f32.mrb[21].mxu0  ;;  %v1758_v57 = vpop.f32.mrb[21].mxu1  ;;  %v7408_v0 = vld [vmem:[#allocation4 + $0x68] ss:$16 sps:$4 sm:$0xff]   ;;  %v7411_v14 = vld [vmem:[#allocation4 + $0x84] ss:$16 sps:$4 sm:$0xff]  }
 0x3ac   :  { %2036 = vmatprep.subr.bf16.mxu0 %v7399_v35  ;;  %2077 = vmatprep.subr.bf16.mxu1 %v7402_v45  ;;  %v1762_v62 = vadd.f32 %v1687_v43, %v1574_v16  ;;  %v1764_v12 = vadd.f32 %v1758_v57, %v1615_v46  ;;  %v7414_v25 = vld [vmem:[#allocation4 + $0x8c] ss:$16 sps:$4 sm:$0xff]   ;;  %v7417_v43 = vld [vmem:[#allocation4 + $0x80] ss:$16 sps:$4 sm:$0xff]   ;;  %v7420_v16 = vld [vmem:[#allocation4 + $0x88] ss:$16 sps:$4 sm:$0xff]  }
 0x3ad   :  { %v4813_v22 = vmul.f32 -1.442695, %v1761_v61  ;;  %8687 = vst [vmem:[#allocation63_spill] sm:$0xff] %v7417_v43  ;;  %8688 = vst [vmem:[#allocation64_spill] sm:$0xff] %v7420_v16  ;;  %v7426_v46 = vld [vmem:[#allocation4 + $0xac] ss:$16 sps:$4 sm:$0xff]  }
 0x3ae   :  { %v4814_v8 = vmul.f32 -1.442695, %v1762_v62  ;;  %8690 = vst [vmem:[#allocation66_spill] sm:$0xff] %v7426_v46  ;;  %v7429_v5 = vld [vmem:[#allocation4 + $0xa0] ss:$16 sps:$4 sm:$0xff]  }
 0x3af   :  { %6157 = vpow2.f32 %v4813_v22  ;;  %2037 = vmatpush1.bf16.msra.mxu0 %v7405_v13  ;;  %2078 = vmatpush1.bf16.msra.mxu1 %v7408_v0  ;;  %v7423_v22 = vld [vmem:[#allocation4 + $0xa4] ss:$16 sps:$4 sm:$0xff]   ;;  %8691 = vst [vmem:[#allocation67_spill] sm:$0xff] %v7429_v5  ;;  %v7438_v57 = vld [vmem:[#allocation4 + $0xcc] ss:$16 sps:$4 sm:$0xff]  }
 0x3b0   :  { %2038 = vmatprep.subr.bf16.mxu0 %v7411_v14  ;;  %2079 = vmatprep.subr.bf16.mxu1 %v7414_v25  ;;  %6159 = vpow2.f32 %v4814_v8  ;;  %8689 = vst [vmem:[#allocation65_spill] sm:$0xff] %v7423_v22  ;;  %v7432_v8 = vld [vmem:[#allocation4 + $0xa8] ss:$16 sps:$4 sm:$0xff]   ;;  %v7435_v61 = vld [vmem:[#allocation4 + $0xc4] ss:$16 sps:$4 sm:$0xff]  }
 0x3b1   :  { %8692 = vst [vmem:[#allocation68_spill] sm:$0xff] %v7432_v8  ;;  %8693 = vst [vmem:[#allocation69_spill] sm:$0xff] %v7435_v61  ;;  %6161 = vtanh.f32 %v1764_v12  ;;  %v7453_v12 = vld [vmem:[#allocation4 + $0xe0] ss:$16 sps:$4 sm:$0xff]  }
 0x3b3   :  { %2039 = vmatpush1.bf16.msra.mxu0 %v7417_v43  ;;  %2080 = vmatpush1.bf16.msra.mxu1 %v7420_v16  ;;  %v7447_v43 = vld [vmem:[#allocation4 + $0xe4] ss:$16 sps:$4 sm:$0xff]  }
 0x3b4   :  { %2040 = vmatprep.subr.bf16.mxu0 %v7423_v22  ;;  %2081 = vmatprep.subr.bf16.mxu1 %v7426_v46  ;;  %v7441_v46 = vld [vmem:[#allocation4 + $0xc0] ss:$16 sps:$4 sm:$0xff]  }
 0x3b7   :  { %2041 = vmatpush1.bf16.msra.mxu0 %v7429_v5  ;;  %2082 = vmatpush1.bf16.msra.mxu1 %v7432_v8  ;;  %v7444_v5 = vld [vmem:[#allocation4 + $0xc8] ss:$16 sps:$4 sm:$0xff]  }
 0x3b8   :  { %2042 = vmatprep.subr.bf16.mxu0 %v7435_v61  ;;  %2083 = vmatprep.subr.bf16.mxu1 %v7438_v57  ;;  %8694 = vst [vmem:[#allocation70_spill] sm:$0xff] %v7444_v5  ;;  %v7450_v61 = vld [vmem:[#allocation4 + $0xec] ss:$16 sps:$4 sm:$0xff]  }
 0x3b9   :  { %v6158_v62 = vpop.eup %6157 }
 0x3ba   :  { %v1774_v22 = vadd.f32 1.0, %v6158_v62  ;;  %v6160_v16 = vpop.eup %6159  ;;  %v7456_v62 = vld [vmem:[#allocation4 + $0xe8] ss:$16 sps:$4 sm:$0xff]  }
 0x3bb   :  { %2043 = vmatpush1.bf16.msra.mxu0 %v7441_v46  ;;  %2084 = vmatpush1.bf16.msra.mxu1 %v7444_v5  ;;  %v1775_v8 = vadd.f32 1.0, %v6160_v16  ;;  %v4815_v5 = vmul.f32 -1.442695, %v1763_v38  ;;  %v2028_v16 = vpack.c.b16 %v7375_v42, %v7375_v42 }
 0x3bc   :  { %6163 = vrcp.f32 %v1774_v22  ;;  %2044 = vmatprep.subr.bf16.mxu0 %v7447_v43  ;;  %2085 = vmatprep.subr.bf16.mxu1 %v7450_v61  ;;  %v6162_v22 = vpop.eup %6161 }
 0x3bd   :  { %6165 = vrcp.f32 %v1775_v8  ;;  %v8695_v8 = vld [vmem:[#allocation93_spill] sm:$0xff] }
 0x3be   :  { %6167 = vpow2.f32 %v4815_v5 }
 0x3bf   :  { %2045 = vmatpush1.bf16.msra.mxu0 %v7453_v12  ;;  %2086 = vmatpush1.bf16.msra.mxu1 %v7456_v62 }
 0x3c0   :  { %5326 = vmatprep.subr.bf16.mxu0 %v8645_v4  ;;  %5358 = vmatprep.subr.bf16.mxu1 %v8646_v7 }
 0x3c2   :  { %2063 = vmatmul.mubr.bf16.vlgmr.msra.gmra.mrb[24].mxu0 %v2028_v16  ;;  %2104 = vmatmul.mubr.bf16.vlgmr.msra.gmra.mrb[24].mxu1 %v2028_v16 }
 0x3c3   :  { %5328 = vmatpush1.bf16.msra.mxu0 %v8647_v50  ;;  %5360 = vmatpush1.bf16.msra.mxu1 %v8648_v59  ;;  %v8696_v50 = vld [vmem:[#allocation94_spill] sm:$0xff]  ;;  %v8697_v59 = vld [vmem:[#allocation95_spill] sm:$0xff] }
 0x3c4   :  { %5330 = vmatprep.subr.bf16.mxu0 %v8649_v9  ;;  %5362 = vmatprep.subr.bf16.mxu1 %v8650_v2  ;;  %v8698_v2 = vld [vmem:[#allocation97_spill] sm:$0xff] }
 0x3c5   :  { %2176 = vmatprep.mubr.f32.mxu0 %v8578_v3  ;;  %2247 = vmatprep.mubr.f32.mxu1 %v8578_v3 }
 0x3c6   :  { %v6164_v42 = vpop.eup %6163 }
 0x3c7   :  { %v1785_v38 = vmul.f32 %v6164_v42, %v6162_v22  ;;  %5332 = vmatpush1.bf16.msra.mxu0 %v8651_v41  ;;  %5364 = vmatpush1.bf16.msra.mxu1 %v8695_v8  ;;  %v6166_v16 = vpop.eup %6165 }
 0x3c8   :  { %5334 = vmatprep.subr.bf16.mxu0 %v8696_v50  ;;  %5366 = vmatprep.subr.bf16.mxu1 %v8697_v59  ;;  %v1784_v5 = vmul.f32 %v6166_v16, %v7282_v40  ;;  %v6168_v22 = vpop.eup %6167 }
 0x3c9   :  { %v1776_v40 = vadd.f32 1.0, %v6168_v22  ;;  %v8700_v22 = vld [vmem:[#allocation20_spill] sm:$0xff] }
 0x3ca   :  { %v7474_v9 = vadd.f32 %v1785_v38, %v1784_v5  ;;  %v8699_v5 = vld [vmem:[#allocation19_spill] sm:$0xff] }
 0x3cb   :  { %5336 = vmatpush1.bf16.msra.mxu0 %v8655_v1  ;;  %5368 = vmatpush1.bf16.msra.mxu1 %v8698_v2 }
 0x3cc   :  { %5338 = vmatprep.subr.bf16.mxu0 %v8657_v32  ;;  %5370 = vmatprep.subr.bf16.mxu1 %v8658_v63  ;;  %6169 = vtanh.f32 %v7474_v9 }
 0x3cd   :  { %6171 = vrcp.f32 %v1776_v40  ;;  %v8701_v40 = vld [vmem:[#allocation22_spill] sm:$0xff] }
 0x3cf   :  { %5340 = vmatpush1.bf16.msra.mxu0 %v8659_v21  ;;  %5372 = vmatpush1.bf16.msra.mxu1 %v8660_v60 }
 0x3d0   :  { %5342 = vmatprep.subr.bf16.mxu0 %v8661_v15  ;;  %5374 = vmatprep.subr.bf16.mxu1 %v8662_v11 }
 0x3d3   :  { %5344 = vmatpush1.bf16.msra.mxu0 %v8663_v6  ;;  %5376 = vmatpush1.bf16.msra.mxu1 %v8664_v10 }
 0x3d4   :  { %5346 = vmatprep.subr.bf16.mxu0 %v7117_v47  ;;  %5378 = vmatprep.subr.bf16.mxu1 %v7119_v17  ;;  %v8732_v47 = vld [vmem:[#allocation50_spill] sm:$0xff] }
 0x3d6   :  { %v6170_v42 = vpop.eup %6169 }
 0x3d7   :  { %5348 = vmatpush1.bf16.msra.mxu0 %v7123_v54  ;;  %5380 = vmatpush1.bf16.msra.mxu1 %v7125_v26  ;;  %v6172_v38 = vpop.eup %6171 }
 0x3d8   :  { %5350 = vmatprep.subr.bf16.mxu0 %v7129_v44  ;;  %5382 = vmatprep.subr.bf16.mxu1 %v7131_v23  ;;  %v1788_v16 = vmul.f32 %v6172_v38, %v6170_v42  ;;  %v8702_v42 = vld [vmem:[#allocation21_spill] sm:$0xff]  ;;  %v8703_v38 = vld [vmem:[#allocation23_spill] sm:$0xff] }
 0x3d9   :  { %v8731_v23 = vld [vmem:[#allocation49_spill] sm:$0xff] }
 0x3db   :  { %5352 = vmatpush1.bf16.msra.mxu0 %v7135_v31  ;;  %5384 = vmatpush1.bf16.msra.mxu1 %v7137_v56  ;;  %v8729_v56 = vld [vmem:[#allocation48_spill] sm:$0xff]  ;;  %v8730_v31 = vld [vmem:[#allocation47_spill] sm:$0xff] }
 0x3dc   :  { %5354 = vmatprep.subr.bf16.mxu0 %v7141_v28  ;;  %5386 = vmatprep.subr.bf16.mxu1 %v7143_v18  ;;  %v8728_v28 = vld [vmem:[#allocation46_spill] sm:$0xff] }
 0x3df   :  { %5356 = vmatpush1.bf16.msra.mxu0 %v7147_v37  ;;  %5388 = vmatpush1.bf16.msra.mxu1 %v7149_v24 }
 0x3e0   :  { %5390 = vmatprep.subr.bf16.mxu0 %v6769_v19  ;;  %5422 = vmatprep.subr.bf16.mxu1 %v6773_v27  ;;  %v8709_v27 = vld [vmem:[#allocation30_spill] sm:$0xff]  ;;  %v8710_v19 = vld [vmem:[#allocation29_spill] sm:$0xff] }
 0x3e2   :  { %2177 = vmatmul.mubr.f32.vlgmr.msra.gmra.mrb[28].mxu0 %v1788_v16  ;;  %2248 = vmatmul.mubr.f32.vlgmr.msra.gmra.mrb[28].mxu1 %v1788_v16  ;;  %v8704_v16 = vld [vmem:[#allocation24_spill] sm:$0xff] }
 0x3e3   :  { %5392 = vmatpush1.bf16.msra.mxu0 %v6775_v30  ;;  %5424 = vmatpush1.bf16.msra.mxu1 %v6781_v36  ;;  %v8705_v30 = vld [vmem:[#allocation26_spill] sm:$0xff]  ;;  %v8706_v36 = vld [vmem:[#allocation25_spill] sm:$0xff] }
 0x3e4   :  { %5394 = vmatprep.subr.bf16.mxu0 %v6779_v33  ;;  %5426 = vmatprep.subr.bf16.mxu1 %v8699_v5  ;;  %v8707_v33 = vld [vmem:[#allocation27_spill] sm:$0xff]  ;;  %v8708_v5 = vld [vmem:[#allocation28_spill] sm:$0xff] }
 0x3e5   :  { %2352 = vmatprep.mubr.f32.mxu0 %v8578_v3  ;;  %2423 = vmatprep.mubr.f32.mxu1 %v8578_v3 }
 0x3e7   :  { %5396 = vmatpush1.bf16.msra.mxu0 %v8700_v22  ;;  %5428 = vmatpush1.bf16.msra.mxu1 %v8701_v40  ;;  %v8711_v22 = vld [vmem:[#allocation31_spill] sm:$0xff]  ;;  %v8712_v40 = vld [vmem:[#allocation32_spill] sm:$0xff] }
 0x3e8   :  { %5398 = vmatprep.subr.bf16.mxu0 %v8702_v42  ;;  %5430 = vmatprep.subr.bf16.mxu1 %v8703_v38  ;;  %v8713_v42 = vld [vmem:[#allocation34_spill] sm:$0xff]  ;;  %v8714_v38 = vld [vmem:[#allocation33_spill] sm:$0xff] }
 0x3eb   :  { %5400 = vmatpush1.bf16.msra.mxu0 %v8704_v16  ;;  %5432 = vmatpush1.bf16.msra.mxu1 %v8705_v30  ;;  %v8715_v16 = vld [vmem:[#allocation35_spill] sm:$0xff]  ;;  %v8716_v30 = vld [vmem:[#allocation36_spill] sm:$0xff] }
 0x3ec   :  { %5402 = vmatprep.subr.bf16.mxu0 %v8706_v36  ;;  %5434 = vmatprep.subr.bf16.mxu1 %v8707_v33  ;;  %v8717_v36 = vld [vmem:[#allocation38_spill] sm:$0xff]  ;;  %v8718_v33 = vld [vmem:[#allocation37_spill] sm:$0xff] }
 0x3ef   :  { %5404 = vmatpush1.bf16.msra.mxu0 %v8708_v5  ;;  %5436 = vmatpush1.bf16.msra.mxu1 %v8709_v27  ;;  %v8719_v5 = vld [vmem:[#allocation39_spill] sm:$0xff]  ;;  %v8720_v27 = vld [vmem:[#allocation40_spill] sm:$0xff] }
 0x3f0   :  { %5406 = vmatprep.subr.bf16.mxu0 %v8710_v19  ;;  %5438 = vmatprep.subr.bf16.mxu1 %v8711_v22  ;;  %v8721_v19 = vld [vmem:[#allocation42_spill] sm:$0xff]  ;;  %v8722_v22 = vld [vmem:[#allocation41_spill] sm:$0xff] }
 0x3f3   :  { %5408 = vmatpush1.bf16.msra.mxu0 %v8712_v40  ;;  %5440 = vmatpush1.bf16.msra.mxu1 %v8713_v42  ;;  %v8723_v40 = vld [vmem:[#allocation43_spill] sm:$0xff]  ;;  %v8724_v42 = vld [vmem:[#allocation44_spill] sm:$0xff] }
 0x3f4   :  { %5410 = vmatprep.subr.bf16.mxu0 %v8714_v38  ;;  %5442 = vmatprep.subr.bf16.mxu1 %v8715_v16  ;;  %v8725_v38 = vld [vmem:[#allocation45_spill] sm:$0xff]  ;;  %v8726_v16 = vld [vmem:[#allocation59_spill] sm:$0xff] }
 0x3f7   :  { %5412 = vmatpush1.bf16.msra.mxu0 %v8716_v30  ;;  %5444 = vmatpush1.bf16.msra.mxu1 %v8717_v36  ;;  %v8727_v30 = vld [vmem:[#allocation60_spill] sm:$0xff] }
 0x3f8   :  { %5414 = vmatprep.subr.bf16.mxu0 %v8718_v33  ;;  %5446 = vmatprep.subr.bf16.mxu1 %v8719_v5 }
 0x3fb   :  { %5416 = vmatpush1.bf16.msra.mxu0 %v8720_v27  ;;  %5448 = vmatpush1.bf16.msra.mxu1 %v8721_v19 }
 0x3fc   :  { %5418 = vmatprep.subr.bf16.mxu0 %v8722_v22  ;;  %5450 = vmatprep.subr.bf16.mxu1 %v8723_v40 }
 0x3ff   :  { %5420 = vmatpush1.bf16.msra.mxu0 %v8724_v42  ;;  %5452 = vmatpush1.bf16.msra.mxu1 %v8725_v38 }
 0x400   :  { %2523 = vmatprep.subr.bf16.mxu0 %v8726_v16  ;;  %2564 = vmatprep.subr.bf16.mxu1 %v8727_v30 }
 0x475   :  { %v1861_v36 = vpop.f32.mrb[22].mxu0  ;;  %v1932_v33 = vpop.f32.mrb[22].mxu1 }
 0x476   :  { %v1941_v24 = vrot.slane %v1861_v36, 5  ;;  %v1945_v5 = vrot.slane %v1861_v36, 6  ;;  %v1863_v37 = vpop.f32.mrb[23].mxu0  ;;  %v1934_v27 = vpop.f32.mrb[23].mxu1  ;;  %v1943_v26 = vrot.slane %v1932_v33, 5  ;;  %v1947_v30 = vrot.slane %v1932_v33, 6 }
 0x477   :  { %v1942_v18 = vrot.slane %v1863_v37, 5  ;;  %v1946_v19 = vrot.slane %v1863_v37, 6  ;;  %v1944_v17 = vrot.slane %v1934_v27, 5  ;;  %v8733_v37 = vld [vmem:[#allocation51_spill] sm:$0xff] }
 0x478   :  { %v1957_v22 = vadd.f32 %v1941_v24, %v8728_v28  ;;  %v1961_v40 = vadd.f32 %v1945_v5, %v8729_v56  ;;  %v1959_v10 = vadd.f32 %v1943_v26, %v8732_v47  ;;  %v1963_v6 = vadd.f32 %v1947_v30, %v8733_v37  ;;  %v8734_v5 = vld [vmem:[#allocation52_spill] sm:$0xff] }
 0x479   :  { %v1958_v42 = vadd.f32 %v1942_v18, %v8730_v31  ;;  %v1962_v38 = vadd.f32 %v1946_v19, %v8731_v23  ;;  %v1948_v24 = vrot.slane %v1934_v27, 6  ;;  %v1960_v18 = vadd.f32 %v1944_v17, %v8734_v5 }
 0x47a   :  { %v4816_v44 = vmul.f32 -1.442695, %v1957_v22  ;;  %v4819_v16 = vmul.f32 -1.442695, %v1961_v40  ;;  %v4818_v31 = vmul.f32 -1.442695, %v1959_v10 }
 0x47b   :  { %v4817_v54 = vmul.f32 -1.442695, %v1958_v42  ;;  %v4820_v36 = vmul.f32 -1.442695, %v1962_v38  ;;  %v4821_v19 = vmul.f32 -1.442695, %v1963_v6 }
 0x47c   :  { %6173 = vpow2.f32 %v4816_v44  ;;  %v8735_v22 = vld [vmem:[#allocation53_spill] sm:$0xff] }
 0x47d   :  { %6175 = vpow2.f32 %v4819_v16  ;;  %v1964_v40 = vadd.f32 %v1948_v24, %v8735_v22 }
 0x47e   :  { %6177 = vpow2.f32 %v4817_v54 }
 0x47f   :  { %6179 = vpow2.f32 %v4820_v36 }
 0x480   :  { %6181 = vtanh.f32 %v1960_v18 }
 0x481   :  { %6183 = vpow2.f32 %v4818_v31 }
 0x482   :  { %6185 = vpow2.f32 %v4821_v19 }
 0x483   :  { %6187 = vtanh.f32 %v1964_v40  ;;  %v2005_v40 = vrot.slane %v7353_v49, 7 }
 0x486   :  { %v6174_v33 = vpop.eup %6173 }
 0x487   :  { %v6176_v44 = vpop.eup %6175  ;;  %v1983_v42 = vadd.f32 1.0, %v6174_v33 }
 0x488   :  { %v1986_v38 = vadd.f32 1.0, %v6176_v44  ;;  %v6178_v26 = vpop.eup %6177 }
 0x489   :  { %6189 = vrcp.f32 %v1983_v42  ;;  %v6180_v30 = vpop.eup %6179  ;;  %v1984_v27 = vadd.f32 1.0, %v6178_v26  ;;  %v2006_v26 = vrot.slane %v7355_v51, 7 }
 0x48a   :  { %6191 = vrcp.f32 %v1986_v38  ;;  %v1987_v54 = vadd.f32 1.0, %v6180_v30  ;;  %v6182_v17 = vpop.eup %6181 }
 0x48b   :  { %6193 = vrcp.f32 %v1984_v27  ;;  %v6184_v6 = vpop.eup %6183 }
 0x48c   :  { %6195 = vrcp.f32 %v1987_v54  ;;  %v6186_v10 = vpop.eup %6185  ;;  %v1985_v44 = vadd.f32 1.0, %v6184_v6 }
 0x48d   :  { %v6188_v16 = vpop.eup %6187  ;;  %v1988_v30 = vadd.f32 1.0, %v6186_v10 }
 0x48e   :  { %6197 = vrcp.f32 %v1985_v44 }
 0x48f   :  { %6199 = vrcp.f32 %v1988_v30  ;;  %v8737_v30 = vld [vmem:[#allocation13_spill] sm:$0xff] }
 0x493   :  { %v6190_v36 = vpop.eup %6189 }
 0x494   :  { %v6192_v24 = vpop.eup %6191  ;;  %v2011_v31 = vmul.f32 %v6190_v36, %v6182_v17 }
 0x495   :  { %v2012_v18 = vmul.f32 %v6192_v24, %v6188_v16  ;;  %v2064_v33 = vpop.f32.mrb[24].mxu0  ;;  %v2105_v19 = vpop.f32.mrb[24].mxu1 }
 0x496   :  { %v2066_v42 = vpop.f32.mrb[25].mxu0  ;;  %v2107_v38 = vpop.f32.mrb[25].mxu1 }
 0x497   :  { %v6194_v22 = vpop.eup %6193  ;;  %v2068_v27 = vpop.f32.mrb[26].mxu0 }
 0x498   :  { %v2109_v54 = vpop.f32.mrb[26].mxu1  ;;  %v6196_v5 = vpop.eup %6195  ;;  %v2009_v37 = vmul.f32 %v6194_v22, %v2005_v40  ;;  %v8738_v27 = vld [vmem:[#allocation56_spill] sm:$0xff] }
 0x499   :  { %v2069_v47 = vpop.f32.mrb[27].mxu0  ;;  %v2110_v23 = vpop.f32.mrb[27].mxu1  ;;  %v2010_v56 = vmul.f32 %v6196_v5, %v2006_v26  ;;  %v8736_v26 = vld [vmem:[#allocation61_spill] sm:$0xff]  ;;  %v2065_v54 = vadd.f32 %v2064_v33, %v8738_v27 }
 0x49a   :  { %v7545_v17 = vadd.f32 %v2011_v31, %v2009_v37  ;;  %v6198_v49 = vpop.eup %6197 }
 0x49b   :  { %v7547_v16 = vadd.f32 %v2012_v18, %v2010_v56  ;;  %v6200_v51 = vpop.eup %6199 }
 0x49c   :  { %6201 = vtanh.f32 %v7545_v17 }
 0x49d   :  { %6203 = vtanh.f32 %v7547_v16 }
 0x4a6   :  { %v6202_v6 = vpop.eup %6201 }
 0x4a7   :  { %v6204_v10 = vpop.eup %6203  ;;  %v2017_v36 = vmul.f32 %v6202_v6, %v6198_v49  ;;  %v2106_v49 = vadd.f32 %v2105_v19, %v7228_v20 }
 0x4a8   :  { %v2018_v24 = vmul.f32 %v6204_v10, %v6200_v51  ;;  %v8739_v51 = vld [vmem:[#allocation57_spill] sm:$0xff]  ;;  %v8740_v10 = vld [vmem:[#allocation58_spill] sm:$0xff] }
 0x4a9   :  { %v2284_v22 = vrot.slane %v2017_v36, 3  ;;  %v2512_v47 = vpack.c.bf16 %v2017_v36, %v2017_v36  ;;  %v2067_v6 = vadd.f32 %v2066_v42, %v8739_v51  ;;  %v2108_v36 = vadd.f32 %v2107_v38, %v8740_v10  ;;  %v8742_v38 = vld [vmem:[#allocation63_spill] sm:$0xff] }
 0x4aa   :  { %v2285_v23 = vrot.slane %v2018_v24, 2  ;;  %v2513_v5 = vpack.c.bf16 %v2018_v24, %v2018_v24 }
 0x4ab   :  { %v2516_v40 = vunpack.c.l.b16 %v2512_v47  ;;  %v8741_v47 = vld [vmem:[#allocation62_spill] sm:$0xff] }
 0x4ac   :  { %v2286_v37 = vsel %vm535_vm2, %v2285_v23, %v2284_v22  ;;  %v2517_v31 = vunpack.c.l.b16 %v2513_v5 }
 0x4ad   :  { %2353 = vmatmul.mubr.f32.vlgmr.msra.gmra.mrb[30].mxu0 %v2286_v37  ;;  %2424 = vmatmul.mubr.f32.vlgmr.msra.gmra.mrb[30].mxu1 %v2286_v37  ;;  %v2518_v56 = vrot.slane %v2516_v40, 3 }
 0x4ae   :  { %2524 = vmatpush1.bf16.msra.mxu0 %v7360_v29  ;;  %2565 = vmatpush1.bf16.msra.mxu1 %v7363_v58  ;;  %v2519_v18 = vrot.slane %v2517_v31, 2 }
 0x4af   :  { %2525 = vmatprep.subr.bf16.mxu0 %v7366_v55  ;;  %2566 = vmatprep.subr.bf16.mxu1 %v7369_v34 }
 0x4b0   :  { %2555 = vmatprep.mubr.bf16.mxu0 %v8682_v48  ;;  %2596 = vmatprep.mubr.bf16.mxu1 %v8682_v48  ;;  %v2520_v44 = vsel %vm535_vm2, %v2519_v18, %v2518_v56  ;;  %v8743_v56 = vld [vmem:[#allocation64_spill] sm:$0xff]  ;;  %v8744_v18 = vld [vmem:[#allocation65_spill] sm:$0xff] }
 0x4b2   :  { %2526 = vmatpush1.bf16.msra.mxu0 %v7377_v53  ;;  %2567 = vmatpush1.bf16.msra.mxu1 %v7380_v52 }
 0x4b3   :  { %2527 = vmatprep.subr.bf16.mxu0 %v8736_v26  ;;  %2568 = vmatprep.subr.bf16.mxu1 %v8737_v30 }
 0x4b5   :  { %v2178_v24 = vpop.f32.mrb[28].mxu0  ;;  %v2249_v22 = vpop.f32.mrb[28].mxu1 }
 0x4b6   :  { %2528 = vmatpush1.bf16.msra.mxu0 %v8741_v47  ;;  %2569 = vmatpush1.bf16.msra.mxu1 %v7396_v39  ;;  %v2254_v23 = vadd.f32 %v2178_v24, %v2065_v54  ;;  %v2256_v5 = vadd.f32 %v2249_v22, %v2106_v49  ;;  %v2180_v40 = vpop.f32.mrb[29].mxu0  ;;  %v2251_v37 = vpop.f32.mrb[29].mxu1  ;;  %v8745_v54 = vld [vmem:[#allocation66_spill] sm:$0xff]  ;;  %v8746_v49 = vld [vmem:[#allocation67_spill] sm:$0xff] }
 0x4b7   :  { %2529 = vmatprep.subr.bf16.mxu0 %v7399_v35  ;;  %2570 = vmatprep.subr.bf16.mxu1 %v7402_v45  ;;  %v2255_v33 = vadd.f32 %v2180_v40, %v2067_v6  ;;  %v2257_v19 = vadd.f32 %v2251_v37, %v2108_v36  ;;  %v8747_v6 = vld [vmem:[#allocation68_spill] sm:$0xff]  ;;  %v8748_v36 = vld [vmem:[#allocation69_spill] sm:$0xff]  ;;  %v8749_v40 = vld [vmem:[#allocation70_spill] sm:$0xff] }
 0x4b8   :  { %v4822_v31 = vmul.f32 -1.442695, %v2254_v23 }
 0x4b9   :  { %v4823_v42 = vmul.f32 -1.442695, %v2255_v33  ;;  %v4824_v33 = vmul.f32 -1.442695, %v2256_v5 }
 0x4ba   :  { %6205 = vpow2.f32 %v4822_v31  ;;  %2530 = vmatpush1.bf16.msra.mxu0 %v7405_v13  ;;  %2571 = vmatpush1.bf16.msra.mxu1 %v7408_v0  ;;  %v2521_v31 = vpack.c.b16 %v2520_v44, %v2520_v44 }
 0x4bb   :  { %2531 = vmatprep.subr.bf16.mxu0 %v7411_v14  ;;  %2572 = vmatprep.subr.bf16.mxu1 %v7414_v25  ;;  %6207 = vpow2.f32 %v4823_v42  ;;  %v8751_v42 = vld [vmem:[#allocation89_spill] sm:$0xff] }
 0x4bc   :  { %6209 = vtanh.f32 %v2257_v19  ;;  %v8750_v19 = vld [vmem:[#allocation88_spill] sm:$0xff] }
 0x4be   :  { %2532 = vmatpush1.bf16.msra.mxu0 %v8742_v38  ;;  %2573 = vmatpush1.bf16.msra.mxu1 %v8743_v56 }
 0x4bf   :  { %2533 = vmatprep.subr.bf16.mxu0 %v8744_v18  ;;  %2574 = vmatprep.subr.bf16.mxu1 %v8745_v54 }
 0x4c2   :  { %2534 = vmatpush1.bf16.msra.mxu0 %v8746_v49  ;;  %2575 = vmatpush1.bf16.msra.mxu1 %v8747_v6 }
 0x4c3   :  { %2535 = vmatprep.subr.bf16.mxu0 %v8748_v36  ;;  %2576 = vmatprep.subr.bf16.mxu1 %v7438_v57 }
 0x4c4   :  { %v6206_v24 = vpop.eup %6205 }
 0x4c5   :  { %v2267_v22 = vadd.f32 1.0, %v6206_v24  ;;  %v6208_v23 = vpop.eup %6207  ;;  %v8752_v24 = vld [vmem:[#allocation90_spill] sm:$0xff] }
 0x4c6   :  { %2536 = vmatpush1.bf16.msra.mxu0 %v7441_v46  ;;  %2577 = vmatpush1.bf16.msra.mxu1 %v8749_v40  ;;  %v2268_v37 = vadd.f32 1.0, %v6208_v23  ;;  %v6210_v23 = vpop.eup %6209 }
 0x4c7   :  { %6211 = vrcp.f32 %v2267_v22  ;;  %2537 = vmatprep.subr.bf16.mxu0 %v7447_v43  ;;  %2578 = vmatprep.subr.bf16.mxu1 %v7450_v61  ;;  %v8753_v22 = vld [vmem:[#allocation91_spill] sm:$0xff] }
 0x4c8   :  { %6213 = vrcp.f32 %v2268_v37 }
 0x4c9   :  { %6215 = vpow2.f32 %v4824_v33 }
 0x4ca   :  { %2538 = vmatpush1.bf16.msra.mxu0 %v7453_v12  ;;  %2579 = vmatpush1.bf16.msra.mxu1 %v7456_v62 }
 0x4cb   :  { %5454 = vmatprep.subr.bf16.mxu0 %v8645_v4  ;;  %5486 = vmatprep.subr.bf16.mxu1 %v8646_v7 }
 0x4cd   :  { %2556 = vmatmul.mubr.bf16.vlgmr.msra.gmra.mrb[32].mxu0 %v2521_v31  ;;  %2597 = vmatmul.mubr.bf16.vlgmr.msra.gmra.mrb[32].mxu1 %v2521_v31 }
 0x4ce   :  { %5456 = vmatpush1.bf16.msra.mxu0 %v8750_v19  ;;  %5488 = vmatpush1.bf16.msra.mxu1 %v8751_v42 }
 0x4cf   :  { %5458 = vmatprep.subr.bf16.mxu0 %v8752_v24  ;;  %5490 = vmatprep.subr.bf16.mxu1 %v8753_v22  ;;  %v8806_v24 = vld [vmem:[#allocation50_spill] sm:$0xff] }
 0x4d0   :  { %2669 = vmatprep.mubr.f32.mxu0 %v8578_v3  ;;  %2740 = vmatprep.mubr.f32.mxu1 %v8578_v3 }
 0x4d1   :  { %v6212_v44 = vpop.eup %6211 }
 0x4d2   :  { %v2278_v5 = vmul.f32 %v6212_v44, %v6210_v23  ;;  %5460 = vmatpush1.bf16.msra.mxu0 %v8651_v41  ;;  %5492 = vmatpush1.bf16.msra.mxu1 %v8695_v8  ;;  %v6214_v37 = vpop.eup %6213  ;;  %v8755_v44 = vld [vmem:[#allocation104_spill] sm:$0xff] }
 0x4d3   :  { %5462 = vmatprep.subr.bf16.mxu0 %v8696_v50  ;;  %5494 = vmatprep.subr.bf16.mxu1 %v8697_v59  ;;  %v2277_v33 = vmul.f32 %v6214_v37, %v7474_v9  ;;  %v6216_v23 = vpop.eup %6215  ;;  %v8757_v37 = vld [vmem:[#allocation106_spill] sm:$0xff]  ;;  %v8804_v59 = vld [vmem:[#allocation47_spill] sm:$0xff]  ;;  %v8805_v50 = vld [vmem:[#allocation49_spill] sm:$0xff] }
 0x4d4   :  { %v2269_v9 = vadd.f32 1.0, %v6216_v23  ;;  %v8763_v23 = vld [vmem:[#allocation112_spill] sm:$0xff] }
 0x4d5   :  { %v7602_v31 = vadd.f32 %v2278_v5, %v2277_v33  ;;  %v8756_v5 = vld [vmem:[#allocation105_spill] sm:$0xff]  ;;  %v8758_v33 = vld [vmem:[#allocation107_spill] sm:$0xff] }
 0x4d6   :  { %5464 = vmatpush1.bf16.msra.mxu0 %v8655_v1  ;;  %5496 = vmatpush1.bf16.msra.mxu1 %v8698_v2 }
 0x4d7   :  { %8754 = vst [vmem:[#allocation71_spill] sm:$0xff] %v7602_v31  ;;  %5466 = vmatprep.subr.bf16.mxu0 %v8657_v32  ;;  %5498 = vmatprep.subr.bf16.mxu1 %v8658_v63  ;;  %6217 = vtanh.f32 %v7602_v31  ;;  %v8759_v63 = vld [vmem:[#allocation108_spill] sm:$0xff] }
 0x4d8   :  { %6219 = vrcp.f32 %v2269_v9  ;;  %v8768_v9 = vld [vmem:[#allocation117_spill] sm:$0xff]  ;;  %v8803_v31 = vld [vmem:[#allocation48_spill] sm:$0xff] }
 0x4da   :  { %5468 = vmatpush1.bf16.msra.mxu0 %v8659_v21  ;;  %5500 = vmatpush1.bf16.msra.mxu1 %v8660_v60  ;;  %v8760_v21 = vld [vmem:[#allocation109_spill] sm:$0xff]  ;;  %v8761_v60 = vld [vmem:[#allocation110_spill] sm:$0xff] }
 0x4db   :  { %5470 = vmatprep.subr.bf16.mxu0 %v8661_v15  ;;  %5502 = vmatprep.subr.bf16.mxu1 %v8662_v11  ;;  %v8762_v15 = vld [vmem:[#allocation111_spill] sm:$0xff]  ;;  %v8764_v11 = vld [vmem:[#allocation113_spill] sm:$0xff] }
 0x4de   :  { %5472 = vmatpush1.bf16.msra.mxu0 %v8755_v44  ;;  %5504 = vmatpush1.bf16.msra.mxu1 %v8756_v5  ;;  %v8765_v44 = vld [vmem:[#allocation114_spill] sm:$0xff]  ;;  %v8766_v5 = vld [vmem:[#allocation115_spill] sm:$0xff] }
 0x4df   :  { %5474 = vmatprep.subr.bf16.mxu0 %v8757_v37  ;;  %5506 = vmatprep.subr.bf16.mxu1 %v8758_v33  ;;  %v8767_v33 = vld [vmem:[#allocation116_spill] sm:$0xff] }
 0x4e1   :  { %v6218_v37 = vpop.eup %6217 }
 0x4e2   :  { %5476 = vmatpush1.bf16.msra.mxu0 %v8759_v63  ;;  %5508 = vmatpush1.bf16.msra.mxu1 %v8760_v21  ;;  %v6220_v32 = vpop.eup %6219  ;;  %v8769_v21 = vld [vmem:[#allocation14_spill] sm:$0xff] }
 0x4e3   :  { %5478 = vmatprep.subr.bf16.mxu0 %v8761_v60  ;;  %5510 = vmatprep.subr.bf16.mxu1 %v8762_v15  ;;  %v2281_v63 = vmul.f32 %v6220_v32, %v6218_v37  ;;  %v8770_v60 = vld [vmem:[#allocation15_spill] sm:$0xff]  ;;  %v8776_v32 = vld [vmem:[#allocation22_spill] sm:$0xff]  ;;  %v8777_v37 = vld [vmem:[#allocation21_spill] sm:$0xff] }
 0x4e6   :  { %5480 = vmatpush1.bf16.msra.mxu0 %v8763_v23  ;;  %5512 = vmatpush1.bf16.msra.mxu1 %v8764_v11  ;;  %v8771_v23 = vld [vmem:[#allocation16_spill] sm:$0xff]  ;;  %v8772_v11 = vld [vmem:[#allocation18_spill] sm:$0xff] }
 0x4e7   :  { %5482 = vmatprep.subr.bf16.mxu0 %v8765_v44  ;;  %5514 = vmatprep.subr.bf16.mxu1 %v8766_v5  ;;  %v8773_v44 = vld [vmem:[#allocation17_spill] sm:$0xff]  ;;  %v8774_v5 = vld [vmem:[#allocation19_spill] sm:$0xff] }
 0x4ea   :  { %5484 = vmatpush1.bf16.msra.mxu0 %v8767_v33  ;;  %5516 = vmatpush1.bf16.msra.mxu1 %v8768_v9  ;;  %v8775_v9 = vld [vmem:[#allocation20_spill] sm:$0xff]  ;;  %v8785_v33 = vld [vmem:[#allocation29_spill] sm:$0xff] }
 0x4eb   :  { %5518 = vmatprep.subr.bf16.mxu0 %v8769_v21  ;;  %5550 = vmatprep.subr.bf16.mxu1 %v8770_v60  ;;  %v8778_v60 = vld [vmem:[#allocation23_spill] sm:$0xff]  ;;  %v8784_v21 = vld [vmem:[#allocation30_spill] sm:$0xff] }
 0x4ed   :  { %2670 = vmatmul.mubr.f32.vlgmr.msra.gmra.mrb[36].mxu0 %v2281_v63  ;;  %2741 = vmatmul.mubr.f32.vlgmr.msra.gmra.mrb[36].mxu1 %v2281_v63  ;;  %v8779_v63 = vld [vmem:[#allocation24_spill] sm:$0xff] }
 0x4ee   :  { %5520 = vmatpush1.bf16.msra.mxu0 %v8771_v23  ;;  %5552 = vmatpush1.bf16.msra.mxu1 %v8772_v11  ;;  %v8780_v23 = vld [vmem:[#allocation26_spill] sm:$0xff]  ;;  %v8781_v11 = vld [vmem:[#allocation25_spill] sm:$0xff] }
 0x4ef   :  { %5522 = vmatprep.subr.bf16.mxu0 %v8773_v44  ;;  %5554 = vmatprep.subr.bf16.mxu1 %v8774_v5  ;;  %v8782_v44 = vld [vmem:[#allocation27_spill] sm:$0xff]  ;;  %v8783_v5 = vld [vmem:[#allocation28_spill] sm:$0xff] }
 0x4f0   :  { %2845 = vmatprep.mubr.f32.mxu0 %v8578_v3  ;;  %2916 = vmatprep.mubr.f32.mxu1 %v8578_v3 }
 0x4f2   :  { %5524 = vmatpush1.bf16.msra.mxu0 %v8775_v9  ;;  %5556 = vmatpush1.bf16.msra.mxu1 %v8776_v32  ;;  %v8786_v9 = vld [vmem:[#allocation31_spill] sm:$0xff]  ;;  %v8787_v32 = vld [vmem:[#allocation32_spill] sm:$0xff] }
 0x4f3   :  { %5526 = vmatprep.subr.bf16.mxu0 %v8777_v37  ;;  %5558 = vmatprep.subr.bf16.mxu1 %v8778_v60  ;;  %v8788_v37 = vld [vmem:[#allocation34_spill] sm:$0xff]  ;;  %v8789_v60 = vld [vmem:[#allocation33_spill] sm:$0xff] }
 0x4f6   :  { %5528 = vmatpush1.bf16.msra.mxu0 %v8779_v63  ;;  %5560 = vmatpush1.bf16.msra.mxu1 %v8780_v23  ;;  %v8790_v63 = vld [vmem:[#allocation35_spill] sm:$0xff]  ;;  %v8791_v23 = vld [vmem:[#allocation36_spill] sm:$0xff] }
 0x4f7   :  { %5530 = vmatprep.subr.bf16.mxu0 %v8781_v11  ;;  %5562 = vmatprep.subr.bf16.mxu1 %v8782_v44  ;;  %v8792_v11 = vld [vmem:[#allocation38_spill] sm:$0xff]  ;;  %v8793_v44 = vld [vmem:[#allocation37_spill] sm:$0xff] }
 0x4fa   :  { %5532 = vmatpush1.bf16.msra.mxu0 %v8783_v5  ;;  %5564 = vmatpush1.bf16.msra.mxu1 %v8784_v21  ;;  %v8794_v5 = vld [vmem:[#allocation39_spill] sm:$0xff]  ;;  %v8795_v21 = vld [vmem:[#allocation40_spill] sm:$0xff] }
 0x4fb   :  { %5534 = vmatprep.subr.bf16.mxu0 %v8785_v33  ;;  %5566 = vmatprep.subr.bf16.mxu1 %v8786_v9  ;;  %v8796_v33 = vld [vmem:[#allocation42_spill] sm:$0xff]  ;;  %v8797_v9 = vld [vmem:[#allocation41_spill] sm:$0xff] }
 0x4fe   :  { %5536 = vmatpush1.bf16.msra.mxu0 %v8787_v32  ;;  %5568 = vmatpush1.bf16.msra.mxu1 %v8788_v37  ;;  %v8798_v32 = vld [vmem:[#allocation43_spill] sm:$0xff]  ;;  %v8799_v37 = vld [vmem:[#allocation44_spill] sm:$0xff] }
 0x4ff   :  { %5538 = vmatprep.subr.bf16.mxu0 %v8789_v60  ;;  %5570 = vmatprep.subr.bf16.mxu1 %v8790_v63  ;;  %v8800_v60 = vld [vmem:[#allocation45_spill] sm:$0xff]  ;;  %v8801_v63 = vld [vmem:[#allocation59_spill] sm:$0xff] }
 0x502   :  { %5540 = vmatpush1.bf16.msra.mxu0 %v8791_v23  ;;  %5572 = vmatpush1.bf16.msra.mxu1 %v8792_v11  ;;  %v8802_v23 = vld [vmem:[#allocation60_spill] sm:$0xff] }
 0x503   :  { %5542 = vmatprep.subr.bf16.mxu0 %v8793_v44  ;;  %5574 = vmatprep.subr.bf16.mxu1 %v8794_v5 }
 0x506   :  { %5544 = vmatpush1.bf16.msra.mxu0 %v8795_v21  ;;  %5576 = vmatpush1.bf16.msra.mxu1 %v8796_v33 }
 0x507   :  { %5546 = vmatprep.subr.bf16.mxu0 %v8797_v9  ;;  %5578 = vmatprep.subr.bf16.mxu1 %v8798_v32 }
 0x50a   :  { %5548 = vmatpush1.bf16.msra.mxu0 %v8799_v37  ;;  %5580 = vmatpush1.bf16.msra.mxu1 %v8800_v60 }
 0x50b   :  { %3016 = vmatprep.subr.bf16.mxu0 %v8801_v63  ;;  %3057 = vmatprep.subr.bf16.mxu1 %v8802_v23 }
 0x580   :  { %v2354_v11 = vpop.f32.mrb[30].mxu0  ;;  %v2425_v44 = vpop.f32.mrb[30].mxu1 }
 0x581   :  { %v2434_v15 = vrot.slane %v2354_v11, 4  ;;  %v2438_v5 = vrot.slane %v2354_v11, 5  ;;  %v2356_v2 = vpop.f32.mrb[31].mxu0  ;;  %v2427_v21 = vpop.f32.mrb[31].mxu1  ;;  %v2436_v41 = vrot.slane %v2425_v44, 4  ;;  %v2440_v23 = vrot.slane %v2425_v44, 5 }
 0x582   :  { %v2435_v1 = vrot.slane %v2356_v2, 4  ;;  %v2439_v33 = vrot.slane %v2356_v2, 5  ;;  %v2437_v22 = vrot.slane %v2427_v21, 4  ;;  %v8807_v2 = vld [vmem:[#allocation51_spill] sm:$0xff] }
 0x583   :  { %v2450_v9 = vadd.f32 %v2434_v15, %v8728_v28  ;;  %v2454_v32 = vadd.f32 %v2438_v5, %v8803_v31  ;;  %v2452_v42 = vadd.f32 %v2436_v41, %v8806_v24  ;;  %v2456_v19 = vadd.f32 %v2440_v23, %v8807_v2  ;;  %v8808_v5 = vld [vmem:[#allocation52_spill] sm:$0xff] }
 0x584   :  { %v2451_v37 = vadd.f32 %v2435_v1, %v8804_v59  ;;  %v2455_v60 = vadd.f32 %v2439_v33, %v8805_v50  ;;  %v2441_v15 = vrot.slane %v2427_v21, 5  ;;  %v2453_v1 = vadd.f32 %v2437_v22, %v8808_v5 }
 0x585   :  { %v4825_v8 = vmul.f32 -1.442695, %v2450_v9  ;;  %v4828_v63 = vmul.f32 -1.442695, %v2454_v32  ;;  %v4827_v59 = vmul.f32 -1.442695, %v2452_v42 }
 0x586   :  { %v4826_v3 = vmul.f32 -1.442695, %v2451_v37  ;;  %v4829_v11 = vmul.f32 -1.442695, %v2455_v60  ;;  %v4830_v33 = vmul.f32 -1.442695, %v2456_v19 }
 0x587   :  { %6221 = vpow2.f32 %v4825_v8  ;;  %v8809_v9 = vld [vmem:[#allocation53_spill] sm:$0xff] }
 0x588   :  { %6223 = vpow2.f32 %v4828_v63  ;;  %v2457_v32 = vadd.f32 %v2441_v15, %v8809_v9 }
 0x589   :  { %6225 = vpow2.f32 %v4826_v3 }
 0x58a   :  { %6227 = vpow2.f32 %v4829_v11 }
 0x58b   :  { %6229 = vtanh.f32 %v2453_v1 }
 0x58c   :  { %6231 = vpow2.f32 %v4827_v59 }
 0x58d   :  { %6233 = vpow2.f32 %v4830_v33 }
 0x58e   :  { %6235 = vtanh.f32 %v2457_v32  ;;  %v2498_v32 = vrot.slane %v7545_v17, 7 }
 0x591   :  { %v6222_v44 = vpop.eup %6221 }
 0x592   :  { %v6224_v8 = vpop.eup %6223  ;;  %v2476_v37 = vadd.f32 1.0, %v6222_v44 }
 0x593   :  { %v2479_v60 = vadd.f32 1.0, %v6224_v8  ;;  %v6226_v41 = vpop.eup %6225 }
 0x594   :  { %6237 = vrcp.f32 %v2476_v37  ;;  %v6228_v3 = vpop.eup %6227  ;;  %v2477_v21 = vadd.f32 1.0, %v6226_v41  ;;  %v2499_v41 = vrot.slane %v7547_v16, 7 }
 0x595   :  { %6239 = vrcp.f32 %v2479_v60  ;;  %v2480_v63 = vadd.f32 1.0, %v6228_v3  ;;  %v6230_v42 = vpop.eup %6229 }
 0x596   :  { %6241 = vrcp.f32 %v2477_v21  ;;  %v6232_v19 = vpop.eup %6231 }
 0x597   :  { %6243 = vrcp.f32 %v2480_v63  ;;  %v6234_v22 = vpop.eup %6233  ;;  %v2478_v8 = vadd.f32 1.0, %v6232_v19 }
 0x598   :  { %v6236_v23 = vpop.eup %6235  ;;  %v2481_v3 = vadd.f32 1.0, %v6234_v22 }
 0x599   :  { %6245 = vrcp.f32 %v2478_v8 }
 0x59a   :  { %6247 = vrcp.f32 %v2481_v3 }
 0x59e   :  { %v6238_v11 = vpop.eup %6237 }
 0x59f   :  { %v6240_v15 = vpop.eup %6239  ;;  %v2504_v59 = vmul.f32 %v6238_v11, %v6230_v42 }
 0x5a0   :  { %v2505_v1 = vmul.f32 %v6240_v15, %v6236_v23  ;;  %v2557_v44 = vpop.f32.mrb[32].mxu0  ;;  %v2598_v33 = vpop.f32.mrb[32].mxu1 }
 0x5a1   :  { %v2559_v37 = vpop.f32.mrb[33].mxu0  ;;  %v2600_v60 = vpop.f32.mrb[33].mxu1 }
 0x5a2   :  { %v6242_v9 = vpop.eup %6241  ;;  %v2561_v21 = vpop.f32.mrb[34].mxu0 }
 0x5a3   :  { %v2602_v63 = vpop.f32.mrb[34].mxu1  ;;  %v6244_v5 = vpop.eup %6243  ;;  %v2502_v2 = vmul.f32 %v6242_v9, %v2498_v32 }
 0x5a4   :  { %v2562_v24 = vpop.f32.mrb[35].mxu0  ;;  %v2603_v50 = vpop.f32.mrb[35].mxu1  ;;  %v2503_v31 = vmul.f32 %v6244_v5, %v2499_v41  ;;  %v8821_v63 = vld [vmem:[#allocation97_spill] sm:$0xff] }
 0x5a5   :  { %v7673_v42 = vadd.f32 %v2504_v59, %v2502_v2  ;;  %v6246_v17 = vpop.eup %6245 }
 0x5a6   :  { %v7675_v23 = vadd.f32 %v2505_v1, %v2503_v31  ;;  %v6248_v16 = vpop.eup %6247 }
 0x5a7   :  { %6249 = vtanh.f32 %v7673_v42 }
 0x5a8   :  { %6251 = vtanh.f32 %v7675_v23 }
 0x5b1   :  { %v6250_v19 = vpop.eup %6249 }
 0x5b2   :  { %v6252_v22 = vpop.eup %6251  ;;  %v2510_v11 = vmul.f32 %v6250_v19, %v6246_v17  ;;  %v8822_v17 = vld [vmem:[#allocation98_spill] sm:$0xff] }
 0x5b3   :  { %v2511_v15 = vmul.f32 %v6252_v22, %v6248_v16  ;;  %v8823_v16 = vld [vmem:[#allocation99_spill] sm:$0xff]  ;;  %v8824_v22 = vld [vmem:[#allocation100_spill] sm:$0xff] }
 0x5b4   :  { %v2777_v9 = vrot.slane %v2510_v11, 4  ;;  %v3005_v24 = vpack.c.bf16 %v2510_v11, %v2510_v11  ;;  %v8825_v11 = vld [vmem:[#allocation101_spill] sm:$0xff] }
 0x5b5   :  { %v2778_v50 = vrot.slane %v2511_v15, 3  ;;  %v3006_v5 = vpack.c.bf16 %v2511_v15, %v2511_v15  ;;  %v8826_v15 = vld [vmem:[#allocation102_spill] sm:$0xff] }
 0x5b6   :  { %v3009_v32 = vunpack.c.l.b16 %v3005_v24 }
 0x5b7   :  { %v2779_v2 = vsel %vm535_vm2, %v2778_v50, %v2777_v9  ;;  %v3010_v59 = vunpack.c.l.b16 %v3006_v5  ;;  %v8827_v9 = vld [vmem:[#allocation103_spill] sm:$0xff]  ;;  %v8828_v50 = vld [vmem:[#allocation104_spill] sm:$0xff]  ;;  %v8829_v5 = vld [vmem:[#allocation105_spill] sm:$0xff] }
 0x5b8   :  { %2846 = vmatmul.mubr.f32.vlgmr.msra.gmra.mrb[38].mxu0 %v2779_v2  ;;  %2917 = vmatmul.mubr.f32.vlgmr.msra.gmra.mrb[38].mxu1 %v2779_v2  ;;  %v3011_v31 = vrot.slane %v3009_v32, 4  ;;  %v8830_v32 = vld [vmem:[#allocation106_spill] sm:$0xff]  ;;  %v8831_v2 = vld [vmem:[#allocation107_spill] sm:$0xff] }
 0x5b9   :  { %3017 = vmatpush1.bf16.msra.mxu0 %v7360_v29  ;;  %3058 = vmatpush1.bf16.msra.mxu1 %v7363_v58  ;;  %v3012_v1 = vrot.slane %v3010_v59, 3  ;;  %v2558_v29 = vadd.f32 %v2557_v44, %v8738_v27  ;;  %v2599_v58 = vadd.f32 %v2598_v33, %v7228_v20  ;;  %v8832_v59 = vld [vmem:[#allocation108_spill] sm:$0xff] }
 0x5ba   :  { %3018 = vmatprep.subr.bf16.mxu0 %v7366_v55  ;;  %3059 = vmatprep.subr.bf16.mxu1 %v7369_v34  ;;  %v2560_v55 = vadd.f32 %v2559_v37, %v8739_v51  ;;  %v2601_v34 = vadd.f32 %v2600_v60, %v8740_v10  ;;  %v8820_v60 = vld [vmem:[#allocation96_spill] sm:$0xff] }
 0x5bb   :  { %3048 = vmatprep.mubr.bf16.mxu0 %v8682_v48  ;;  %3089 = vmatprep.mubr.bf16.mxu1 %v8682_v48  ;;  %v3013_v8 = vsel %vm535_vm2, %v3012_v1, %v3011_v31  ;;  %v8833_v31 = vld [vmem:[#allocation109_spill] sm:$0xff]  ;;  %v8834_v1 = vld [vmem:[#allocation110_spill] sm:$0xff] }
 0x5bd   :  { %3019 = vmatpush1.bf16.msra.mxu0 %v7377_v53  ;;  %3060 = vmatpush1.bf16.msra.mxu1 %v7380_v52 }
 0x5be   :  { %3020 = vmatprep.subr.bf16.mxu0 %v8736_v26  ;;  %3061 = vmatprep.subr.bf16.mxu1 %v8737_v30 }
 0x5c0   :  { %v2671_v41 = vpop.f32.mrb[36].mxu0  ;;  %v2742_v3 = vpop.f32.mrb[36].mxu1 }
 0x5c1   :  { %3021 = vmatpush1.bf16.msra.mxu0 %v8741_v47  ;;  %3062 = vmatpush1.bf16.msra.mxu1 %v7396_v39  ;;  %v2747_v53 = vadd.f32 %v2671_v41, %v2558_v29  ;;  %v2749_v52 = vadd.f32 %v2742_v3, %v2599_v58  ;;  %v2673_v21 = vpop.f32.mrb[37].mxu0  ;;  %v2744_v26 = vpop.f32.mrb[37].mxu1  ;;  %v8836_v29 = vld [vmem:[#allocation112_spill] sm:$0xff]  ;;  %v8837_v58 = vld [vmem:[#allocation113_spill] sm:$0xff] }
 0x5c2   :  { %3022 = vmatprep.subr.bf16.mxu0 %v7399_v35  ;;  %3063 = vmatprep.subr.bf16.mxu1 %v7402_v45  ;;  %v2748_v30 = vadd.f32 %v2673_v21, %v2560_v55  ;;  %v2750_v44 = vadd.f32 %v2744_v26, %v2601_v34  ;;  %v8838_v55 = vld [vmem:[#allocation114_spill] sm:$0xff]  ;;  %v8839_v34 = vld [vmem:[#allocation115_spill] sm:$0xff] }
 0x5c3   :  { %v4831_v33 = vmul.f32 -1.442695, %v2747_v53  ;;  %v8840_v53 = vld [vmem:[#allocation116_spill] sm:$0xff]  ;;  %v8842_v26 = vld [vmem:[#allocation14_spill] sm:$0xff] }
 0x5c4   :  { %v4832_v37 = vmul.f32 -1.442695, %v2748_v30  ;;  %v8843_v30 = vld [vmem:[#allocation15_spill] sm:$0xff] }
 0x5c5   :  { %6253 = vpow2.f32 %v4831_v33  ;;  %3023 = vmatpush1.bf16.msra.mxu0 %v7405_v13  ;;  %3064 = vmatpush1.bf16.msra.mxu1 %v7408_v0  ;;  %v4833_v0 = vmul.f32 -1.442695, %v2749_v52  ;;  %v8841_v52 = vld [vmem:[#allocation117_spill] sm:$0xff]  ;;  %v8845_v33 = vld [vmem:[#allocation18_spill] sm:$0xff] }
 0x5c6   :  { %3024 = vmatprep.subr.bf16.mxu0 %v7411_v14  ;;  %3065 = vmatprep.subr.bf16.mxu1 %v7414_v25  ;;  %6255 = vpow2.f32 %v4832_v37  ;;  %v3014_v14 = vpack.c.b16 %v3013_v8, %v3013_v8  ;;  %v8810_v25 = vld [vmem:[#allocation88_spill] sm:$0xff]  ;;  %v8835_v8 = vld [vmem:[#allocation111_spill] sm:$0xff]  ;;  %v8846_v37 = vld [vmem:[#allocation17_spill] sm:$0xff] }
 0x5c7   :  { %6257 = vtanh.f32 %v2750_v44  ;;  %v8844_v44 = vld [vmem:[#allocation16_spill] sm:$0xff] }
 0x5c9   :  { %3025 = vmatpush1.bf16.msra.mxu0 %v8742_v38  ;;  %3066 = vmatpush1.bf16.msra.mxu1 %v8743_v56  ;;  %v8815_v38 = vld [vmem:[#allocation92_spill] sm:$0xff]  ;;  %v8816_v56 = vld [vmem:[#allocation93_spill] sm:$0xff] }
 0x5ca   :  { %3026 = vmatprep.subr.bf16.mxu0 %v8744_v18  ;;  %3067 = vmatprep.subr.bf16.mxu1 %v8745_v54  ;;  %v8817_v54 = vld [vmem:[#allocation94_spill] sm:$0xff] }
 0x5cd   :  { %3027 = vmatpush1.bf16.msra.mxu0 %v8746_v49  ;;  %3068 = vmatpush1.bf16.msra.mxu1 %v8747_v6  ;;  %v8818_v49 = vld [vmem:[#allocation95_spill] sm:$0xff] }
 0x5ce   :  { %3028 = vmatprep.subr.bf16.mxu0 %v8748_v36  ;;  %3069 = vmatprep.subr.bf16.mxu1 %v7438_v57  ;;  %v8819_v6 = vld [vmem:[#allocation71_spill] sm:$0xff] }
 0x5cf   :  { %v6254_v35 = vpop.eup %6253 }
 0x5d0   :  { %v2760_v13 = vadd.f32 1.0, %v6254_v35  ;;  %v6256_v39 = vpop.eup %6255  ;;  %v8847_v35 = vld [vmem:[#allocation19_spill] sm:$0xff] }
 0x5d1   :  { %3029 = vmatpush1.bf16.msra.mxu0 %v7441_v46  ;;  %3070 = vmatpush1.bf16.msra.mxu1 %v8749_v40  ;;  %v2761_v45 = vadd.f32 1.0, %v6256_v39  ;;  %v8811_v46 = vld [vmem:[#allocation89_spill] sm:$0xff]  ;;  %v6258_v57 = vpop.eup %6257  ;;  %v8849_v39 = vld [vmem:[#allocation22_spill] sm:$0xff] }
 0x5d2   :  { %6259 = vrcp.f32 %v2760_v13  ;;  %3030 = vmatprep.subr.bf16.mxu0 %v7447_v43  ;;  %3071 = vmatprep.subr.bf16.mxu1 %v7450_v61  ;;  %v8812_v43 = vld [vmem:[#allocation90_spill] sm:$0xff]  ;;  %v8813_v61 = vld [vmem:[#allocation91_spill] sm:$0xff]  ;;  %v8848_v13 = vld [vmem:[#allocation20_spill] sm:$0xff] }
 0x5d3   :  { %6261 = vrcp.f32 %v2761_v45  ;;  %v8850_v45 = vld [vmem:[#allocation21_spill] sm:$0xff] }
 0x5d4   :  { %6263 = vpow2.f32 %v4833_v0  ;;  %v8851_v0 = vld [vmem:[#allocation23_spill] sm:$0xff] }
 0x5d5   :  { %3031 = vmatpush1.bf16.msra.mxu0 %v7453_v12  ;;  %3072 = vmatpush1.bf16.msra.mxu1 %v7456_v62  ;;  %v8814_v12 = vmov 0.0  }
 0x5d6   :  { %5582 = vmatprep.subr.bf16.mxu0 %v8645_v4  ;;  %5614 = vmatprep.subr.bf16.mxu1 %v8646_v7 }
 0x5d8   :  { %3049 = vmatmul.mubr.bf16.vlgmr.msra.gmra.mrb[40].mxu0 %v3014_v14  ;;  %3090 = vmatmul.mubr.bf16.vlgmr.msra.gmra.mrb[40].mxu1 %v3014_v14  ;;  %v8852_v14 = vld [vmem:[#allocation24_spill] sm:$0xff] }
 0x5d9   :  { %5584 = vmatpush1.bf16.msra.mxu0 %v8810_v25  ;;  %5616 = vmatpush1.bf16.msra.mxu1 %v8811_v46 }
 0x5da   :  { %5586 = vmatprep.subr.bf16.mxu0 %v8812_v43  ;;  %5618 = vmatprep.subr.bf16.mxu1 %v8813_v61 }
 0x5db   :  { %3162 = vmatprep.mubr.f32.mxu0 %v8814_v12  ;;  %3233 = vmatprep.mubr.f32.mxu1 %v8814_v12 }
 0x5dc   :  { %v6260_v62 = vpop.eup %6259 }
 0x5dd   :  { %v2771_v47 = vmul.f32 %v6260_v62, %v6258_v57  ;;  %5588 = vmatpush1.bf16.msra.mxu0 %v8815_v38  ;;  %5620 = vmatpush1.bf16.msra.mxu1 %v8816_v56  ;;  %v6262_v18 = vpop.eup %6261  ;;  %v8853_v57 = vld [vmem:[#allocation26_spill] sm:$0xff]  ;;  %v8854_v62 = vld [vmem:[#allocation25_spill] sm:$0xff] }
 0x5de   :  { %5590 = vmatprep.subr.bf16.mxu0 %v8817_v54  ;;  %5622 = vmatprep.subr.bf16.mxu1 %v8818_v49  ;;  %v2770_v36 = vmul.f32 %v6262_v18, %v8819_v6  ;;  %v6264_v19 = vpop.eup %6263  ;;  %v8856_v18 = vld [vmem:[#allocation28_spill] sm:$0xff]  ;;  %v8857_v6 = vld [vmem:[#allocation30_spill] sm:$0xff] }
 0x5df   :  { %v2762_v24 = vadd.f32 1.0, %v6264_v19  ;;  %v8859_v19 = vld [vmem:[#allocation31_spill] sm:$0xff] }
 0x5e0   :  { %v7730_v40 = vadd.f32 %v2771_v47, %v2770_v36  ;;  %v8855_v47 = vld [vmem:[#allocation27_spill] sm:$0xff]  ;;  %v8858_v36 = vld [vmem:[#allocation29_spill] sm:$0xff] }
 0x5e1   :  { %5592 = vmatpush1.bf16.msra.mxu0 %v8820_v60  ;;  %5624 = vmatpush1.bf16.msra.mxu1 %v8821_v63 }
 0x5e2   :  { %5594 = vmatprep.subr.bf16.mxu0 %v8822_v17  ;;  %5626 = vmatprep.subr.bf16.mxu1 %v8823_v16  ;;  %6265 = vtanh.f32 %v7730_v40 }
 0x5e3   :  { %6267 = vrcp.f32 %v2762_v24  ;;  %v8860_v24 = vld [vmem:[#allocation32_spill] sm:$0xff] }
 0x5e5   :  { %5596 = vmatpush1.bf16.msra.mxu0 %v8824_v22  ;;  %5628 = vmatpush1.bf16.msra.mxu1 %v8825_v11 }
 0x5e6   :  { %5598 = vmatprep.subr.bf16.mxu0 %v8826_v15  ;;  %5630 = vmatprep.subr.bf16.mxu1 %v8827_v9 }
 0x5e9   :  { %5600 = vmatpush1.bf16.msra.mxu0 %v8828_v50  ;;  %5632 = vmatpush1.bf16.msra.mxu1 %v8829_v5 }
 0x5ea   :  { %5602 = vmatprep.subr.bf16.mxu0 %v8830_v32  ;;  %5634 = vmatprep.subr.bf16.mxu1 %v8831_v2 }
 0x5ec   :  { %v6266_v41 = vpop.eup %6265 }
 0x5ed   :  { %5604 = vmatpush1.bf16.msra.mxu0 %v8832_v59  ;;  %5636 = vmatpush1.bf16.msra.mxu1 %v8833_v31  ;;  %v6268_v3 = vpop.eup %6267 }
 0x5ee   :  { %5606 = vmatprep.subr.bf16.mxu0 %v8834_v1  ;;  %5638 = vmatprep.subr.bf16.mxu1 %v8835_v8  ;;  %v2774_v21 = vmul.f32 %v6268_v3, %v6266_v41  ;;  %v8861_v41 = vld [vmem:[#allocation34_spill] sm:$0xff]  ;;  %v8862_v3 = vld [vmem:[#allocation33_spill] sm:$0xff] }
 0x5f1   :  { %5608 = vmatpush1.bf16.msra.mxu0 %v8836_v29  ;;  %5640 = vmatpush1.bf16.msra.mxu1 %v8837_v58 }
 0x5f2   :  { %5610 = vmatprep.subr.bf16.mxu0 %v8838_v55  ;;  %5642 = vmatprep.subr.bf16.mxu1 %v8839_v34 }
 0x5f5   :  { %5612 = vmatpush1.bf16.msra.mxu0 %v8840_v53  ;;  %5644 = vmatpush1.bf16.msra.mxu1 %v8841_v52 }
 0x5f6   :  { %5646 = vmatprep.subr.bf16.mxu0 %v8842_v26  ;;  %5678 = vmatprep.subr.bf16.mxu1 %v8843_v30  ;;  %v8879_v26 = vld [vmem:[#allocation50_spill] sm:$0xff] }
 0x5f8   :  { %3163 = vmatmul.mubr.f32.vlgmr.msra.gmra.mrb[44].mxu0 %v2774_v21  ;;  %3234 = vmatmul.mubr.f32.vlgmr.msra.gmra.mrb[44].mxu1 %v2774_v21  ;;  %v8863_v21 = vld [vmem:[#allocation35_spill] sm:$0xff] }
 0x5f9   :  { %5648 = vmatpush1.bf16.msra.mxu0 %v8844_v44  ;;  %5680 = vmatpush1.bf16.msra.mxu1 %v8845_v33 }
 0x5fa   :  { %5650 = vmatprep.subr.bf16.mxu0 %v8846_v37  ;;  %5682 = vmatprep.subr.bf16.mxu1 %v8847_v35 }
 0x5fb   :  { %3338 = vmatprep.mubr.f32.mxu0 %v8814_v12  ;;  %3409 = vmatprep.mubr.f32.mxu1 %v8814_v12 }
 0x5fd   :  { %5652 = vmatpush1.bf16.msra.mxu0 %v8848_v13  ;;  %5684 = vmatpush1.bf16.msra.mxu1 %v8849_v39  ;;  %v8878_v13 = vld [vmem:[#allocation49_spill] sm:$0xff] }
 0x5fe   :  { %5654 = vmatprep.subr.bf16.mxu0 %v8850_v45  ;;  %5686 = vmatprep.subr.bf16.mxu1 %v8851_v0  ;;  %v8876_v0 = vld [vmem:[#allocation48_spill] sm:$0xff]  ;;  %v8877_v45 = vld [vmem:[#allocation47_spill] sm:$0xff] }
 0x601   :  { %5656 = vmatpush1.bf16.msra.mxu0 %v8852_v14  ;;  %5688 = vmatpush1.bf16.msra.mxu1 %v8853_v57  ;;  %v8864_v57 = vld [vmem:[#allocation36_spill] sm:$0xff] }
 0x602   :  { %5658 = vmatprep.subr.bf16.mxu0 %v8854_v62  ;;  %5690 = vmatprep.subr.bf16.mxu1 %v8855_v47  ;;  %v8865_v62 = vld [vmem:[#allocation38_spill] sm:$0xff]  ;;  %v8866_v47 = vld [vmem:[#allocation37_spill] sm:$0xff] }
 0x605   :  { %5660 = vmatpush1.bf16.msra.mxu0 %v8856_v18  ;;  %5692 = vmatpush1.bf16.msra.mxu1 %v8857_v6  ;;  %v8867_v18 = vld [vmem:[#allocation39_spill] sm:$0xff]  ;;  %v8868_v6 = vld [vmem:[#allocation40_spill] sm:$0xff] }
 0x606   :  { %5662 = vmatprep.subr.bf16.mxu0 %v8858_v36  ;;  %5694 = vmatprep.subr.bf16.mxu1 %v8859_v19  ;;  %v8869_v36 = vld [vmem:[#allocation42_spill] sm:$0xff]  ;;  %v8870_v19 = vld [vmem:[#allocation41_spill] sm:$0xff] }
 0x609   :  { %5664 = vmatpush1.bf16.msra.mxu0 %v8860_v24  ;;  %5696 = vmatpush1.bf16.msra.mxu1 %v8861_v41  ;;  %v8871_v24 = vld [vmem:[#allocation43_spill] sm:$0xff]  ;;  %v8872_v41 = vld [vmem:[#allocation44_spill] sm:$0xff] }
 0x60a   :  { %5666 = vmatprep.subr.bf16.mxu0 %v8862_v3  ;;  %5698 = vmatprep.subr.bf16.mxu1 %v8863_v21  ;;  %v8873_v3 = vld [vmem:[#allocation45_spill] sm:$0xff] }
 0x60b   :  { %v7789_v21 = vld [vmem:[#allocation4 + $0x4] ss:$16 sps:$4 sm:$0xff]  }
 0x60c   :  { %8874 = vst [vmem:[#allocation72_spill] sm:$0xff] %v7789_v21 }
 0x60d   :  { %5668 = vmatpush1.bf16.msra.mxu0 %v8864_v57  ;;  %5700 = vmatpush1.bf16.msra.mxu1 %v8865_v62  ;;  %v7792_v62 = vld [vmem:[#allocation4 + $0xc] ss:$16 sps:$4 sm:$0xff]  }
 0x60e   :  { %5670 = vmatprep.subr.bf16.mxu0 %v8866_v47  ;;  %5702 = vmatprep.subr.bf16.mxu1 %v8867_v18  ;;  %8875 = vst [vmem:[#allocation73_spill] sm:$0xff] %v7792_v62 }
 0x611   :  { %5672 = vmatpush1.bf16.msra.mxu0 %v8868_v6  ;;  %5704 = vmatpush1.bf16.msra.mxu1 %v8869_v36 }
 0x612   :  { %5674 = vmatprep.subr.bf16.mxu0 %v8870_v19  ;;  %5706 = vmatprep.subr.bf16.mxu1 %v8871_v24 }
 0x615   :  { %5676 = vmatpush1.bf16.msra.mxu0 %v8872_v41  ;;  %5708 = vmatpush1.bf16.msra.mxu1 %v8873_v3 }
 0x616   :  { %3509 = vmatprep.subr.bf16.mxu0 %v7789_v21  ;;  %3550 = vmatprep.subr.bf16.mxu1 %v7792_v62 }
 0x68b   :  { %v2847_v18 = vpop.f32.mrb[38].mxu0  ;;  %v2918_v6 = vpop.f32.mrb[38].mxu1 }
 0x68c   :  { %v2927_v47 = vrot.slane %v2847_v18, 3  ;;  %v2931_v36 = vrot.slane %v2847_v18, 4  ;;  %v2849_v57 = vpop.f32.mrb[39].mxu0  ;;  %v2920_v19 = vpop.f32.mrb[39].mxu1  ;;  %v2929_v33 = vrot.slane %v2918_v6, 3  ;;  %v2933_v62 = vrot.slane %v2918_v6, 4 }
 0x68d   :  { %v2928_v14 = vrot.slane %v2849_v57, 3  ;;  %v2932_v24 = vrot.slane %v2849_v57, 4  ;;  %v2930_v30 = vrot.slane %v2920_v19, 3  ;;  %v8880_v57 = vld [vmem:[#allocation51_spill] sm:$0xff] }
 0x68e   :  { %v2943_v41 = vadd.f32 %v2927_v47, %v8728_v28  ;;  %v2947_v3 = vadd.f32 %v2931_v36, %v8876_v0  ;;  %v2945_v52 = vadd.f32 %v2929_v33, %v8879_v26  ;;  %v2949_v53 = vadd.f32 %v2933_v62, %v8880_v57  ;;  %v8881_v36 = vld [vmem:[#allocation52_spill] sm:$0xff] }
 0x68f   :  { %v2944_v39 = vadd.f32 %v2928_v14, %v8877_v45  ;;  %v2948_v21 = vadd.f32 %v2932_v24, %v8878_v13  ;;  %v2934_v47 = vrot.slane %v2920_v19, 4  ;;  %v2946_v14 = vadd.f32 %v2930_v30, %v8881_v36 }
 0x690   :  { %v4834_v35 = vmul.f32 -1.442695, %v2943_v41  ;;  %v4837_v37 = vmul.f32 -1.442695, %v2947_v3  ;;  %v4836_v45 = vmul.f32 -1.442695, %v2945_v52 }
 0x691   :  { %v4835_v44 = vmul.f32 -1.442695, %v2944_v39  ;;  %v4838_v18 = vmul.f32 -1.442695, %v2948_v21  ;;  %v4839_v24 = vmul.f32 -1.442695, %v2949_v53 }
 0x692   :  { %6269 = vpow2.f32 %v4834_v35  ;;  %v8882_v41 = vld [vmem:[#allocation53_spill] sm:$0xff] }
 0x693   :  { %6271 = vpow2.f32 %v4837_v37  ;;  %v2950_v3 = vadd.f32 %v2934_v47, %v8882_v41 }
 0x694   :  { %6273 = vpow2.f32 %v4835_v44 }
 0x695   :  { %6275 = vpow2.f32 %v4838_v18 }
 0x696   :  { %6277 = vtanh.f32 %v2946_v14 }
 0x697   :  { %6279 = vpow2.f32 %v4836_v45 }
 0x698   :  { %6281 = vpow2.f32 %v4839_v24 }
 0x699   :  { %6283 = vtanh.f32 %v2950_v3  ;;  %v2991_v3 = vrot.slane %v7673_v42, 7 }
 0x69c   :  { %v6270_v6 = vpop.eup %6269 }
 0x69d   :  { %v6272_v35 = vpop.eup %6271  ;;  %v2969_v37 = vadd.f32 1.0, %v6270_v6 }
 0x69e   :  { %v2972_v39 = vadd.f32 1.0, %v6272_v35  ;;  %v6274_v33 = vpop.eup %6273 }
 0x69f   :  { %6285 = vrcp.f32 %v2969_v37  ;;  %v6276_v44 = vpop.eup %6275  ;;  %v2970_v62 = vadd.f32 1.0, %v6274_v33  ;;  %v2992_v33 = vrot.slane %v7675_v23, 7 }
 0x6a0   :  { %6287 = vrcp.f32 %v2972_v39  ;;  %v2973_v19 = vadd.f32 1.0, %v6276_v44  ;;  %v6278_v52 = vpop.eup %6277 }
 0x6a1   :  { %6289 = vrcp.f32 %v2970_v62  ;;  %v6280_v53 = vpop.eup %6279 }
 0x6a2   :  { %6291 = vrcp.f32 %v2973_v19  ;;  %v6282_v30 = vpop.eup %6281  ;;  %v2971_v35 = vadd.f32 1.0, %v6280_v53 }
 0x6a3   :  { %v6284_v21 = vpop.eup %6283  ;;  %v2974_v44 = vadd.f32 1.0, %v6282_v30 }
 0x6a4   :  { %6293 = vrcp.f32 %v2971_v35  ;;  %v7815_v35 = vld [vmem:[#allocation4 + $0x8] ss:$16 sps:$4 sm:$0xff]  }
 0x6a5   :  { %6295 = vrcp.f32 %v2974_v44  ;;  %v7818_v44 = vld [vmem:[#allocation4 + $0x24] ss:$16 sps:$4 sm:$0xff]  }
 0x6a9   :  { %v6286_v18 = vpop.eup %6285 }
 0x6aa   :  { %v6288_v47 = vpop.eup %6287  ;;  %v2997_v45 = vmul.f32 %v6286_v18, %v6278_v52 }
 0x6ab   :  { %v2998_v14 = vmul.f32 %v6288_v47, %v6284_v21  ;;  %v3050_v6 = vpop.f32.mrb[40].mxu0  ;;  %v3091_v24 = vpop.f32.mrb[40].mxu1 }
 0x6ac   :  { %v3052_v37 = vpop.f32.mrb[41].mxu0  ;;  %v3093_v39 = vpop.f32.mrb[41].mxu1 }
 0x6ad   :  { %v6290_v41 = vpop.eup %6289  ;;  %v3054_v62 = vpop.f32.mrb[42].mxu0 }
 0x6ae   :  { %v3095_v19 = vpop.f32.mrb[42].mxu1  ;;  %v6292_v36 = vpop.eup %6291  ;;  %v2995_v57 = vmul.f32 %v6290_v41, %v2991_v3  ;;  %v7821_v62 = vld [vmem:[#allocation4 + $0x2c] ss:$16 sps:$4 sm:$0xff]  }
 0x6af   :  { %v3055_v26 = vpop.f32.mrb[43].mxu0  ;;  %v3096_v13 = vpop.f32.mrb[43].mxu1  ;;  %v2996_v0 = vmul.f32 %v6292_v36, %v2992_v33 }
 0x6b0   :  { %v7805_v52 = vadd.f32 %v2997_v45, %v2995_v57  ;;  %v6294_v42 = vpop.eup %6293 }
 0x6b1   :  { %v7807_v21 = vadd.f32 %v2998_v14, %v2996_v0  ;;  %v6296_v23 = vpop.eup %6295  ;;  %v7812_v14 = vld [vmem:[#allocation4] ss:$16 sps:$4 sm:$0xff]  }
 0x6b2   :  { %6297 = vtanh.f32 %v7805_v52 }
 0x6b3   :  { %6299 = vtanh.f32 %v7807_v21 }
 0x6bc   :  { %v6298_v53 = vpop.eup %6297 }
 0x6bd   :  { %v6300_v30 = vpop.eup %6299  ;;  %v3003_v18 = vmul.f32 %v6298_v53, %v6294_v42  ;;  %v7829_v42 = vld [vmem:[#allocation4 + $0x20] ss:$16 sps:$4 sm:$0xff]   ;;  %v7835_v53 = vld [vmem:[#allocation4 + $0x44] ss:$16 sps:$4 sm:$0xff]  }
 0x6be   :  { %v3004_v47 = vmul.f32 %v6300_v30, %v6296_v23  ;;  %v7832_v23 = vld [vmem:[#allocation4 + $0x28] ss:$16 sps:$4 sm:$0xff]   ;;  %v7838_v30 = vld [vmem:[#allocation4 + $0x4c] ss:$16 sps:$4 sm:$0xff]  }
 0x6bf   :  { %v3270_v41 = vrot.slane %v3003_v18, 5  ;;  %v3498_v26 = vpack.c.bf16 %v3003_v18, %v3003_v18  ;;  %v3051_v18 = vadd.f32 %v3050_v6, %v8738_v27  ;;  %v7851_v27 = vld [vmem:[#allocation4 + $0x64] ss:$16 sps:$4 sm:$0xff]  }
 0x6c0   :  { %v3271_v13 = vrot.slane %v3004_v47, 4  ;;  %v3499_v36 = vpack.c.bf16 %v3004_v47, %v3004_v47  ;;  %v3092_v47 = vadd.f32 %v3091_v24, %v7228_v20  ;;  %v7854_v24 = vld [vmem:[#allocation4 + $0x6c] ss:$16 sps:$4 sm:$0xff]  }
 0x6c1   :  { %v3502_v3 = vunpack.c.l.b16 %v3498_v26  ;;  %v3094_v26 = vadd.f32 %v3093_v39, %v8740_v10 }
 0x6c2   :  { %v3272_v57 = vsel %vm535_vm2, %v3271_v13, %v3270_v41  ;;  %v3503_v45 = vunpack.c.l.b16 %v3499_v36  ;;  %v3053_v41 = vadd.f32 %v3052_v37, %v8739_v51  ;;  %v7857_v51 = vld [vmem:[#allocation4 + $0x60] ss:$16 sps:$4 sm:$0xff]  }
 0x6c3   :  { %3339 = vmatmul.mubr.f32.vlgmr.msra.gmra.mrb[46].mxu0 %v3272_v57  ;;  %3410 = vmatmul.mubr.f32.vlgmr.msra.gmra.mrb[46].mxu1 %v3272_v57  ;;  %v3504_v0 = vrot.slane %v3502_v3, 5  ;;  %v7845_v3 = vld [vmem:[#allocation4 + $0x40] ss:$16 sps:$4 sm:$0xff]   ;;  %v7848_v57 = vld [vmem:[#allocation4 + $0x48] ss:$16 sps:$4 sm:$0xff]  }
 0x6c4   :  { %3510 = vmatpush1.bf16.msra.mxu0 %v7812_v14  ;;  %3551 = vmatpush1.bf16.msra.mxu1 %v7815_v35  ;;  %v3505_v33 = vrot.slane %v3503_v45, 4  ;;  %8883 = vst [vmem:[#allocation74_spill] sm:$0xff] %v7845_v3 }
 0x6c5   :  { %3511 = vmatprep.subr.bf16.mxu0 %v7818_v44  ;;  %3552 = vmatprep.subr.bf16.mxu1 %v7821_v62 }
 0x6c6   :  { %3541 = vmatprep.mubr.bf16.mxu0 %v8682_v48  ;;  %3582 = vmatprep.mubr.bf16.mxu1 %v8682_v48  ;;  %v7827_v19 = vsel %vm535_vm2, %v3505_v33, %v3504_v0 }
 0x6c8   :  { %3512 = vmatpush1.bf16.msra.mxu0 %v7829_v42  ;;  %3553 = vmatpush1.bf16.msra.mxu1 %v7832_v23 }
 0x6c9   :  { %3513 = vmatprep.subr.bf16.mxu0 %v7835_v53  ;;  %3554 = vmatprep.subr.bf16.mxu1 %v7838_v30 }
 0x6cb   :  { %v3164_v13 = vpop.f32.mrb[44].mxu0  ;;  %v3235_v36 = vpop.f32.mrb[44].mxu1 }
 0x6cc   :  { %3514 = vmatpush1.bf16.msra.mxu0 %v7845_v3  ;;  %3555 = vmatpush1.bf16.msra.mxu1 %v7848_v57  ;;  %v3240_v45 = vadd.f32 %v3164_v13, %v3051_v18  ;;  %v3242_v0 = vadd.f32 %v3235_v36, %v3092_v47  ;;  %v3166_v33 = vpop.f32.mrb[45].mxu0  ;;  %v3237_v6 = vpop.f32.mrb[45].mxu1  ;;  %v7860_v18 = vld [vmem:[#allocation4 + $0x68] ss:$16 sps:$4 sm:$0xff]   ;;  %v7863_v47 = vld [vmem:[#allocation4 + $0x84] ss:$16 sps:$4 sm:$0xff]  }
 0x6cd   :  { %3515 = vmatprep.subr.bf16.mxu0 %v7851_v27  ;;  %3556 = vmatprep.subr.bf16.mxu1 %v7854_v24  ;;  %v3241_v37 = vadd.f32 %v3166_v33, %v3053_v41  ;;  %v3243_v39 = vadd.f32 %v3237_v6, %v3094_v26  ;;  %v7866_v13 = vld [vmem:[#allocation4 + $0x8c] ss:$16 sps:$4 sm:$0xff]   ;;  %v7869_v41 = vld [vmem:[#allocation4 + $0x80] ss:$16 sps:$4 sm:$0xff]   ;;  %v7875_v26 = vld [vmem:[#allocation4 + $0xa4] ss:$16 sps:$4 sm:$0xff]  }
 0x6ce   :  { %v4840_v10 = vmul.f32 -1.442695, %v3240_v45  ;;  %8884 = vst [vmem:[#allocation75_spill] sm:$0xff] %v7869_v41  ;;  %8886 = vst [vmem:[#allocation77_spill] sm:$0xff] %v7875_v26  ;;  %v7878_v36 = vld [vmem:[#allocation4 + $0xac] ss:$16 sps:$4 sm:$0xff]  }
 0x6cf   :  { %v4841_v3 = vmul.f32 -1.442695, %v3241_v37  ;;  %8887 = vst [vmem:[#allocation78_spill] sm:$0xff] %v7878_v36  ;;  %v7881_v45 = vld [vmem:[#allocation4 + $0xa0] ss:$16 sps:$4 sm:$0xff]  }
 0x6d0   :  { %6301 = vpow2.f32 %v4840_v10  ;;  %3516 = vmatpush1.bf16.msra.mxu0 %v7857_v51  ;;  %3557 = vmatpush1.bf16.msra.mxu1 %v7860_v18  ;;  %v7872_v10 = vld [vmem:[#allocation4 + $0x88] ss:$16 sps:$4 sm:$0xff]   ;;  %8888 = vst [vmem:[#allocation79_spill] sm:$0xff] %v7881_v45  ;;  %v7887_v33 = vld [vmem:[#allocation4 + $0xc4] ss:$16 sps:$4 sm:$0xff]  }
 0x6d1   :  { %3517 = vmatprep.subr.bf16.mxu0 %v7863_v47  ;;  %3558 = vmatprep.subr.bf16.mxu1 %v7866_v13  ;;  %6303 = vpow2.f32 %v4841_v3  ;;  %8885 = vst [vmem:[#allocation76_spill] sm:$0xff] %v7872_v10  ;;  %v7884_v3 = vld [vmem:[#allocation4 + $0xa8] ss:$16 sps:$4 sm:$0xff]   ;;  %8890 = vst [vmem:[#allocation81_spill] sm:$0xff] %v7887_v33  ;;  %v7890_v6 = vld [vmem:[#allocation4 + $0xcc] ss:$16 sps:$4 sm:$0xff]  }
 0x6d2   :  { %8889 = vst [vmem:[#allocation80_spill] sm:$0xff] %v7884_v3  ;;  %6305 = vtanh.f32 %v3243_v39  ;;  %v7905_v39 = vld [vmem:[#allocation4 + $0xe0] ss:$16 sps:$4 sm:$0xff]  }
 0x6d4   :  { %3518 = vmatpush1.bf16.msra.mxu0 %v7869_v41  ;;  %3559 = vmatpush1.bf16.msra.mxu1 %v7872_v10  ;;  %v7899_v41 = vld [vmem:[#allocation4 + $0xe4] ss:$16 sps:$4 sm:$0xff]  }
 0x6d5   :  { %3519 = vmatprep.subr.bf16.mxu0 %v7875_v26  ;;  %3560 = vmatprep.subr.bf16.mxu1 %v7878_v36  ;;  %v7893_v36 = vld [vmem:[#allocation4 + $0xc0] ss:$16 sps:$4 sm:$0xff]  }
 0x6d8   :  { %3520 = vmatpush1.bf16.msra.mxu0 %v7881_v45  ;;  %3561 = vmatpush1.bf16.msra.mxu1 %v7884_v3  ;;  %v7896_v45 = vld [vmem:[#allocation4 + $0xc8] ss:$16 sps:$4 sm:$0xff]  }
 0x6d9   :  { %3521 = vmatprep.subr.bf16.mxu0 %v7887_v33  ;;  %3562 = vmatprep.subr.bf16.mxu1 %v7890_v6  ;;  %8891 = vst [vmem:[#allocation82_spill] sm:$0xff] %v7896_v45  ;;  %v7902_v33 = vld [vmem:[#allocation4 + $0xec] ss:$16 sps:$4 sm:$0xff]  }
 0x6da   :  { %v6302_v37 = vpop.eup %6301 }
 0x6db   :  { %v3253_v26 = vadd.f32 1.0, %v6302_v37  ;;  %v6304_v10 = vpop.eup %6303  ;;  %v7908_v37 = vld [vmem:[#allocation4 + $0xe8] ss:$16 sps:$4 sm:$0xff]  }
 0x6dc   :  { %3522 = vmatpush1.bf16.msra.mxu0 %v7893_v36  ;;  %3563 = vmatpush1.bf16.msra.mxu1 %v7896_v45  ;;  %v3254_v3 = vadd.f32 1.0, %v6304_v10  ;;  %v4842_v45 = vmul.f32 -1.442695, %v3242_v0  ;;  %v3507_v10 = vpack.c.b16 %v7827_v19, %v7827_v19 }
 0x6dd   :  { %6307 = vrcp.f32 %v3253_v26  ;;  %3523 = vmatprep.subr.bf16.mxu0 %v7899_v41  ;;  %3564 = vmatprep.subr.bf16.mxu1 %v7902_v33  ;;  %v6306_v26 = vpop.eup %6305 }
 0x6de   :  { %6309 = vrcp.f32 %v3254_v3 }
 0x6df   :  { %6311 = vpow2.f32 %v4842_v45 }
 0x6e0   :  { %3524 = vmatpush1.bf16.msra.mxu0 %v7905_v39  ;;  %3565 = vmatpush1.bf16.msra.mxu1 %v7908_v37 }
 0x6e1   :  { %5710 = vmatprep.subr.bf16.mxu0 %v8645_v4  ;;  %5742 = vmatprep.subr.bf16.mxu1 %v8646_v7 }
 0x6e3   :  { %3542 = vmatmul.mubr.bf16.vlgmr.msra.gmra.mrb[48].mxu0 %v3507_v10  ;;  %3583 = vmatmul.mubr.bf16.vlgmr.msra.gmra.mrb[48].mxu1 %v3507_v10 }
 0x6e4   :  { %5712 = vmatpush1.bf16.msra.mxu0 %v8810_v25  ;;  %5744 = vmatpush1.bf16.msra.mxu1 %v8811_v46 }
 0x6e5   :  { %5714 = vmatprep.subr.bf16.mxu0 %v8812_v43  ;;  %5746 = vmatprep.subr.bf16.mxu1 %v8813_v61 }
 0x6e6   :  { %3655 = vmatprep.mubr.f32.mxu0 %v8814_v12  ;;  %3726 = vmatprep.mubr.f32.mxu1 %v8814_v12 }
 0x6e7   :  { %v6308_v19 = vpop.eup %6307 }
 0x6e8   :  { %v3264_v0 = vmul.f32 %v6308_v19, %v6306_v26  ;;  %5716 = vmatpush1.bf16.msra.mxu0 %v8815_v38  ;;  %5748 = vmatpush1.bf16.msra.mxu1 %v8816_v56  ;;  %v6310_v3 = vpop.eup %6309 }
 0x6e9   :  { %5718 = vmatprep.subr.bf16.mxu0 %v8817_v54  ;;  %5750 = vmatprep.subr.bf16.mxu1 %v8818_v49  ;;  %v3263_v45 = vmul.f32 %v6310_v3, %v7730_v40  ;;  %v6312_v26 = vpop.eup %6311  ;;  %v8892_v3 = vld [vmem:[#allocation116_spill] sm:$0xff] }
 0x6ea   :  { %v3255_v40 = vadd.f32 1.0, %v6312_v26 }
 0x6eb   :  { %v7926_v10 = vadd.f32 %v3264_v0, %v3263_v45  ;;  %v8893_v45 = vld [vmem:[#allocation117_spill] sm:$0xff] }
 0x6ec   :  { %5720 = vmatpush1.bf16.msra.mxu0 %v8820_v60  ;;  %5752 = vmatpush1.bf16.msra.mxu1 %v8821_v63 }
 0x6ed   :  { %5722 = vmatprep.subr.bf16.mxu0 %v8822_v17  ;;  %5754 = vmatprep.subr.bf16.mxu1 %v8823_v16  ;;  %6313 = vtanh.f32 %v7926_v10 }
 0x6ee   :  { %6315 = vrcp.f32 %v3255_v40  ;;  %v8894_v40 = vld [vmem:[#allocation14_spill] sm:$0xff] }
 0x6f0   :  { %5724 = vmatpush1.bf16.msra.mxu0 %v8824_v22  ;;  %5756 = vmatpush1.bf16.msra.mxu1 %v8825_v11  ;;  %v8931_v22 = vld [vmem:[#allocation50_spill] sm:$0xff] }
 0x6f1   :  { %5726 = vmatprep.subr.bf16.mxu0 %v8826_v15  ;;  %5758 = vmatprep.subr.bf16.mxu1 %v8827_v9 }
 0x6f4   :  { %5728 = vmatpush1.bf16.msra.mxu0 %v8828_v50  ;;  %5760 = vmatpush1.bf16.msra.mxu1 %v8829_v5  ;;  %v8930_v5 = vld [vmem:[#allocation49_spill] sm:$0xff] }
 0x6f5   :  { %5730 = vmatprep.subr.bf16.mxu0 %v8830_v32  ;;  %5762 = vmatprep.subr.bf16.mxu1 %v8831_v2  ;;  %v8928_v2 = vld [vmem:[#allocation48_spill] sm:$0xff]  ;;  %v8929_v32 = vld [vmem:[#allocation47_spill] sm:$0xff] }
 0x6f7   :  { %v6314_v19 = vpop.eup %6313 }
 0x6f8   :  { %5732 = vmatpush1.bf16.msra.mxu0 %v8832_v59  ;;  %5764 = vmatpush1.bf16.msra.mxu1 %v8833_v31  ;;  %v6316_v0 = vpop.eup %6315 }
 0x6f9   :  { %5734 = vmatprep.subr.bf16.mxu0 %v8834_v1  ;;  %5766 = vmatprep.subr.bf16.mxu1 %v8835_v8  ;;  %v3267_v26 = vmul.f32 %v6316_v0, %v6314_v19  ;;  %v8895_v1 = vld [vmem:[#allocation15_spill] sm:$0xff]  ;;  %v8901_v19 = vld [vmem:[#allocation22_spill] sm:$0xff]  ;;  %v8902_v0 = vld [vmem:[#allocation21_spill] sm:$0xff] }
 0x6fc   :  { %5736 = vmatpush1.bf16.msra.mxu0 %v8836_v29  ;;  %5768 = vmatpush1.bf16.msra.mxu1 %v8837_v58  ;;  %v8896_v29 = vld [vmem:[#allocation16_spill] sm:$0xff]  ;;  %v8897_v58 = vld [vmem:[#allocation18_spill] sm:$0xff] }
 0x6fd   :  { %5738 = vmatprep.subr.bf16.mxu0 %v8838_v55  ;;  %5770 = vmatprep.subr.bf16.mxu1 %v8839_v34  ;;  %v8898_v55 = vld [vmem:[#allocation17_spill] sm:$0xff]  ;;  %v8899_v34 = vld [vmem:[#allocation19_spill] sm:$0xff] }
 0x700   :  { %5740 = vmatpush1.bf16.msra.mxu0 %v8892_v3  ;;  %5772 = vmatpush1.bf16.msra.mxu1 %v8893_v45  ;;  %v8900_v45 = vld [vmem:[#allocation20_spill] sm:$0xff]  ;;  %v8910_v3 = vld [vmem:[#allocation29_spill] sm:$0xff] }
 0x701   :  { %5774 = vmatprep.subr.bf16.mxu0 %v8894_v40  ;;  %5806 = vmatprep.subr.bf16.mxu1 %v8895_v1  ;;  %v8903_v1 = vld [vmem:[#allocation23_spill] sm:$0xff]  ;;  %v8909_v40 = vld [vmem:[#allocation30_spill] sm:$0xff] }
 0x703   :  { %3656 = vmatmul.mubr.f32.vlgmr.msra.gmra.mrb[52].mxu0 %v3267_v26  ;;  %3727 = vmatmul.mubr.f32.vlgmr.msra.gmra.mrb[52].mxu1 %v3267_v26  ;;  %v8904_v26 = vld [vmem:[#allocation24_spill] sm:$0xff] }
 0x704   :  { %5776 = vmatpush1.bf16.msra.mxu0 %v8896_v29  ;;  %5808 = vmatpush1.bf16.msra.mxu1 %v8897_v58  ;;  %v8905_v29 = vld [vmem:[#allocation26_spill] sm:$0xff]  ;;  %v8906_v58 = vld [vmem:[#allocation25_spill] sm:$0xff] }
 0x705   :  { %5778 = vmatprep.subr.bf16.mxu0 %v8898_v55  ;;  %5810 = vmatprep.subr.bf16.mxu1 %v8899_v34  ;;  %v8907_v55 = vld [vmem:[#allocation27_spill] sm:$0xff]  ;;  %v8908_v34 = vld [vmem:[#allocation28_spill] sm:$0xff] }
 0x706   :  { %3831 = vmatprep.mubr.f32.mxu0 %v8814_v12  ;;  %3902 = vmatprep.mubr.f32.mxu1 %v8814_v12 }
 0x708   :  { %5780 = vmatpush1.bf16.msra.mxu0 %v8900_v45  ;;  %5812 = vmatpush1.bf16.msra.mxu1 %v8901_v19  ;;  %v8911_v45 = vld [vmem:[#allocation31_spill] sm:$0xff]  ;;  %v8912_v19 = vld [vmem:[#allocation32_spill] sm:$0xff] }
 0x709   :  { %5782 = vmatprep.subr.bf16.mxu0 %v8902_v0  ;;  %5814 = vmatprep.subr.bf16.mxu1 %v8903_v1  ;;  %v8913_v0 = vld [vmem:[#allocation34_spill] sm:$0xff]  ;;  %v8914_v1 = vld [vmem:[#allocation33_spill] sm:$0xff] }
 0x70c   :  { %5784 = vmatpush1.bf16.msra.mxu0 %v8904_v26  ;;  %5816 = vmatpush1.bf16.msra.mxu1 %v8905_v29  ;;  %v8915_v26 = vld [vmem:[#allocation35_spill] sm:$0xff]  ;;  %v8916_v29 = vld [vmem:[#allocation36_spill] sm:$0xff] }
 0x70d   :  { %5786 = vmatprep.subr.bf16.mxu0 %v8906_v58  ;;  %5818 = vmatprep.subr.bf16.mxu1 %v8907_v55  ;;  %v8917_v58 = vld [vmem:[#allocation38_spill] sm:$0xff]  ;;  %v8918_v55 = vld [vmem:[#allocation37_spill] sm:$0xff] }
 0x710   :  { %5788 = vmatpush1.bf16.msra.mxu0 %v8908_v34  ;;  %5820 = vmatpush1.bf16.msra.mxu1 %v8909_v40  ;;  %v8919_v34 = vld [vmem:[#allocation39_spill] sm:$0xff]  ;;  %v8920_v40 = vld [vmem:[#allocation40_spill] sm:$0xff] }
 0x711   :  { %5790 = vmatprep.subr.bf16.mxu0 %v8910_v3  ;;  %5822 = vmatprep.subr.bf16.mxu1 %v8911_v45  ;;  %v8921_v3 = vld [vmem:[#allocation42_spill] sm:$0xff]  ;;  %v8922_v45 = vld [vmem:[#allocation41_spill] sm:$0xff] }
 0x714   :  { %5792 = vmatpush1.bf16.msra.mxu0 %v8912_v19  ;;  %5824 = vmatpush1.bf16.msra.mxu1 %v8913_v0  ;;  %v8923_v19 = vld [vmem:[#allocation43_spill] sm:$0xff]  ;;  %v8924_v0 = vld [vmem:[#allocation44_spill] sm:$0xff] }
 0x715   :  { %5794 = vmatprep.subr.bf16.mxu0 %v8914_v1  ;;  %5826 = vmatprep.subr.bf16.mxu1 %v8915_v26  ;;  %v8925_v1 = vld [vmem:[#allocation45_spill] sm:$0xff]  ;;  %v8926_v26 = vld [vmem:[#allocation72_spill] sm:$0xff] }
 0x718   :  { %5796 = vmatpush1.bf16.msra.mxu0 %v8916_v29  ;;  %5828 = vmatpush1.bf16.msra.mxu1 %v8917_v58  ;;  %v8927_v29 = vld [vmem:[#allocation73_spill] sm:$0xff] }
 0x719   :  { %5798 = vmatprep.subr.bf16.mxu0 %v8918_v55  ;;  %5830 = vmatprep.subr.bf16.mxu1 %v8919_v34 }
 0x71c   :  { %5800 = vmatpush1.bf16.msra.mxu0 %v8920_v40  ;;  %5832 = vmatpush1.bf16.msra.mxu1 %v8921_v3 }
 0x71d   :  { %5802 = vmatprep.subr.bf16.mxu0 %v8922_v45  ;;  %5834 = vmatprep.subr.bf16.mxu1 %v8923_v19 }
 0x720   :  { %5804 = vmatpush1.bf16.msra.mxu0 %v8924_v0  ;;  %5836 = vmatpush1.bf16.msra.mxu1 %v8925_v1 }
 0x721   :  { %4002 = vmatprep.subr.bf16.mxu0 %v8926_v26  ;;  %4043 = vmatprep.subr.bf16.mxu1 %v8927_v29 }
 0x796   :  { %v3340_v58 = vpop.f32.mrb[46].mxu0  ;;  %v3411_v55 = vpop.f32.mrb[46].mxu1 }
 0x797   :  { %v3420_v8 = vrot.slane %v3340_v58, 2  ;;  %v3424_v34 = vrot.slane %v3340_v58, 3  ;;  %v3342_v31 = vpop.f32.mrb[47].mxu0  ;;  %v3413_v40 = vpop.f32.mrb[47].mxu1  ;;  %v3422_v9 = vrot.slane %v3411_v55, 2  ;;  %v3426_v29 = vrot.slane %v3411_v55, 3 }
 0x798   :  { %v3421_v59 = vrot.slane %v3342_v31, 2  ;;  %v3425_v3 = vrot.slane %v3342_v31, 3  ;;  %v3423_v11 = vrot.slane %v3413_v40, 2  ;;  %v8932_v31 = vld [vmem:[#allocation51_spill] sm:$0xff] }
 0x799   :  { %v3436_v45 = vadd.f32 %v3420_v8, %v8728_v28  ;;  %v3440_v19 = vadd.f32 %v3424_v34, %v8928_v2  ;;  %v3438_v16 = vadd.f32 %v3422_v9, %v8931_v22  ;;  %v3442_v17 = vadd.f32 %v3426_v29, %v8932_v31  ;;  %v8933_v34 = vld [vmem:[#allocation52_spill] sm:$0xff] }
 0x79a   :  { %v3437_v0 = vadd.f32 %v3421_v59, %v8929_v32  ;;  %v3441_v1 = vadd.f32 %v3425_v3, %v8930_v5  ;;  %v3427_v8 = vrot.slane %v3413_v40, 3  ;;  %v3439_v59 = vadd.f32 %v3423_v11, %v8933_v34 }
 0x79b   :  { %v4843_v50 = vmul.f32 -1.442695, %v3436_v45  ;;  %v4846_v26 = vmul.f32 -1.442695, %v3440_v19  ;;  %v4845_v32 = vmul.f32 -1.442695, %v3438_v16 }
 0x79c   :  { %v4844_v15 = vmul.f32 -1.442695, %v3437_v0  ;;  %v4847_v58 = vmul.f32 -1.442695, %v3441_v1  ;;  %v4848_v3 = vmul.f32 -1.442695, %v3442_v17 }
 0x79d   :  { %6317 = vpow2.f32 %v4843_v50  ;;  %v8934_v45 = vld [vmem:[#allocation53_spill] sm:$0xff] }
 0x79e   :  { %6319 = vpow2.f32 %v4846_v26  ;;  %v3443_v19 = vadd.f32 %v3427_v8, %v8934_v45 }
 0x79f   :  { %6321 = vpow2.f32 %v4844_v15 }
 0x7a0   :  { %6323 = vpow2.f32 %v4847_v58 }
 0x7a1   :  { %6325 = vtanh.f32 %v3439_v59 }
 0x7a2   :  { %6327 = vpow2.f32 %v4845_v32 }
 0x7a3   :  { %6329 = vpow2.f32 %v4848_v3 }
 0x7a4   :  { %6331 = vtanh.f32 %v3443_v19  ;;  %v3484_v19 = vrot.slane %v7805_v52, 7 }
 0x7a7   :  { %v6318_v55 = vpop.eup %6317 }
 0x7a8   :  { %v6320_v50 = vpop.eup %6319  ;;  %v3462_v26 = vadd.f32 1.0, %v6318_v55 }
 0x7a9   :  { %v3465_v0 = vadd.f32 1.0, %v6320_v50  ;;  %v6322_v9 = vpop.eup %6321 }
 0x7aa   :  { %6333 = vrcp.f32 %v3462_v26  ;;  %v6324_v15 = vpop.eup %6323  ;;  %v3463_v29 = vadd.f32 1.0, %v6322_v9  ;;  %v3485_v9 = vrot.slane %v7807_v21, 7 }
 0x7ab   :  { %6335 = vrcp.f32 %v3465_v0  ;;  %v3466_v40 = vadd.f32 1.0, %v6324_v15  ;;  %v6326_v16 = vpop.eup %6325 }
 0x7ac   :  { %6337 = vrcp.f32 %v3463_v29  ;;  %v6328_v17 = vpop.eup %6327 }
 0x7ad   :  { %6339 = vrcp.f32 %v3466_v40  ;;  %v6330_v11 = vpop.eup %6329  ;;  %v3464_v50 = vadd.f32 1.0, %v6328_v17 }
 0x7ae   :  { %v6332_v1 = vpop.eup %6331  ;;  %v3467_v15 = vadd.f32 1.0, %v6330_v11 }
 0x7af   :  { %6341 = vrcp.f32 %v3464_v50 }
 0x7b0   :  { %6343 = vrcp.f32 %v3467_v15 }
 0x7b4   :  { %v6334_v58 = vpop.eup %6333 }
 0x7b5   :  { %v6336_v8 = vpop.eup %6335  ;;  %v3490_v32 = vmul.f32 %v6334_v58, %v6326_v16 }
 0x7b6   :  { %v3491_v59 = vmul.f32 %v6336_v8, %v6332_v1  ;;  %v3543_v55 = vpop.f32.mrb[48].mxu0  ;;  %v3584_v3 = vpop.f32.mrb[48].mxu1 }
 0x7b7   :  { %v3545_v26 = vpop.f32.mrb[49].mxu0  ;;  %v3586_v0 = vpop.f32.mrb[49].mxu1 }
 0x7b8   :  { %v6338_v45 = vpop.eup %6337  ;;  %v3547_v29 = vpop.f32.mrb[50].mxu0 }
 0x7b9   :  { %v3588_v40 = vpop.f32.mrb[50].mxu1  ;;  %v6340_v34 = vpop.eup %6339  ;;  %v3488_v31 = vmul.f32 %v6338_v45, %v3484_v19  ;;  %v3585_v29 = vadd.f32 %v3584_v3, %v7228_v20 }
 0x7ba   :  { %v3548_v22 = vpop.f32.mrb[51].mxu0  ;;  %v3589_v5 = vpop.f32.mrb[51].mxu1  ;;  %v3489_v2 = vmul.f32 %v6340_v34, %v3485_v9  ;;  %v8935_v9 = vld [vmem:[#allocation56_spill] sm:$0xff]  ;;  %v8936_v40 = vld [vmem:[#allocation57_spill] sm:$0xff] }
 0x7bb   :  { %v7997_v16 = vadd.f32 %v3490_v32, %v3488_v31  ;;  %v6342_v52 = vpop.eup %6341  ;;  %v3544_v15 = vadd.f32 %v3543_v55, %v8935_v9 }
 0x7bc   :  { %v7999_v1 = vadd.f32 %v3491_v59, %v3489_v2  ;;  %v6344_v21 = vpop.eup %6343 }
 0x7bd   :  { %6345 = vtanh.f32 %v7997_v16 }
 0x7be   :  { %6347 = vtanh.f32 %v7999_v1 }
 0x7c7   :  { %v6346_v17 = vpop.eup %6345 }
 0x7c8   :  { %v6348_v11 = vpop.eup %6347  ;;  %v3496_v58 = vmul.f32 %v6346_v17, %v6342_v52  ;;  %v3546_v52 = vadd.f32 %v3545_v26, %v8936_v40 }
 0x7c9   :  { %v3497_v8 = vmul.f32 %v6348_v11, %v6344_v21  ;;  %v8937_v21 = vld [vmem:[#allocation58_spill] sm:$0xff] }
 0x7ca   :  { %v3763_v45 = vrot.slane %v3496_v58, 6  ;;  %v3991_v22 = vpack.c.bf16 %v3496_v58, %v3496_v58  ;;  %v3587_v17 = vadd.f32 %v3586_v0, %v8937_v21  ;;  %v8939_v0 = vld [vmem:[#allocation75_spill] sm:$0xff] }
 0x7cb   :  { %v3764_v5 = vrot.slane %v3497_v8, 5  ;;  %v3992_v34 = vpack.c.bf16 %v3497_v8, %v3497_v8  ;;  %v8938_v8 = vld [vmem:[#allocation74_spill] sm:$0xff] }
 0x7cc   :  { %v3995_v19 = vunpack.c.l.b16 %v3991_v22 }
 0x7cd   :  { %v3765_v31 = vsel %vm535_vm2, %v3764_v5, %v3763_v45  ;;  %v3996_v32 = vunpack.c.l.b16 %v3992_v34 }
 0x7ce   :  { %3832 = vmatmul.mubr.f32.vlgmr.msra.gmra.mrb[54].mxu0 %v3765_v31  ;;  %3903 = vmatmul.mubr.f32.vlgmr.msra.gmra.mrb[54].mxu1 %v3765_v31  ;;  %v3997_v2 = vrot.slane %v3995_v19, 6  ;;  %v8940_v31 = vld [vmem:[#allocation76_spill] sm:$0xff] }
 0x7cf   :  { %4003 = vmatpush1.bf16.msra.mxu0 %v7812_v14  ;;  %4044 = vmatpush1.bf16.msra.mxu1 %v7815_v35  ;;  %v3998_v59 = vrot.slane %v3996_v32, 5  ;;  %v8941_v32 = vld [vmem:[#allocation77_spill] sm:$0xff] }
 0x7d0   :  { %4004 = vmatprep.subr.bf16.mxu0 %v7818_v44  ;;  %4045 = vmatprep.subr.bf16.mxu1 %v7821_v62 }
 0x7d1   :  { %4034 = vmatprep.mubr.bf16.mxu0 %v8682_v48  ;;  %4075 = vmatprep.mubr.bf16.mxu1 %v8682_v48  ;;  %v3999_v50 = vsel %vm535_vm2, %v3998_v59, %v3997_v2  ;;  %v8942_v2 = vld [vmem:[#allocation78_spill] sm:$0xff]  ;;  %v8943_v59 = vld [vmem:[#allocation79_spill] sm:$0xff] }
 0x7d3   :  { %4005 = vmatpush1.bf16.msra.mxu0 %v7829_v42  ;;  %4046 = vmatpush1.bf16.msra.mxu1 %v7832_v23 }
 0x7d4   :  { %4006 = vmatprep.subr.bf16.mxu0 %v7835_v53  ;;  %4047 = vmatprep.subr.bf16.mxu1 %v7838_v30 }
 0x7d6   :  { %v3657_v11 = vpop.f32.mrb[52].mxu0  ;;  %v3728_v58 = vpop.f32.mrb[52].mxu1 }
 0x7d7   :  { %4007 = vmatpush1.bf16.msra.mxu0 %v8938_v8  ;;  %4048 = vmatpush1.bf16.msra.mxu1 %v7848_v57  ;;  %v3733_v45 = vadd.f32 %v3657_v11, %v3544_v15  ;;  %v3735_v22 = vadd.f32 %v3728_v58, %v3585_v29  ;;  %v3659_v5 = vpop.f32.mrb[53].mxu0  ;;  %v3730_v34 = vpop.f32.mrb[53].mxu1  ;;  %v8944_v15 = vld [vmem:[#allocation80_spill] sm:$0xff]  ;;  %v8945_v29 = vld [vmem:[#allocation81_spill] sm:$0xff]  ;;  %v8946_v58 = vld [vmem:[#allocation82_spill] sm:$0xff] }
 0x7d8   :  { %4008 = vmatprep.subr.bf16.mxu0 %v7851_v27  ;;  %4049 = vmatprep.subr.bf16.mxu1 %v7854_v24  ;;  %v3734_v55 = vadd.f32 %v3659_v5, %v3546_v52  ;;  %v3736_v3 = vadd.f32 %v3730_v34, %v3587_v17  ;;  %v4000_v34 = vpack.c.b16 %v3999_v50, %v3999_v50 }
 0x7d9   :  { %v4849_v19 = vmul.f32 -1.442695, %v3733_v45  ;;  %v4851_v5 = vmul.f32 -1.442695, %v3735_v22 }
 0x7da   :  { %v4850_v26 = vmul.f32 -1.442695, %v3734_v55 }
 0x7db   :  { %6349 = vpow2.f32 %v4849_v19  ;;  %4009 = vmatpush1.bf16.msra.mxu0 %v7857_v51  ;;  %4050 = vmatpush1.bf16.msra.mxu1 %v7860_v18 }
 0x7dc   :  { %4010 = vmatprep.subr.bf16.mxu0 %v7863_v47  ;;  %4051 = vmatprep.subr.bf16.mxu1 %v7866_v13  ;;  %6351 = vpow2.f32 %v4850_v26 }
 0x7dd   :  { %6353 = vtanh.f32 %v3736_v3 }
 0x7df   :  { %4011 = vmatpush1.bf16.msra.mxu0 %v8939_v0  ;;  %4052 = vmatpush1.bf16.msra.mxu1 %v8940_v31 }
 0x7e0   :  { %4012 = vmatprep.subr.bf16.mxu0 %v8941_v32  ;;  %4053 = vmatprep.subr.bf16.mxu1 %v8942_v2 }
 0x7e3   :  { %4013 = vmatpush1.bf16.msra.mxu0 %v8943_v59  ;;  %4054 = vmatpush1.bf16.msra.mxu1 %v8944_v15 }
 0x7e4   :  { %4014 = vmatprep.subr.bf16.mxu0 %v8945_v29  ;;  %4055 = vmatprep.subr.bf16.mxu1 %v7890_v6 }
 0x7e5   :  { %v6350_v52 = vpop.eup %6349 }
 0x7e6   :  { %v3746_v17 = vadd.f32 1.0, %v6350_v52  ;;  %v6352_v11 = vpop.eup %6351  ;;  %v8948_v52 = vld [vmem:[#allocation98_spill] sm:$0xff] }
 0x7e7   :  { %4015 = vmatpush1.bf16.msra.mxu0 %v7893_v36  ;;  %4056 = vmatpush1.bf16.msra.mxu1 %v8946_v58  ;;  %v3747_v45 = vadd.f32 1.0, %v6352_v11  ;;  %v6354_v55 = vpop.eup %6353 }
 0x7e8   :  { %6355 = vrcp.f32 %v3746_v17  ;;  %4016 = vmatprep.subr.bf16.mxu0 %v7899_v41  ;;  %4057 = vmatprep.subr.bf16.mxu1 %v7902_v33  ;;  %v8949_v17 = vld [vmem:[#allocation99_spill] sm:$0xff] }
 0x7e9   :  { %6357 = vrcp.f32 %v3747_v45  ;;  %v8950_v45 = vld [vmem:[#allocation100_spill] sm:$0xff] }
 0x7ea   :  { %6359 = vpow2.f32 %v4851_v5  ;;  %v8951_v5 = vld [vmem:[#allocation101_spill] sm:$0xff] }
 0x7eb   :  { %4017 = vmatpush1.bf16.msra.mxu0 %v7905_v39  ;;  %4058 = vmatpush1.bf16.msra.mxu1 %v7908_v37 }
 0x7ec   :  { %5838 = vmatprep.subr.bf16.mxu0 %v8645_v4  ;;  %5870 = vmatprep.subr.bf16.mxu1 %v8646_v7 }
 0x7ee   :  { %4035 = vmatmul.mubr.bf16.vlgmr.msra.gmra.mrb[56].mxu0 %v4000_v34  ;;  %4076 = vmatmul.mubr.bf16.vlgmr.msra.gmra.mrb[56].mxu1 %v4000_v34  ;;  %v8952_v34 = vld [vmem:[#allocation102_spill] sm:$0xff] }
 0x7ef   :  { %5840 = vmatpush1.bf16.msra.mxu0 %v8810_v25  ;;  %5872 = vmatpush1.bf16.msra.mxu1 %v8811_v46 }
 0x7f0   :  { %5842 = vmatprep.subr.bf16.mxu0 %v8812_v43  ;;  %5874 = vmatprep.subr.bf16.mxu1 %v8813_v61 }
 0x7f1   :  { %4148 = vmatprep.mubr.f32.mxu0 %v8814_v12  ;;  %4219 = vmatprep.mubr.f32.mxu1 %v8814_v12 }
 0x7f2   :  { %v6356_v50 = vpop.eup %6355 }
 0x7f3   :  { %v3757_v22 = vmul.f32 %v6356_v50, %v6354_v55  ;;  %5844 = vmatpush1.bf16.msra.mxu0 %v8815_v38  ;;  %5876 = vmatpush1.bf16.msra.mxu1 %v8816_v56  ;;  %v6358_v3 = vpop.eup %6357  ;;  %v8953_v55 = vld [vmem:[#allocation103_spill] sm:$0xff]  ;;  %v8954_v50 = vld [vmem:[#allocation104_spill] sm:$0xff] }
 0x7f4   :  { %5846 = vmatprep.subr.bf16.mxu0 %v8817_v54  ;;  %5878 = vmatprep.subr.bf16.mxu1 %v8818_v49  ;;  %v3756_v19 = vmul.f32 %v6358_v3, %v7926_v10  ;;  %v6360_v11 = vpop.eup %6359  ;;  %v8956_v3 = vld [vmem:[#allocation106_spill] sm:$0xff] }
 0x7f5   :  { %v3748_v10 = vadd.f32 1.0, %v6360_v11  ;;  %v8962_v11 = vld [vmem:[#allocation112_spill] sm:$0xff] }
 0x7f6   :  { %v8054_v26 = vadd.f32 %v3757_v22, %v3756_v19  ;;  %v8955_v22 = vld [vmem:[#allocation105_spill] sm:$0xff]  ;;  %v8957_v19 = vld [vmem:[#allocation107_spill] sm:$0xff] }
 0x7f7   :  { %5848 = vmatpush1.bf16.msra.mxu0 %v8820_v60  ;;  %5880 = vmatpush1.bf16.msra.mxu1 %v8821_v63 }
 0x7f8   :  { %8947 = vst [vmem:[#allocation83_spill] sm:$0xff] %v8054_v26  ;;  %5850 = vmatprep.subr.bf16.mxu0 %v8948_v52  ;;  %5882 = vmatprep.subr.bf16.mxu1 %v8949_v17  ;;  %6361 = vtanh.f32 %v8054_v26  ;;  %v8958_v17 = vld [vmem:[#allocation108_spill] sm:$0xff]  ;;  %v8963_v26 = vld [vmem:[#allocation113_spill] sm:$0xff] }
 0x7f9   :  { %6363 = vrcp.f32 %v3748_v10  ;;  %v8967_v10 = vld [vmem:[#allocation117_spill] sm:$0xff] }
 0x7fb   :  { %5852 = vmatpush1.bf16.msra.mxu0 %v8950_v45  ;;  %5884 = vmatpush1.bf16.msra.mxu1 %v8951_v5  ;;  %v8959_v45 = vld [vmem:[#allocation109_spill] sm:$0xff]  ;;  %v8960_v5 = vld [vmem:[#allocation110_spill] sm:$0xff] }
 0x7fc   :  { %5854 = vmatprep.subr.bf16.mxu0 %v8952_v34  ;;  %5886 = vmatprep.subr.bf16.mxu1 %v8953_v55  ;;  %v8961_v34 = vld [vmem:[#allocation111_spill] sm:$0xff] }
 0x7ff   :  { %5856 = vmatpush1.bf16.msra.mxu0 %v8954_v50  ;;  %5888 = vmatpush1.bf16.msra.mxu1 %v8955_v22  ;;  %v8964_v50 = vld [vmem:[#allocation114_spill] sm:$0xff]  ;;  %v8965_v22 = vld [vmem:[#allocation115_spill] sm:$0xff] }
 0x800   :  { %5858 = vmatprep.subr.bf16.mxu0 %v8956_v3  ;;  %5890 = vmatprep.subr.bf16.mxu1 %v8957_v19  ;;  %v8966_v19 = vld [vmem:[#allocation116_spill] sm:$0xff] }
 0x802   :  { %v6362_v3 = vpop.eup %6361 }
 0x803   :  { %5860 = vmatpush1.bf16.msra.mxu0 %v8958_v17  ;;  %5892 = vmatpush1.bf16.msra.mxu1 %v8959_v45  ;;  %v6364_v55 = vpop.eup %6363  ;;  %v8968_v45 = vld [vmem:[#allocation72_spill] sm:$0xff] }
 0x804   :  { %5862 = vmatprep.subr.bf16.mxu0 %v8960_v5  ;;  %5894 = vmatprep.subr.bf16.mxu1 %v8961_v34  ;;  %v3760_v17 = vmul.f32 %v6364_v55, %v6362_v3  ;;  %v8969_v5 = vld [vmem:[#allocation73_spill] sm:$0xff] }
 0x807   :  { %5864 = vmatpush1.bf16.msra.mxu0 %v8962_v11  ;;  %5896 = vmatpush1.bf16.msra.mxu1 %v8963_v26 }
 0x808   :  { %5866 = vmatprep.subr.bf16.mxu0 %v8964_v50  ;;  %5898 = vmatprep.subr.bf16.mxu1 %v8965_v22 }
 0x80b   :  { %5868 = vmatpush1.bf16.msra.mxu0 %v8966_v19  ;;  %5900 = vmatpush1.bf16.msra.mxu1 %v8967_v10 }
 0x80c   :  { %4265 = vmatprep.subr.bf16.mxu0 %v8968_v45  ;;  %4306 = vmatprep.subr.bf16.mxu1 %v8969_v5 }
 0x80e   :  { %4149 = vmatmul.mubr.f32.vlgmr.msra.gmra.mrb[60].mxu0 %v3760_v17  ;;  %4220 = vmatmul.mubr.f32.vlgmr.msra.gmra.mrb[60].mxu1 %v3760_v17 }
 0x80f   :  { %4266 = vmatpush1.bf16.msra.mxu0 %v7812_v14  ;;  %4307 = vmatpush1.bf16.msra.mxu1 %v7815_v35 }
 0x810   :  { %4267 = vmatprep.subr.bf16.mxu0 %v7818_v44  ;;  %4308 = vmatprep.subr.bf16.mxu1 %v7821_v62 }
 0x811   :  { %4297 = vmatprep.mubr.bf16.mxu0 %v8682_v48  ;;  %4338 = vmatprep.mubr.bf16.mxu1 %v8682_v48 }
 0x813   :  { %4268 = vmatpush1.bf16.msra.mxu0 %v7829_v42  ;;  %4309 = vmatpush1.bf16.msra.mxu1 %v7832_v23 }
 0x814   :  { %4269 = vmatprep.subr.bf16.mxu0 %v7835_v53  ;;  %4310 = vmatprep.subr.bf16.mxu1 %v7838_v30  ;;  %v8970_v53 = vld [vmem:[#allocation48_spill] sm:$0xff] }
 0x817   :  { %4270 = vmatpush1.bf16.msra.mxu0 %v8938_v8  ;;  %4311 = vmatpush1.bf16.msra.mxu1 %v7848_v57  ;;  %v8971_v57 = vld [vmem:[#allocation47_spill] sm:$0xff] }
 0x818   :  { %4271 = vmatprep.subr.bf16.mxu0 %v7851_v27  ;;  %4312 = vmatprep.subr.bf16.mxu1 %v7854_v24  ;;  %v8974_v8 = vld [vmem:[#allocation51_spill] sm:$0xff] }
 0x81b   :  { %4272 = vmatpush1.bf16.msra.mxu0 %v7857_v51  ;;  %4313 = vmatpush1.bf16.msra.mxu1 %v7860_v18  ;;  %v8972_v18 = vld [vmem:[#allocation49_spill] sm:$0xff] }
 0x81c   :  { %4273 = vmatprep.subr.bf16.mxu0 %v7863_v47  ;;  %4314 = vmatprep.subr.bf16.mxu1 %v7866_v13 }
 0x81f   :  { %4274 = vmatpush1.bf16.msra.mxu0 %v8939_v0  ;;  %4315 = vmatpush1.bf16.msra.mxu1 %v8940_v31  ;;  %v8975_v31 = vld [vmem:[#allocation52_spill] sm:$0xff] }
 0x820   :  { %4275 = vmatprep.subr.bf16.mxu0 %v8941_v32  ;;  %4316 = vmatprep.subr.bf16.mxu1 %v8942_v2 }
 0x823   :  { %4276 = vmatpush1.bf16.msra.mxu0 %v8943_v59  ;;  %4317 = vmatpush1.bf16.msra.mxu1 %v8944_v15  ;;  %v8976_v15 = vld [vmem:[#allocation53_spill] sm:$0xff] }
 0x824   :  { %4277 = vmatprep.subr.bf16.mxu0 %v8945_v29  ;;  %4318 = vmatprep.subr.bf16.mxu1 %v7890_v6 }
 0x827   :  { %4278 = vmatpush1.bf16.msra.mxu0 %v7893_v36  ;;  %4319 = vmatpush1.bf16.msra.mxu1 %v8946_v58 }
 0x828   :  { %4279 = vmatprep.subr.bf16.mxu0 %v7899_v41  ;;  %4320 = vmatprep.subr.bf16.mxu1 %v7902_v33 }
 0x82b   :  { %4280 = vmatpush1.bf16.msra.mxu0 %v7905_v39  ;;  %4321 = vmatpush1.bf16.msra.mxu1 %v7908_v37  ;;  %v8973_v39 = vld [vmem:[#allocation50_spill] sm:$0xff] }
 0x82c   :  { %5902 = vmatprep.subr.bf16.mxu0 %v8645_v4  ;;  %5934 = vmatprep.subr.bf16.mxu1 %v8646_v7 }
 0x8a1   :  { %v3833_v48 = vpop.f32.mrb[54].mxu0  ;;  %v3904_v27 = vpop.f32.mrb[54].mxu1 }
 0x8a2   :  { %v3913_v51 = vrot.slane %v3833_v48, 1  ;;  %v3917_v14 = vrot.slane %v3833_v48, 2  ;;  %v3835_v35 = vpop.f32.mrb[55].mxu0  ;;  %v3906_v44 = vpop.f32.mrb[55].mxu1  ;;  %v3915_v41 = vrot.slane %v3904_v27, 1  ;;  %v3919_v7 = vrot.slane %v3904_v27, 2 }
 0x8a3   :  { %v3914_v62 = vrot.slane %v3835_v35, 1  ;;  %v3918_v42 = vrot.slane %v3835_v35, 2  ;;  %v3916_v6 = vrot.slane %v3906_v44, 1 }
 0x8a4   :  { %v3929_v23 = vadd.f32 %v3913_v51, %v8728_v28  ;;  %v3933_v30 = vadd.f32 %v3917_v14, %v8970_v53  ;;  %v3931_v37 = vadd.f32 %v3915_v41, %v8973_v39  ;;  %v3935_v0 = vadd.f32 %v3919_v7, %v8974_v8 }
 0x8a5   :  { %v3930_v24 = vadd.f32 %v3914_v62, %v8971_v57  ;;  %v3934_v47 = vadd.f32 %v3918_v42, %v8972_v18  ;;  %v3920_v28 = vrot.slane %v3906_v44, 2  ;;  %v3932_v32 = vadd.f32 %v3916_v6, %v8975_v31 }
 0x8a6   :  { %v4852_v13 = vmul.f32 -1.442695, %v3929_v23  ;;  %v4855_v4 = vmul.f32 -1.442695, %v3933_v30  ;;  %v4854_v2 = vmul.f32 -1.442695, %v3931_v37 }
 0x8a7   :  { %v4853_v36 = vmul.f32 -1.442695, %v3930_v24  ;;  %v4856_v33 = vmul.f32 -1.442695, %v3934_v47  ;;  %v4857_v59 = vmul.f32 -1.442695, %v3935_v0  ;;  %v3936_v29 = vadd.f32 %v3920_v28, %v8976_v15 }
 0x8a8   :  { %6365 = vpow2.f32 %v4852_v13  ;;  %v3977_v24 = vrot.slane %v7997_v16, 7  ;;  %v3978_v41 = vrot.slane %v7999_v1, 7 }
 0x8a9   :  { %6367 = vpow2.f32 %v4855_v4 }
 0x8aa   :  { %6369 = vpow2.f32 %v4853_v36 }
 0x8ab   :  { %6371 = vpow2.f32 %v4856_v33 }
 0x8ac   :  { %6373 = vtanh.f32 %v3932_v32 }
 0x8ad   :  { %6375 = vpow2.f32 %v4854_v2 }
 0x8ae   :  { %6377 = vpow2.f32 %v4857_v59 }
 0x8af   :  { %6379 = vtanh.f32 %v3936_v29 }
 0x8b2   :  { %v6366_v58 = vpop.eup %6365 }
 0x8b3   :  { %v6368_v17 = vpop.eup %6367  ;;  %v3955_v45 = vadd.f32 1.0, %v6366_v58 }
 0x8b4   :  { %v3958_v5 = vadd.f32 1.0, %v6368_v17  ;;  %v6370_v55 = vpop.eup %6369 }
 0x8b5   :  { %6381 = vrcp.f32 %v3955_v45  ;;  %v6372_v3 = vpop.eup %6371  ;;  %v3956_v48 = vadd.f32 1.0, %v6370_v55 }
 0x8b6   :  { %6383 = vrcp.f32 %v3958_v5  ;;  %v3959_v27 = vadd.f32 1.0, %v6372_v3  ;;  %v6374_v51 = vpop.eup %6373 }
 0x8b7   :  { %6385 = vrcp.f32 %v3956_v48  ;;  %v6376_v14 = vpop.eup %6375 }
 0x8b8   :  { %6387 = vrcp.f32 %v3959_v27  ;;  %v6378_v35 = vpop.eup %6377  ;;  %v3957_v18 = vadd.f32 1.0, %v6376_v14 }
 0x8b9   :  { %v6380_v44 = vpop.eup %6379  ;;  %v3960_v7 = vadd.f32 1.0, %v6378_v35 }
 0x8ba   :  { %6389 = vrcp.f32 %v3957_v18  ;;  %v8981_v18 = vld [vmem:[#allocation103_spill] sm:$0xff] }
 0x8bb   :  { %6391 = vrcp.f32 %v3960_v7  ;;  %v8986_v7 = vld [vmem:[#allocation108_spill] sm:$0xff] }
 0x8bf   :  { %v6382_v62 = vpop.eup %6381 }
 0x8c0   :  { %v6384_v42 = vpop.eup %6383  ;;  %v3983_v23 = vmul.f32 %v6382_v62, %v6374_v51 }
 0x8c1   :  { %v3984_v53 = vmul.f32 %v6384_v42, %v6380_v44  ;;  %v4036_v30 = vpop.f32.mrb[56].mxu0  ;;  %v4077_v57 = vpop.f32.mrb[56].mxu1 }
 0x8c2   :  { %v4038_v47 = vpop.f32.mrb[57].mxu0  ;;  %v4079_v13 = vpop.f32.mrb[57].mxu1  ;;  %v4037_v27 = vadd.f32 %v4036_v30, %v8935_v9  ;;  %v4078_v51 = vadd.f32 %v4077_v57, %v7228_v20 }
 0x8c3   :  { %v6386_v4 = vpop.eup %6385  ;;  %v4040_v36 = vpop.f32.mrb[58].mxu0  ;;  %v4039_v14 = vadd.f32 %v4038_v47, %v8936_v40  ;;  %v4080_v35 = vadd.f32 %v4079_v13, %v8937_v21  ;;  %v8982_v47 = vld [vmem:[#allocation104_spill] sm:$0xff]  ;;  %v8983_v13 = vld [vmem:[#allocation105_spill] sm:$0xff] }
 0x8c4   :  { %v4081_v33 = vpop.f32.mrb[58].mxu1  ;;  %v6388_v6 = vpop.eup %6387  ;;  %v3981_v39 = vmul.f32 %v6386_v4, %v3977_v24  ;;  %v8987_v36 = vld [vmem:[#allocation109_spill] sm:$0xff] }
 0x8c5   :  { %v4041_v37 = vpop.f32.mrb[59].mxu0  ;;  %v4082_v8 = vpop.f32.mrb[59].mxu1  ;;  %v3982_v0 = vmul.f32 %v6388_v6, %v3978_v41  ;;  %v8988_v33 = vld [vmem:[#allocation110_spill] sm:$0xff] }
 0x8c6   :  { %v3985_v28 = vadd.f32 %v3983_v23, %v3981_v39  ;;  %v6390_v16 = vpop.eup %6389 }
 0x8c7   :  { %v3986_v31 = vadd.f32 %v3984_v53, %v3982_v0  ;;  %v6392_v32 = vpop.eup %6391  ;;  %v8989_v0 = vld [vmem:[#allocation83_spill] sm:$0xff] }
 0x8c8   :  { %6393 = vtanh.f32 %v3985_v28 }
 0x8c9   :  { %6395 = vtanh.f32 %v3986_v31  ;;  %v6030_v31 = vld [vmem:[#allocation7 + $0x8] sm:$0xff]  }
 0x8d2   :  { %v6394_v2 = vpop.eup %6393 }
 0x8d3   :  { %v6396_v59 = vpop.eup %6395  ;;  %v3989_v15 = vmul.f32 %v6394_v2, %v6390_v16  ;;  %v6031_v16 = vld [vmem:[#allocation7 + $0x10] sm:$0xff]   ;;  %v6033_v2 = vld [vmem:[#allocation7 + $0x20] sm:$0xff]  }
 0x8d4   :  { %v3990_v1 = vmul.f32 %v6396_v59, %v6392_v32  ;;  %v6032_v32 = vld [vmem:[#allocation7 + $0x18] sm:$0xff]   ;;  %v6034_v59 = vld [vmem:[#allocation7 + $0x28] sm:$0xff]  }
 0x8d5   :  { %v4254_v29 = vpack.c.bf16 %v3989_v15, %v3989_v15  ;;  %v6035_v15 = vld [vmem:[#allocation7 + $0x30] sm:$0xff]  }
 0x8d6   :  { %v4255_v58 = vpack.c.bf16 %v3990_v1, %v3990_v1  ;;  %v6036_v1 = vld [vmem:[#allocation7 + $0x38] sm:$0xff]  }
 0x8d7   :  { %v4258_v17 = vunpack.c.l.b16 %v4254_v29  ;;  %v6037_v29 = vld [vmem:[#allocation9] sm:$0xff]  }
 0x8d8   :  { %v4259_v45 = vunpack.c.l.b16 %v4255_v58  ;;  %v6038_v58 = vld [vmem:[#allocation9 + $0x8] sm:$0xff]  }
 0x8d9   :  { %v4260_v5 = vrot.slane %v4258_v17, 7  ;;  %v6039_v17 = vld [vmem:[#allocation9 + $0x10] sm:$0xff]  }
 0x8da   :  { %v4261_v55 = vrot.slane %v4259_v45, 6  ;;  %v6040_v45 = vld [vmem:[#allocation9 + $0x18] sm:$0xff]  }
 0x8dc   :  { %v4262_v3 = vsel %vm535_vm2, %v4261_v55, %v4260_v5  ;;  %v6041_v5 = vld [vmem:[#allocation9 + $0x20] sm:$0xff]   ;;  %v6042_v55 = vld [vmem:[#allocation9 + $0x28] sm:$0xff]  }
 0x8dd   :  { %v4263_v48 = vpack.c.b16 %v4262_v3, %v4262_v3 }
 0x8df   :  { %4298 = vmatmul.mubr.bf16.vlgmr.msra.gmra.mrb[64].mxu0 %v4263_v48  ;;  %4339 = vmatmul.mubr.bf16.vlgmr.msra.gmra.mrb[64].mxu1 %v4263_v48 }
 0x8e0   :  { %5904 = vmatpush1.bf16.msra.mxu0 %v8810_v25  ;;  %5936 = vmatpush1.bf16.msra.mxu1 %v8811_v46 }
 0x8e1   :  { %v4150_v44 = vpop.f32.mrb[60].mxu0  ;;  %v4221_v62 = vpop.f32.mrb[60].mxu1  ;;  %5906 = vmatprep.subr.bf16.mxu0 %v8812_v43  ;;  %5938 = vmatprep.subr.bf16.mxu1 %v8813_v61  ;;  %v8977_v43 = vld [vmem:[#allocation99_spill] sm:$0xff]  ;;  %v8978_v61 = vld [vmem:[#allocation100_spill] sm:$0xff] }
 0x8e2   :  { %v4226_v42 = vadd.f32 %v4150_v44, %v4037_v27  ;;  %v4228_v23 = vadd.f32 %v4221_v62, %v4078_v51  ;;  %v4152_v53 = vpop.f32.mrb[61].mxu0  ;;  %v4223_v30 = vpop.f32.mrb[61].mxu1  ;;  %4411 = vmatprep.mubr.f32.mxu0 %v8814_v12  ;;  %4482 = vmatprep.mubr.f32.mxu1 %v8814_v12 }
 0x8e3   :  { %v4227_v25 = vadd.f32 %v4152_v53, %v4039_v14  ;;  %v4229_v46 = vadd.f32 %v4223_v30, %v4080_v35 }
 0x8e4   :  { %v4858_v57 = vmul.f32 -1.442695, %v4226_v42  ;;  %5908 = vmatpush1.bf16.msra.mxu0 %v8815_v38  ;;  %5940 = vmatpush1.bf16.msra.mxu1 %v8816_v56  ;;  %v8979_v38 = vld [vmem:[#allocation101_spill] sm:$0xff]  ;;  %v8980_v56 = vld [vmem:[#allocation102_spill] sm:$0xff] }
 0x8e5   :  { %v4859_v24 = vmul.f32 -1.442695, %v4227_v25  ;;  %5910 = vmatprep.subr.bf16.mxu0 %v8817_v54  ;;  %5942 = vmatprep.subr.bf16.mxu1 %v8818_v49  ;;  %v4860_v54 = vmul.f32 -1.442695, %v4228_v23 }
 0x8e6   :  { %6397 = vpow2.f32 %v4858_v57 }
 0x8e7   :  { %6399 = vpow2.f32 %v4859_v24 }
 0x8e8   :  { %5912 = vmatpush1.bf16.msra.mxu0 %v8820_v60  ;;  %5944 = vmatpush1.bf16.msra.mxu1 %v8821_v63  ;;  %6401 = vtanh.f32 %v4229_v46  ;;  %v8984_v63 = vld [vmem:[#allocation106_spill] sm:$0xff] }
 0x8e9   :  { %5914 = vmatprep.subr.bf16.mxu0 %v8948_v52  ;;  %5946 = vmatprep.subr.bf16.mxu1 %v8977_v43  ;;  %v8985_v52 = vld [vmem:[#allocation107_spill] sm:$0xff]  ;;  %6403 = vpow2.f32 %v4860_v54 }
 0x8ec   :  { %5916 = vmatpush1.bf16.msra.mxu0 %v8978_v61  ;;  %5948 = vmatpush1.bf16.msra.mxu1 %v8979_v38 }
 0x8ed   :  { %5918 = vmatprep.subr.bf16.mxu0 %v8980_v56  ;;  %5950 = vmatprep.subr.bf16.mxu1 %v8981_v18 }
 0x8f0   :  { %v6398_v49 = vpop.eup %6397  ;;  %5920 = vmatpush1.bf16.msra.mxu0 %v8982_v47  ;;  %5952 = vmatpush1.bf16.msra.mxu1 %v8983_v13 }
 0x8f1   :  { %v4239_v60 = vadd.f32 1.0, %v6398_v49  ;;  %5922 = vmatprep.subr.bf16.mxu0 %v8984_v63  ;;  %5954 = vmatprep.subr.bf16.mxu1 %v8985_v52  ;;  %v6400_v4 = vpop.eup %6399 }
 0x8f2   :  { %v4240_v41 = vadd.f32 1.0, %v6400_v4  ;;  %v6402_v6 = vpop.eup %6401 }
 0x8f3   :  { %6405 = vrcp.f32 %v4239_v60  ;;  %v6404_v39 = vpop.eup %6403 }
 0x8f4   :  { %5924 = vmatpush1.bf16.msra.mxu0 %v8986_v7  ;;  %5956 = vmatpush1.bf16.msra.mxu1 %v8987_v36  ;;  %6407 = vrcp.f32 %v4240_v41 }
 0x8f5   :  { %5926 = vmatprep.subr.bf16.mxu0 %v8988_v33  ;;  %5958 = vmatprep.subr.bf16.mxu1 %v8961_v34 }
 0x8f8   :  { %5928 = vmatpush1.bf16.msra.mxu0 %v8962_v11  ;;  %5960 = vmatpush1.bf16.msra.mxu1 %v8963_v26  ;;  %v4241_v11 = vadd.f32 1.0, %v6404_v39 }
 0x8f9   :  { %5930 = vmatprep.subr.bf16.mxu0 %v8964_v50  ;;  %5962 = vmatprep.subr.bf16.mxu1 %v8965_v22 }
 0x8fa   :  { %6409 = vrcp.f32 %v4241_v11 }
 0x8fc   :  { %5932 = vmatpush1.bf16.msra.mxu0 %v8966_v19  ;;  %5964 = vmatpush1.bf16.msra.mxu1 %v8967_v10  ;;  %v6029_v10 = vld [vmem:[#allocation7] sm:$0xff]  }
 0x8fd   :  { %v6406_v37 = vpop.eup %6405  ;;  %4901 = vmatprep.subr.bf16.mxu0 %v8814_v12  ;;  %4921 = vmatprep.subr.bf16.mxu1 %v8814_v12 }
 0x8fe   :  { %v4250_v34 = vmul.f32 %v6406_v37, %v6402_v6  ;;  %v6408_v8 = vpop.eup %6407  ;;  %v6043_v37 = vld [vmem:[#allocation9 + $0x30] sm:$0xff]  }
 0x8ff   :  { %v4249_v26 = vmul.f32 %v6408_v8, %v8989_v0  ;;  %v4864_v8 = vld [vmem:[%s8206_s8] ss:$0 sm:$0xff] }
 0x901   :  { %v8165_v28 = vadd.f32 %v4250_v34, %v4249_v26  ;;  %v6044_v34 = vld [vmem:[#allocation9 + $0x38] sm:$0xff]  }
 0x903   :  { %6411 = vtanh.f32 %v8165_v28 }
 0x904   :  { %v6410_v50 = vpop.eup %6409 }
 0x90d   :  { %v6412_v22 = vpop.eup %6411 }
 0x90e   :  { %v4253_v19 = vmul.f32 %v6412_v22, %v6410_v50 }
 0x910   :  { %4412 = vmatmul.mubr.f32.vlgmr.msra.gmra.mrb[62].mxu0 %v4253_v19  ;;  %4483 = vmatmul.mubr.f32.vlgmr.msra.gmra.mrb[62].mxu1 %v4253_v19 }
 0x911   :  { %4902 = vmatpush3.bf16.msra.mxu0 %v6029_v10  ;;  %4917 = vmatprep.mubr.msk.bf16.mxu0 %vm6627_vm3, %v8814_v12  ;;  %v4873_v10 = vld [vmem:[%s8208_s10] ss:$0 sm:$0xff] }
 0x912   :  { %4903 = vmatprep.subr.bf16.mxu0 %v8814_v12  ;;  %4937 = vmatprep.mubr.msk.bf16.mxu1 %vm6627_vm3, %v8814_v12 }
 0x913   :  { %4922 = vmatpush3.bf16.msra.mxu1 %v6037_v29 }
 0x914   :  { %4923 = vmatprep.subr.bf16.mxu1 %v8814_v12 }
 0x915   :  { %4904 = vmatpush3.bf16.msra.mxu0 %v6030_v31 }
 0x916   :  { %4905 = vmatprep.subr.bf16.mxu0 %v8814_v12 }
 0x917   :  { %4924 = vmatpush3.bf16.msra.mxu1 %v6038_v58 }
 0x918   :  { %4925 = vmatprep.subr.bf16.mxu1 %v8814_v12 }
 0x919   :  { %4906 = vmatpush3.bf16.msra.mxu0 %v6031_v16 }
 0x91a   :  { %4907 = vmatprep.subr.bf16.mxu0 %v8814_v12 }
 0x91b   :  { %4926 = vmatpush3.bf16.msra.mxu1 %v6039_v17 }
 0x91c   :  { %4927 = vmatprep.subr.bf16.mxu1 %v8814_v12 }
 0x91d   :  { %4908 = vmatpush3.bf16.msra.mxu0 %v6032_v32 }
 0x91e   :  { %4909 = vmatprep.subr.bf16.mxu0 %v8814_v12 }
 0x91f   :  { %4928 = vmatpush3.bf16.msra.mxu1 %v6040_v45 }
 0x920   :  { %4929 = vmatprep.subr.bf16.mxu1 %v8814_v12 }
 0x921   :  { %4910 = vmatpush3.bf16.msra.mxu0 %v6033_v2 }
 0x922   :  { %4911 = vmatprep.subr.bf16.mxu0 %v8814_v12 }
 0x923   :  { %4930 = vmatpush3.bf16.msra.mxu1 %v6041_v5 }
 0x924   :  { %4931 = vmatprep.subr.bf16.mxu1 %v8814_v12 }
 0x925   :  { %4912 = vmatpush3.bf16.msra.mxu0 %v6034_v59 }
 0x926   :  { %4913 = vmatprep.subr.bf16.mxu0 %v8814_v12 }
 0x927   :  { %4932 = vmatpush3.bf16.msra.mxu1 %v6042_v55 }
 0x928   :  { %4933 = vmatprep.subr.bf16.mxu1 %v8814_v12 }
 0x929   :  { %4914 = vmatpush3.bf16.msra.mxu0 %v6035_v15 }
 0x92a   :  { %4915 = vmatprep.subr.bf16.mxu0 %v8814_v12 }
 0x92b   :  { %4934 = vmatpush3.bf16.msra.mxu1 %v6043_v37 }
 0x92c   :  { %4935 = vmatprep.subr.bf16.mxu1 %v8814_v12 }
 0x92d   :  { %4916 = vmatpush3.bf16.msra.mxu0 %v6036_v1 }
 0x92f   :  { %4936 = vmatpush3.bf16.msra.mxu1 %v6044_v34 }
 0x9b2   :  { %v4299_v3 = vpop.f32.mrb[64].mxu0  ;;  %v4340_v48 = vpop.f32.mrb[64].mxu1 }
 0x9b3   :  { %v4301_v27 = vpop.f32.mrb[65].mxu0  ;;  %v4342_v51 = vpop.f32.mrb[65].mxu1  ;;  %v4300_v42 = vadd.f32 %v4299_v3, %v8935_v9  ;;  %v4341_v23 = vadd.f32 %v4340_v48, %v7228_v20 }
 0x9b4   :  { %v4303_v14 = vpop.f32.mrb[66].mxu0  ;;  %v4344_v35 = vpop.f32.mrb[66].mxu1  ;;  %v4302_v53 = vadd.f32 %v4301_v27, %v8936_v40  ;;  %v4343_v30 = vadd.f32 %v4342_v51, %v8937_v21 }
 0x9b5   :  { %v4304_v44 = vpop.f32.mrb[67].mxu0  ;;  %v4345_v62 = vpop.f32.mrb[67].mxu1 }
 0x9e3   :  { %v4413_v25 = vpop.f32.mrb[62].mxu0  ;;  %v4484_v46 = vpop.f32.mrb[62].mxu1 }
 0x9e4   :  { %v4489_v57 = vadd.f32 %v4413_v25, %v4300_v42  ;;  %v4491_v24 = vadd.f32 %v4484_v46, %v4341_v23  ;;  %v4415_v43 = vpop.f32.mrb[63].mxu0  ;;  %v4486_v61 = vpop.f32.mrb[63].mxu1 }
 0x9e5   :  { %v4490_v38 = vadd.f32 %v4415_v43, %v4302_v53  ;;  %v4492_v56 = vadd.f32 %v4486_v61, %v4343_v30 }
 0x9e6   :  { %v4861_v18 = vmul.f32 -1.442695, %v4489_v57  ;;  %v4863_v49 = vmul.f32 -1.442695, %v4491_v24 }
 0x9e7   :  { %v4862_v54 = vmul.f32 -1.442695, %v4490_v38 }
 0x9e8   :  { %6413 = vpow2.f32 %v4861_v18 }
 0x9e9   :  { %6415 = vpow2.f32 %v4862_v54 }
 0x9ea   :  { %6417 = vtanh.f32 %v4492_v56 }
 0x9eb   :  { %6419 = vpow2.f32 %v4863_v49 }
 0x9f2   :  { %v6414_v9 = vpop.eup %6413 }
 0x9f3   :  { %v4502_v47 = vadd.f32 1.0, %v6414_v9  ;;  %v6416_v20 = vpop.eup %6415 }
 0x9f4   :  { %v4503_v40 = vadd.f32 1.0, %v6416_v20  ;;  %v6418_v21 = vpop.eup %6417 }
 0x9f5   :  { %6421 = vrcp.f32 %v4502_v47  ;;  %v6420_v13 = vpop.eup %6419 }
 0x9f6   :  { %6423 = vrcp.f32 %v4503_v40  ;;  %v4504_v4 = vadd.f32 1.0, %v6420_v13 }
 0x9f8   :  { %6425 = vrcp.f32 %v4504_v4 }
 0x9ff   :  { %v6422_v60 = vpop.eup %6421 }
 0xa00   :  { %v4513_v63 = vmul.f32 %v6422_v60, %v6418_v21  ;;  %v6424_v52 = vpop.eup %6423 }
 0xa01   :  { %v4512_v41 = vmul.f32 %v6424_v52, %v8165_v28 }
 0xa02   :  { %v6426_v36 = vpop.eup %6425 }
 0xa03   :  { %v4514_v7 = vadd.f32 %v4513_v63, %v4512_v41 }
 0xa05   :  { %6427 = vtanh.f32 %v4514_v7 }
 0xa0f   :  { %v6428_v33 = vpop.eup %6427 }
 0xa10   :  { %v4516_v6 = vmul.f32 %v6428_v33, %v6426_v36 }
 0xa12   :  { %v4517_v39 = vpack.c.bf16 %v4516_v6, %v4516_v6 }
 0xa14   :  { %4918 = vmatmul.mubr.bf16.vlgmr.msra.gmra.mrb[68].mxu0 %v4517_v39 }
 0xae7   :  { %v4623_v11 = vpop.f32.mrb[68].mxu0 }
 0xae8   :  { %v4624_v0 = vadd.f32 %v4864_v8, %v4623_v11  ;;  %v4919_v26 = vpop.f32.mrb[69].mxu0 }
 0xae9   :  { %v4626_v28 = vpop.f32.mrb[70].mxu0 }
 0xaea   :  { %v4629_v50 = vmax.f32 %v4624_v0, 0.0  ;;  %v4920_v22 = vpop.f32.mrb[71].mxu0 }
 0xaec   :  { %v4630_v19 = vpack.c.bf16 %v4629_v50, %v4629_v50 }
 0xaee   :  { %4938 = vmatmul.mubr.bf16.vlgmr.msra.gmra.mrb[68].mxu1 %v4630_v19 }
 0xbc1   :  { %v4736_v31 = vpop.f32.mrb[68].mxu1 }
 0xbc2   :  { %v4737_v12 = vadd.f32 %v4873_v10, %v4736_v31  ;;  %v4939_v16 = vpop.f32.mrb[69].mxu1 }
 0xbc3   :  { %v4739_v32 = vpop.f32.mrb[70].mxu1 }
 0xbc4   :  { %v4882_v2 = vmul.f32 -1.442695, %v4737_v12  ;;  %v4940_v59 = vpop.f32.mrb[71].mxu1 }
 0xbc6   :  { %6429 = vpow2.f32 %v4882_v2 }
 0xbd0   :  { %v6430_v15 = vpop.eup %6429 }
 0xbd1   :  { %v4745_v1 = vadd.f32 1.0, %v6430_v15 }
 0xbd3   :  { %6431 = vrcp.f32 %v4745_v1 }
 0xbdd   :  { %v6432_v29 = vpop.eup %6431 }
 0xbde   :  { %4748 = vst [vmem:[%s8209_s11] sm:$0x3] %v6432_v29 }
 0xbdf   :  { %4753 = vsyncpa [#allocation3], 1 }
 0xbe0   :  { %4754 = vsyncpa [#allocation5], 1 }
 0xbe1   :  { %4755 = vsyncpa [#allocation8], 1 }

</bundles_post_ra>
